<compile_context>
chip_gen: v7x
topology: tpu7x:2x2x1
jax: 0.10.0
libtpu: 0.0.40
codegen_flags: <defaults>
</compile_context>

<pallas_src>
import functools

import jax
import jax.numpy as jnp
from jax.experimental import pallas as pl
from jax.experimental.pallas import tpu as pltpu


_MIN_TILE_BYTES = 1 * 1024 * 1024   # don't shrink tiles below this for step count


def _round_up(a, m):
    return ((a + m - 1) // m) * m


def _largest_divisor_at_most(n, cap):
    cap = max(1, min(n, cap))
    for d in range(cap, 0, -1):
        if n % d == 0:
            return d
    return 1


def _vmem_budget():
    """(target_tile_bytes, vmem_limit_bytes) tuned per chip generation."""
    vmem_cap = None
    try:  # config query only -- kernel choice never depends on an exception
        vmem_cap = getattr(pltpu.get_tpu_info(), "vmem_capacity_bytes", None)
    except Exception:
        vmem_cap = None
    if vmem_cap is not None and int(vmem_cap) >= 96 * 1024 * 1024:
        # v5e / v6e: 128 MiB physical VMEM -> bigger tiles amortize the
        # ~0.35us per-step overhead; plenty of double-buffer headroom.
        return 4 * 1024 * 1024, 64 * 1024 * 1024
    # v7x (64 MiB VMEM) or unknown: stay modest.
    return 2 * 1024 * 1024, 32 * 1024 * 1024


def _choose_cb(n, per_chan_vmem_bytes, target_tile_bytes):
    """Fused-channel block size: big tiles, but keep >=8 grid steps for large
    problems so the 'parallel' axis pipelines and shards across v7x's 2 TCs."""
    cb_cap = max(1, target_tile_bytes // per_chan_vmem_bytes)
    steps_cap = max(1, n // 8)
    if steps_cap * per_chan_vmem_bytes >= _MIN_TILE_BYTES:
        cb_cap = min(cb_cap, steps_cap)
    # NOTE: prime / awkward N degrades to Cb=1 (always correct); the H grid
    # axis below restores pipelining depth for those shapes, so we avoid the
    # extra complexity of a cdiv grid with a masked tail block.
    return _largest_divisor_at_most(n, cb_cap)


def _choose_hb(H, per_row_vmem_bytes, target_tile_bytes):
    """H block (multiple of 8 dividing H) when one plane exceeds the budget."""
    hb_cap = max(8, target_tile_bytes // per_row_vmem_bytes)
    best = None
    d = 8
    while d <= min(H, hb_cap):
        if H % d == 0:
            best = d
        d += 8
    if best is None:
        # No 8-aligned divisor: fall back to the whole plane.
        # TODO(synk): pathological (huge plane, H with no multiple-of-8
        # divisor) shapes may exceed the VMEM budget here.
        best = H
    return best


def _rows_for_y(x_ref, y, *, k, Hb, W, Cb, strided, whole):
    """(Cb, Hb, k*W) = input rows h*k+y for all h in the block."""
    if strided:
        # Sublane-strided load (minor stride 1) -- supported by Mosaic and the
        # cheapest way to do the y de-interleave (load slot, not XLU).
        return x_ref[:, pl.ds(y, Hb, stride=k), :]
    # Packed dtypes (bf16/int8): de-interleave y in-register instead.
    return whole[:, :, y, :]


def _unshuffle_kernel_slab(x_ref, o_ref, *, k, Hb, W, Cb, strided):
    # x_ref: (Cb, k*Hb, k*W)   o_ref: (Cb, k*k, Hb, W)
    whole = None
    if not strided:
        whole = x_ref[...].reshape(Cb, Hb, k, k * W)
    for y in range(k):  # k is tiny and static -> unrolled
        rows = _rows_for_y(x_ref, y, k=k, Hb=Hb, W=W, Cb=Cb,
                           strided=strided, whole=whole)
        # Lane de-interleave of x (column j = w*k + x).  A lane-strided pl.ds
        # does not lower (minor stride must be 1), so this stays a single
        # reshape+transpose per y, feeding a dense full-(Hb,W)-slab store.
        t = rows.reshape(Cb, Hb, W, k)
        t = jnp.transpose(t, (0, 3, 1, 2))              # (Cb, k, Hb, W)
        # Leading-dim slice only: every store covers full (Hb, W) tiles.
        o_ref[:, y * k:(y + 1) * k, :, :] = t


def _unshuffle_kernel_flat(x_ref, o_ref, *, k, H, W, Cb, strided):
    # x_ref: (Cb, k*H, k*W)   o_ref: (Cb, k*k, H*W)   (small / unaligned W)
    whole = None
    if not strided:
        whole = x_ref[...].reshape(Cb, H, k, k * W)
    planes = []
    for y in range(k):
        rows = _rows_for_y(x_ref, y, k=k, Hb=H, W=W, Cb=Cb,
                           strided=strided, whole=whole)
        t = rows.reshape(Cb, H, W, k)
        t = jnp.transpose(t, (0, 3, 1, 2))              # (Cb, k, H, W)
        planes.append(t.reshape(Cb, k, H * W))
    # Assemble the whole block in registers and issue a single store.
    o_ref[...] = jnp.concatenate(planes, axis=1)        # (Cb, k*k, H*W)


def pixel_unshuffle_pallas(x, downscale_factor):
    """(B, C, k*H, k*W) -> (B, C*k*k, H, W), matching the PyTorch module."""
    k = int(downscale_factor)
    if k == 1:
        return x  # identity
    B, C, HH, WW = x.shape
    if HH % k or WW % k:
        raise ValueError("spatial dims must be divisible by downscale_factor")
    H, W = HH // k, WW // k
    N = B * C

    dtype = x.dtype
    itemsize = jnp.dtype(dtype).itemsize
    # Sublane-strided loads are only used for unpacked 32-bit dtypes; packed
    # dtypes (bf16/int8) take the in-register y de-interleave path (static
    # selection -- no runtime fallback).
    strided = (itemsize == 4)

    target_tile, vmem_limit = _vmem_budget()
    bytes_accessed = 2 * x.size * itemsize
    cost = pl.CostEstimate(flops=0, transcendentals=0,
                           bytes_accessed=bytes_accessed)

    x3 = x.reshape(N, HH, WW)                     # free (contiguous) reshape

    # Padded (VMEM-resident) sizes -- used for all tile-budget math.
    in_plane_vmem = _round_up(HH, 8) * _round_up(WW, 128) * itemsize

    # Layout decision rule: W in lanes (4-D output) only when W is lane
    # friendly; otherwise merge H*W into lanes so stores stay lane-dense.
    use_4d = (W % 128 == 0) or (W >= 512)
    if not use_4d:
        flat_out_vmem = _round_up(k * k, 8) * _round_up(H * W, 128) * itemsize
        if in_plane_vmem + flat_out_vmem > target_tile:
            # Huge plane with unaligned W: accept lane padding to get the
            # H-blocked path (VMEM safety beats store efficiency here).
            use_4d = True

    if use_4d:
        out_plane_vmem = k * k * _round_up(H, 8) * _round_up(W, 128) * itemsize
        per_chan = in_plane_vmem + out_plane_vmem
        if per_chan <= target_tile:
            Hb = H
            Cb = _choose_cb(N, per_chan, target_tile)
        else:
            # Single plane exceeds the budget -> block over H (also rescues
            # small-N inputs such as B=1, C=3 image preprocessing).
            Cb = 1
            per_row = (k * _round_up(WW, 128)
                       + k * k * _round_up(W, 128)) * itemsize
            Hb = _choose_hb(H, per_row, target_tile)

        kernel = functools.partial(_unshuffle_kernel_slab, k=k, Hb=Hb, W=W,
                                   Cb=Cb, strided=strided)
        out = pl.pallas_call(
            kernel,
            out_shape=jax.ShapeDtypeStruct((N, k * k, H, W), dtype),
            grid=(N // Cb, H // Hb),
            in_specs=[pl.BlockSpec((Cb, k * Hb, WW),
                                   lambda ci, hi: (ci, hi, 0))],
            out_specs=pl.BlockSpec((Cb, k * k, Hb, W),
                                   lambda ci, hi: (ci, 0, hi, 0)),
            compiler_params=pltpu.CompilerParams(
                dimension_semantics=("parallel", "parallel"),
                vmem_limit_bytes=vmem_limit),
            cost_estimate=cost,
        )(x3)
    else:
        flat_out_vmem = _round_up(k * k, 8) * _round_up(H * W, 128) * itemsize
        per_chan = in_plane_vmem + flat_out_vmem
        Cb = _choose_cb(N, per_chan, target_tile)

        kernel = functools.partial(_unshuffle_kernel_flat, k=k, H=H, W=W,
                                   Cb=Cb, strided=strided)
        out = pl.pallas_call(
            kernel,
            out_shape=jax.ShapeDtypeStruct((N, k * k, H * W), dtype),
            grid=(N // Cb,),
            in_specs=[pl.BlockSpec((Cb, HH, WW), lambda ci: (ci, 0, 0))],
            out_specs=pl.BlockSpec((Cb, k * k, H * W), lambda ci: (ci, 0, 0)),
            compiler_params=pltpu.CompilerParams(
                dimension_semantics=("parallel",),
                vmem_limit_bytes=vmem_limit),
            cost_estimate=cost,
        )(x3)

    return out.reshape(B, C * k * k, H, W)        # free (contiguous) reshape


class PixelUnShuffle:
    def __init__(self, downscale_factor):
        self.downscale_factor = downscale_factor

    def __call__(self, x):
        return pixel_unshuffle_pallas(x, self.downscale_factor)


def _reference(x, k):
    # Pure-JAX reference matching F.conv2d(input, one_hot_kernel, stride=k, groups=C)
    B, C, HH, WW = x.shape
    H, W = HH // k, WW // k
    t = x.reshape(B, C, H, k, W, k)
    t = jnp.transpose(t, (0, 1, 3, 5, 2, 4))      # (B, C, y, x, H, W)
    return t.reshape(B, C * k * k, H, W)


if __name__ == "__main__":
    key = jax.random.PRNGKey(0)
    k1, k2, k3 = jax.random.split(key, 3)
    mod = PixelUnShuffle(downscale_factor=2)

    # 1) Small / unaligned W -> lane-merged output path.
    x1 = jax.random.normal(k1, (2, 4, 16, 16), dtype=jnp.float32)
    o1 = jax.block_until_ready(mod(x1))
    assert o1.shape == (2, 16, 8, 8), o1.shape
    assert jnp.allclose(o1, _reference(x1, 2)), "mismatch (lane-merged path)"

    # 2) Lane-aligned W (W % 128 == 0) -> 4-D dense-slab path, fused channels.
    x2 = jax.random.normal(k2, (2, 3, 32, 256), dtype=jnp.float32)
    o2 = jax.block_until_ready(mod(x2))
    assert o2.shape == (2, 12, 16, 128), o2.shape
    assert jnp.allclose(o2, _reference(x2, 2)), "mismatch (4D slab path)"

    # 3) Plane larger than the tile budget -> 4-D path with H grid blocking.
    x3 = jax.random.normal(k3, (1, 1, 8192, 256), dtype=jnp.float32)
    o3 = jax.block_until_ready(mod(x3))
    assert o3.shape == (1, 4, 4096, 128), o3.shape
    assert jnp.allclose(o3, _reference(x3, 2)), "mismatch (H-blocked path)"

    print("KERNEL_OK")
</pallas_src>

<mosaic_0001>
module attributes {stable_mosaic.version = 11 : i64} {
  func.func @_unshuffle_kernel_flat(%arg0: i32, %arg1: memref<8x16x16xf32, #tpu.memory_space<vmem>>, %arg2: memref<8x4x64xf32, #tpu.memory_space<vmem>>) attributes {dimension_semantics = [#tpu.dimension_semantics<parallel>], iteration_bounds = array<i64: 1>, scalar_prefetch = 0 : i64, scratch_operands = 0 : i64, tpu.core_type = #tpu.core_type<tc>, window_params = [{transform_indices = @transform_0, window_bounds = array<i64: 8, 16, 16>}, {transform_indices = @transform_1, window_bounds = array<i64: 8, 4, 64>}]} {
    %c0 = arith.constant 0 : index
    %c0_0 = arith.constant 0 : index
    %c0_1 = arith.constant 0 : index
    %0 = tpu.strided_load %arg1[%c0, %c0_0, %c0_1] {strides = array<i32: 1, 2, 1>} : memref<8x16x16xf32, #tpu.memory_space<vmem>>, vector<8x8x16xf32>
    %1 = vector.shape_cast %0 : vector<8x8x16xf32> to vector<8x8x8x2xf32>
    %2 = tpu.transpose %1, [0, 3, 1, 2] : vector<8x8x8x2xf32> -> vector<8x2x8x8xf32>
    %3 = vector.shape_cast %2 : vector<8x2x8x8xf32> to vector<8x2x64xf32>
    %c0_2 = arith.constant 0 : index
    %c1 = arith.constant 1 : index
    %c0_3 = arith.constant 0 : index
    %4 = tpu.strided_load %arg1[%c0_2, %c1, %c0_3] {strides = array<i32: 1, 2, 1>} : memref<8x16x16xf32, #tpu.memory_space<vmem>>, vector<8x8x16xf32>
    %5 = vector.shape_cast %4 : vector<8x8x16xf32> to vector<8x8x8x2xf32>
    %6 = tpu.transpose %5, [0, 3, 1, 2] : vector<8x8x8x2xf32> -> vector<8x2x8x8xf32>
    %7 = vector.shape_cast %6 : vector<8x2x8x8xf32> to vector<8x2x64xf32>
    %8 = tpu.concatenate %3, %7 in 1 : vector<8x2x64xf32>, vector<8x2x64xf32> -> vector<8x4x64xf32>
    %c0_4 = arith.constant 0 : index
    %c0_5 = arith.constant 0 : index
    %c0_6 = arith.constant 0 : index
    %9 = vector.load %arg2[%c0_4, %c0_5, %c0_6] : memref<8x4x64xf32, #tpu.memory_space<vmem>>, vector<8x4x64xf32>
    tpu.vector_store %arg2[%c0_4, %c0_5, %c0_6], %8 {strides = array<i32>} : memref<8x4x64xf32, #tpu.memory_space<vmem>>, vector<8x4x64xf32>,
    return
  }
  func.func @transform_0(%arg0: i32) -> (i32, i32, i32) {
    %c0_i32 = arith.constant 0 : i32
    %c0_i32_0 = arith.constant 0 : i32
    %c0_i32_1 = arith.constant 0 : i32
    return %arg0, %c0_i32, %c0_i32_0 : i32, i32, i32
  }
  func.func @transform_1(%arg0: i32) -> (i32, i32, i32) {
    %c0_i32 = arith.constant 0 : i32
    %c0_i32_0 = arith.constant 0 : i32
    %c0_i32_1 = arith.constant 0 : i32
    return %arg0, %c0_i32, %c0_i32_0 : i32, i32, i32
  }
}

</mosaic_0001>

<bundles_post_ra>
// kernel: tpu_custom_call.1
= control target key start
LH: loop header
LB: loop body
LE: loop exit
PB: predicated region body
PF: predicated region fallthrough
CT: control target
= control target key end

     0   :  { %6 = vsyncpa [#allocation3], 0  ;;  %s11382_s0 = inlined_call_operand.hbm [shape: f32[8,16,16], index: 0, kind: input, shape index: {}]   ;;  %s11383_s1 = inlined_call_operand.hbm [shape: f32[8,4,64], index: 1, kind: output, shape index: {}]  }
   0x1   :  { %7 = vsyncpa [#allocation4], 0  ;;  %s9246_s6 = smov [#allocation2]   ;;  %s9198_s10 = scalar_lea.hbm %s11382_s0, 2048 }
   0x2   :  { %s13_s7 = sshll.u32 %s9246_s6, 4  ;;  %p9199_p0 = scmp.ne.s32.totalorder %s11382_s0, %s9198_s10  ;;  %s14_s7 = int_to_ptr.vmem [resolvable:$true] %s13_s7 }
   0x3   :  { %p9202_p1 = scmp.lt.u32.totalorder %s9198_s10, %s11382_s0 }
   0x5   :  { %p9204_p2 = pnand %p9202_p1, %p9199_p0 }
   0x7   :  { %9207 = shalt.err (!%p9204_p2)
}
   0x8   :  { %s9208_s15 = scalar_lea.vmem %s14_s7, 2048  ;;  %p9213_p4 = scmp.lt.s32.totalorder %s14_s7, %s14_s7 }
   0x9   :  { %p9209_p3 = scmp.ne.s32.totalorder %s14_s7, %s9208_s15  ;;  %p9214_p5 = scmp.lt.s32.totalorder %s9208_s15, %s9208_s15 }
   0xb   :  { %p9215_p6 = por %p9214_p5, %p9213_p4 }
   0xd   :  { %p9216_p7 = pnand %p9215_p6, %p9209_p3 }
   0xf   :  { %9219 = shalt.err (!%p9216_p7)
}
  0x10   :  { %s9247_s16 = smov 128   ;;  %s9248_s17 = smov 8  }
  0x11   :  { %19 = dma.hbm_to_vmem [thread:$0]  %s11382_s0, 2048, %s14_s7, [#allocation3], %s9247_s16, %s9247_s16, %s9248_s17  }
  0x12   :  { %9242 = dma.done.wait [#allocation3], 2048  }
  0x13   :  { %9243 = vsyncadd [#allocation3], 4294965248  ;;  %v9291_v0 = vld [vmem:[#allocation2 + $0x20] ss:$2 sm:$0xff]  ;;  %s9249_s20 = smov 126   ;;  %s9250_s0 = smov 124   ;;  %v219_v54 = vlaneseq }
  0x14   :  { %v9293_v1 = vld [vmem:[#allocation2] ss:$2 sm:$0xff]  ;;  %50 = vrot.lane.b32.xlu1 %v9291_v0, %s9249_s20  ;;  %v9299_v2 = vld [vmem:[#allocation2 + $0x30] ss:$2 sm:$0xff]  ;;  %s9251_s21 = smov 122   ;;  %s9252_s22 = smov 120  }
  0x15   :  { %46 = vrot.lane.b32.xlu0 %v9293_v1, %s9249_s20  ;;  %v9301_v3 = vld [vmem:[#allocation2 + $0x10] ss:$2 sm:$0xff]  ;;  %v9309_v5 = vld [vmem:[#allocation2 + $0x40] ss:$2 sm:$0xff]  ;;  %s9253_s23 = smov 118   ;;  %s9254_s24 = smov 116  }
  0x16   :  { %v9307_v4 = vld [vmem:[#allocation2 + $0x50] ss:$2 sm:$0xff]  ;;  %v9317_v7 = vld [vmem:[#allocation2 + $0x60] ss:$2 sm:$0xff]  ;;  %s9255_s25 = smov 114   ;;  %v220_v58 = vshrl.u32 %v219_v54, 7 }
  0x17   :  { %v9315_v6 = vld [vmem:[#allocation2 + $0x70] ss:$2 sm:$0xff]  ;;  %11424 = vst [vmem:[#allocation9_spill] sm:$0xff] %v9317_v7  ;;  %v9256_v52 = vmov 1983009808   ;;  %s9259_s26 = smov 16  }
  0x18   :  { %52 = vrot.lane.b32.xlu1 %v9299_v2, %s9249_s20  ;;  %11423 = vst [vmem:[#allocation8_spill] sm:$0xff] %v9315_v6  ;;  %v217_v53 = vunpack.c.l.s4 %v9256_v52  ;;  %v9257_v62 = vmov 1934713408   ;;  %s9260_s27 = smov 24   ;;  %s9261_s28 = smov 32   ;;  %vm4502_vm0 = vcmask 64512  }
  0x19   :  { %48 = vrot.lane.b32.xlu0 %v9301_v3, %s9249_s20  ;;  %v281_v63 = vunpack.c.l.s4 %v9257_v62  ;;  %s9262_s29 = smov 40   ;;  %s9263_s30 = smov 48   ;;  %vm4511_vm1 = vcmask 130048   ;;  %vm4520_vm2 = vcmask 195584   ;;  %vm4529_vm3 = vcmask 261120  }
  0x1a   :  { %v218_v57 = vunpack.c.0.s8 %v217_v53  ;;  %s9264_s2 = smov 56   ;;  %vm4538_vm4 = vcmask 326656   ;;  %vm4547_vm5 = vcmask 392192   ;;  %vm4556_vm6 = vcmask 457728   ;;  %s9265_s3 = smov [#allocation5]  }
  0x1b   :  { %vm9125_vm7 = vcmask 1041408   ;;  %vm9134_vm8 = vcmask 519168   ;;  %s9148_s4 = sshll.u32 %s9265_s3, 4  ;;  %s9149_s4 = int_to_ptr.vmem [resolvable:$true] %s9148_s4 }
  0x1c   :  { %56 = vrot.lane.b32.xlu1 %v9307_v4, %s9249_s20  ;;  %s9220_s5 = scalar_lea.vmem %s9149_s4, 512  ;;  %p9225_p9 = scmp.lt.s32.totalorder %s9149_s4, %s9149_s4 }
  0x1d   :  { %54 = vrot.lane.b32.xlu0 %v9309_v5, %s9249_s20  ;;  %p9221_p8 = scmp.ne.s32.totalorder %s9149_s4, %s9220_s5  ;;  %p9226_p10 = scmp.lt.s32.totalorder %s9220_s5, %s9220_s5 }
  0x1f   :  { %p9227_p11 = por %p9226_p10, %p9225_p9 }
  0x20   :  { %60 = vrot.lane.b32.xlu1 %v9315_v6, %s9249_s20 }
  0x21   :  { %58 = vrot.lane.b32.xlu0 %v9317_v7, %s9249_s20  ;;  %p9228_p12 = pnand %p9227_p11, %p9221_p8 }
  0x24   :  { %72 = vrot.lane.b32.xlu1 %v9301_v3, %s9250_s0 }
  0x25   :  { %70 = vrot.lane.b32.xlu0 %v9293_v1, %s9250_s0 }
  0x28   :  { %76 = vrot.lane.b32.xlu1 %v9299_v2, %s9250_s0 }
  0x29   :  { %74 = vrot.lane.b32.xlu0 %v9291_v0, %s9250_s0 }
  0x2c   :  { %80 = vrot.lane.b32.xlu1 %v9307_v4, %s9250_s0 }
  0x2d   :  { %78 = vrot.lane.b32.xlu0 %v9309_v5, %s9250_s0 }
  0x30   :  { %84 = vrot.lane.b32.xlu1 %v9315_v6, %s9250_s0 }
  0x31   :  { %82 = vrot.lane.b32.xlu0 %v9317_v7, %s9250_s0 }
  0x34   :  { %96 = vrot.lane.b32.xlu1 %v9301_v3, %s9251_s21 }
  0x35   :  { %94 = vrot.lane.b32.xlu0 %v9293_v1, %s9251_s21 }
  0x38   :  { %100 = vrot.lane.b32.xlu1 %v9299_v2, %s9251_s21 }
  0x39   :  { %98 = vrot.lane.b32.xlu0 %v9291_v0, %s9251_s21 }
  0x3c   :  { %104 = vrot.lane.b32.xlu1 %v9307_v4, %s9251_s21 }
  0x3d   :  { %102 = vrot.lane.b32.xlu0 %v9309_v5, %s9251_s21 }
  0x40   :  { %108 = vrot.lane.b32.xlu1 %v9315_v6, %s9251_s21 }
  0x41   :  { %106 = vrot.lane.b32.xlu0 %v9317_v7, %s9251_s21 }
  0x44   :  { %120 = vrot.lane.b32.xlu1 %v9301_v3, %s9252_s22 }
  0x45   :  { %118 = vrot.lane.b32.xlu0 %v9293_v1, %s9252_s22 }
  0x48   :  { %124 = vrot.lane.b32.xlu1 %v9299_v2, %s9252_s22 }
  0x49   :  { %122 = vrot.lane.b32.xlu0 %v9291_v0, %s9252_s22 }
  0x4c   :  { %128 = vrot.lane.b32.xlu1 %v9307_v4, %s9252_s22 }
  0x4d   :  { %126 = vrot.lane.b32.xlu0 %v9309_v5, %s9252_s22 }
  0x50   :  { %132 = vrot.lane.b32.xlu1 %v9315_v6, %s9252_s22 }
  0x51   :  { %130 = vrot.lane.b32.xlu0 %v9317_v7, %s9252_s22 }
  0x54   :  { %144 = vrot.lane.b32.xlu1 %v9301_v3, %s9253_s23 }
  0x55   :  { %142 = vrot.lane.b32.xlu0 %v9293_v1, %s9253_s23 }
  0x58   :  { %148 = vrot.lane.b32.xlu1 %v9299_v2, %s9253_s23 }
  0x59   :  { %146 = vrot.lane.b32.xlu0 %v9291_v0, %s9253_s23 }
  0x5c   :  { %152 = vrot.lane.b32.xlu1 %v9307_v4, %s9253_s23 }
  0x5d   :  { %150 = vrot.lane.b32.xlu0 %v9309_v5, %s9253_s23 }
  0x60   :  { %156 = vrot.lane.b32.xlu1 %v9315_v6, %s9253_s23 }
  0x61   :  { %154 = vrot.lane.b32.xlu0 %v9317_v7, %s9253_s23 }
  0x64   :  { %168 = vrot.lane.b32.xlu1 %v9301_v3, %s9254_s24 }
  0x65   :  { %166 = vrot.lane.b32.xlu0 %v9293_v1, %s9254_s24 }
  0x68   :  { %172 = vrot.lane.b32.xlu1 %v9299_v2, %s9254_s24 }
  0x69   :  { %170 = vrot.lane.b32.xlu0 %v9291_v0, %s9254_s24 }
  0x6c   :  { %176 = vrot.lane.b32.xlu1 %v9307_v4, %s9254_s24 }
  0x6d   :  { %174 = vrot.lane.b32.xlu0 %v9309_v5, %s9254_s24 }
  0x70   :  { %180 = vrot.lane.b32.xlu1 %v9315_v6, %s9254_s24 }
  0x71   :  { %178 = vrot.lane.b32.xlu0 %v9317_v7, %s9254_s24 }
  0x74   :  { %192 = vrot.lane.b32.xlu1 %v9301_v3, %s9255_s25 }
  0x75   :  { %190 = vrot.lane.b32.xlu0 %v9293_v1, %s9255_s25 }
  0x78   :  { %196 = vrot.lane.b32.xlu1 %v9299_v2, %s9255_s25 }
  0x79   :  { %194 = vrot.lane.b32.xlu0 %v9291_v0, %s9255_s25 }
  0x7c   :  { %200 = vrot.lane.b32.xlu1 %v9307_v4, %s9255_s25 }
  0x7d   :  { %198 = vrot.lane.b32.xlu0 %v9309_v5, %s9255_s25 }
  0x80   :  { %204 = vrot.lane.b32.xlu1 %v9315_v6, %s9255_s25 }
  0x81   :  { %202 = vrot.lane.b32.xlu0 %v9317_v7, %s9255_s25 }
  0x86   :  { %v9419_v8 = vpop.permute.xlu1 %50 }
  0x87   :  { %v9421_v9 = vpop.permute.xlu0 %46 }
  0x8a   :  { %v9423_v10 = vpop.permute.xlu1 %52 }
  0x8b   :  { %v9425_v11 = vpop.permute.xlu0 %48 }
  0x8e   :  { %v9427_v12 = vpop.permute.xlu1 %56 }
  0x8f   :  { %v9429_v13 = vpop.permute.xlu0 %54 }
  0x92   :  { %v9431_v14 = vpop.permute.xlu1 %60 }
  0x93   :  { %11425 = vst [vmem:[#allocation10_spill] sm:$0xff] %v9431_v14  ;;  %v9433_v15 = vpop.permute.xlu0 %58 }
  0x94   :  { %11426 = vst [vmem:[#allocation11_spill] sm:$0xff] %v9433_v15 }
  0x96   :  { %v9435_v16 = vpop.permute.xlu1 %72 }
  0x97   :  { %v9437_v17 = vpop.permute.xlu0 %70 }
  0x98   :  { %v214_v52 = vcombine.low %v9293_v1, %v9437_v17 }
  0x9a   :  { %v9439_v18 = vpop.permute.xlu1 %76 }
  0x9b   :  { %v9441_v19 = vpop.permute.xlu0 %74 }
  0x9e   :  { %v9443_v20 = vpop.permute.xlu1 %80 }
  0x9f   :  { %v9445_v21 = vpop.permute.xlu0 %78 }
  0xa2   :  { %v9447_v22 = vpop.permute.xlu1 %84 }
  0xa3   :  { %11427 = vst [vmem:[#allocation12_spill] sm:$0xff] %v9447_v22  ;;  %v9449_v23 = vpop.permute.xlu0 %82  ;;  %v282_v22 = vunpack.c.0.s8 %v281_v63 }
  0xa4   :  { %11428 = vst [vmem:[#allocation13_spill] sm:$0xff] %v9449_v23 }
  0xa6   :  { %v9451_v24 = vpop.permute.xlu1 %96 }
  0xa7   :  { %v95_v25 = vpop.permute.xlu0 %94 }
  0xa8   :  { %v230_v59 = vcombine.low %v9421_v9, %v95_v25  ;;  %v231_v14 = vcombine.high %v9421_v9, %v95_v25 }
  0xaa   :  { %v9453_v26 = vpop.permute.xlu1 %100 }
  0xab   :  { %v9455_v27 = vpop.permute.xlu0 %98 }
  0xae   :  { %v9457_v28 = vpop.permute.xlu1 %104 }
  0xaf   :  { %v9459_v29 = vpop.permute.xlu0 %102 }
  0xb2   :  { %v9461_v30 = vpop.permute.xlu1 %108 }
  0xb3   :  { %11429 = vst [vmem:[#allocation14_spill] sm:$0xff] %v9461_v30  ;;  %v9463_v31 = vpop.permute.xlu0 %106 }
  0xb4   :  { %11430 = vst [vmem:[#allocation15_spill] sm:$0xff] %v9463_v31 }
  0xb6   :  { %v9465_v32 = vpop.permute.xlu1 %120 }
  0xb7   :  { %v119_v33 = vpop.permute.xlu0 %118 }
  0xba   :  { %v9467_v34 = vpop.permute.xlu1 %124 }
  0xbb   :  { %v9469_v35 = vpop.permute.xlu0 %122 }
  0xbe   :  { %v9471_v36 = vpop.permute.xlu1 %128 }
  0xbf   :  { %11431 = vst [vmem:[#allocation16_spill] sm:$0xff] %v9471_v36  ;;  %v9473_v37 = vpop.permute.xlu0 %126 }
  0xc2   :  { %v9475_v38 = vpop.permute.xlu1 %132 }
  0xc3   :  { %11432 = vst [vmem:[#allocation17_spill] sm:$0xff] %v9475_v38  ;;  %v9477_v39 = vpop.permute.xlu0 %130  ;;  %v9508_v38 = vsub.s32 %v218_v57, %v220_v58 }
  0xc4   :  { %11433 = vst [vmem:[#allocation18_spill] sm:$0xff] %v9477_v39 }
  0xc5   :  { %v238_v30 = vrot.slane %v230_v59, %v9508_v38  ;;  %v222_v62 = vrot.slane %v214_v52, %v9508_v38  ;;  %v245_v23 = vrot.slane %v231_v14, %v9508_v38  ;;  %v9522_v59 = vsub.s32 %v282_v22, %v220_v58 }
  0xc6   :  { %v9479_v40 = vpop.permute.xlu1 %144  ;;  %v350_v14 = vcombine.low %v9301_v3, %v9435_v16 }
  0xc7   :  { %v143_v41 = vpop.permute.xlu0 %142 }
  0xc8   :  { %v358_v31 = vrot.slane %v350_v14, %v9508_v38 }
  0xca   :  { %v9481_v42 = vpop.permute.xlu1 %148 }
  0xcb   :  { %v9483_v43 = vpop.permute.xlu0 %146 }
  0xce   :  { %v9485_v44 = vpop.permute.xlu1 %152 }
  0xcf   :  { %v9487_v45 = vpop.permute.xlu0 %150 }
  0xd2   :  { %v9489_v46 = vpop.permute.xlu1 %156 }
  0xd3   :  { %11434 = vst [vmem:[#allocation19_spill] sm:$0xff] %v9489_v46  ;;  %v9491_v47 = vpop.permute.xlu0 %154 }
  0xd4   :  { %11435 = vst [vmem:[#allocation20_spill] sm:$0xff] %v9491_v47 }
  0xd6   :  { %v9493_v48 = vpop.permute.xlu1 %168 }
  0xd7   :  { %v167_v49 = vpop.permute.xlu0 %166 }
  0xd8   :  { %v246_v6 = vcombine.low %v119_v33, %v167_v49  ;;  %v247_v53 = vcombine.high %v119_v33, %v167_v49  ;;  %v278_v49 = vcombine.low %v222_v62, %v238_v30 }
  0xda   :  { %v9495_v50 = vpop.permute.xlu1 %172  ;;  %v254_v25 = vrot.slane %v246_v6, %v9508_v38  ;;  %v261_v33 = vrot.slane %v247_v53, %v9508_v38  ;;  %v382_v6 = vcombine.low %v9465_v32, %v9493_v48  ;;  %v286_v22 = vrot.slane %v278_v49, %v9522_v59 }
  0xdb   :  { %v9497_v51 = vpop.permute.xlu0 %170 }
  0xde   :  { %v9499_v55 = vpop.permute.xlu1 %176 }
  0xdf   :  { %11436 = vst [vmem:[#allocation21_spill] sm:$0xff] %v9499_v55  ;;  %v9501_v56 = vpop.permute.xlu0 %174  ;;  %v390_v55 = vrot.slane %v382_v6, %v9508_v38 }
  0xe2   :  { %v9504_v60 = vpop.permute.xlu1 %180 }
  0xe3   :  { %11437 = vst [vmem:[#allocation22_spill] sm:$0xff] %v9504_v60  ;;  %v9506_v61 = vpop.permute.xlu0 %178  ;;  %v215_v60 = vcombine.high %v9293_v1, %v9437_v17 }
  0xe4   :  { %11438 = vst [vmem:[#allocation23_spill] sm:$0xff] %v9506_v61 }
  0xe5   :  { %v229_v1 = vrot.slane %v215_v60, %v9508_v38  ;;  %v279_v60 = vcombine.high %v222_v62, %v238_v30 }
  0xe6   :  { %v193_v57 = vpop.permute.xlu1 %192 }
  0xe7   :  { %v191_v54 = vpop.permute.xlu0 %190  ;;  %v398_v17 = vcombine.low %v9479_v40, %v193_v57  ;;  %v295_v36 = vcombine.high %v229_v1, %v245_v23  ;;  %v293_v62 = vrot.slane %v279_v60, %v9522_v59  ;;  %v518_v60 = vcombine.low %v9469_v35, %v9497_v51 }
  0xe8   :  { %v262_v46 = vcombine.low %v143_v41, %v191_v54  ;;  %v263_v7 = vcombine.high %v143_v41, %v191_v54 }
  0xe9   :  { %v406_v53 = vrot.slane %v398_v17, %v9508_v38 }
  0xea   :  { %v270_v39 = vrot.slane %v262_v46, %v9508_v38  ;;  %v277_v9 = vrot.slane %v263_v7, %v9508_v38  ;;  %v366_v7 = vcombine.low %v9425_v11, %v9451_v24  ;;  %v294_v46 = vcombine.low %v229_v1, %v245_v23 }
  0xeb   :  { %v367_v23 = vcombine.high %v9425_v11, %v9451_v24  ;;  %v309_v1 = vrot.slane %v295_v36, %v9522_v59  ;;  %v447_v6 = vcombine.high %v390_v55, %v406_v53 }
  0xec   :  { %v310_v41 = vcombine.low %v254_v25, %v270_v39  ;;  %v326_v63 = vcombine.low %v261_v33, %v277_v9  ;;  %v311_v52 = vcombine.high %v254_v25, %v270_v39  ;;  %v327_v54 = vcombine.high %v261_v33, %v277_v9 }
  0xed   :  { %v374_v47 = vrot.slane %v366_v7, %v9508_v38  ;;  %v302_v30 = vrot.slane %v294_v46, %v9522_v59  ;;  %v399_v9 = vcombine.high %v9479_v40, %v193_v57  ;;  %v195_v57 = vpop.permute.xlu0 %194  ;;  %v381_v11 = vrot.slane %v367_v23, %v9508_v38 }
  0xee   :  { %v318_v58 = vrot.slane %v310_v41, %v9522_v59  ;;  %v334_v25 = vrot.slane %v326_v63, %v9522_v59  ;;  %v325_v15 = vrot.slane %v311_v52, %v9522_v59  ;;  %v341_v17 = vrot.slane %v327_v54, %v9522_v59 }
  0xef   :  { %v446_v41 = vcombine.low %v390_v55, %v406_v53  ;;  %v351_v63 = vcombine.high %v9301_v3, %v9435_v16  ;;  %v414_v52 = vcombine.low %v358_v31, %v374_v47  ;;  %v413_v40 = vrot.slane %v399_v9, %v9508_v38 }
  0xf0   :  { %v343_v61 = vcombine.high %v286_v22, %v318_v58  ;;  %v342_v39 = vcombine.low %v286_v22, %v318_v58  ;;  %v347_v33 = vcombine.high %v302_v30, %v334_v25  ;;  %v344_v49 = vcombine.low %v293_v62, %v325_v15 }
  0xf1   :  { %v349_v14 = vcombine.high %v309_v1, %v341_v17  ;;  %v345_v7 = vcombine.high %v293_v62, %v325_v15  ;;  %v454_v46 = vrot.slane %v446_v41, %v9522_v59  ;;  %v365_v3 = vrot.slane %v351_v63, %v9508_v38 }
  0xf2   :  { %1334 = vxpose.xlu1.b32.start.end [1/1] (short) (narrow) %v343_v61, 8  ;;  %1302 = vxpose.xlu0.b32.start.end [1/1] (short) (narrow) %v342_v39, 8  ;;  %v383_v61 = vcombine.high %v9465_v32, %v9493_v48  ;;  %v422_v24 = vrot.slane %v414_v52, %v9522_v59  ;;  %v415_v32 = vcombine.high %v358_v31, %v374_v47 }
  0xf3   :  { %v534_v36 = vcombine.low %v9483_v43, %v195_v57  ;;  %v346_v22 = vcombine.low %v302_v30, %v334_v25  ;;  %v461_v15 = vrot.slane %v447_v6, %v9522_v59  ;;  %v502_v55 = vcombine.low %v9419_v8, %v9455_v27 }
  0xf4   :  { %v397_v16 = vrot.slane %v383_v61, %v9508_v38  ;;  %v479_v48 = vcombine.high %v422_v24, %v454_v46  ;;  %v429_v53 = vrot.slane %v415_v32, %v9522_v59  ;;  %v430_v54 = vcombine.low %v365_v3, %v381_v11 }
  0xf5   :  { %v486_v31 = vcombine.low %v9291_v0, %v9441_v19  ;;  %v542_v47 = vrot.slane %v534_v36, %v9508_v38  ;;  %v348_v25 = vcombine.low %v309_v1, %v341_v17  ;;  %v510_v9 = vrot.slane %v502_v55, %v9508_v38 }
  0xf6   :  { %1462 = vxpose.xlu1.b32.start.end [1/1] (short) (narrow) %v347_v33, 8  ;;  %1366 = vxpose.xlu0.b32.start.end [1/1] (short) (narrow) %v344_v49, 8  ;;  %v462_v58 = vcombine.low %v397_v16, %v413_v40  ;;  %v481_v39 = vcombine.high %v429_v53, %v461_v15  ;;  %v463_v62 = vcombine.high %v397_v16, %v413_v40 }
  0xf7   :  { %v526_v33 = vrot.slane %v518_v60, %v9508_v38  ;;  %v438_v49 = vrot.slane %v430_v54, %v9522_v59  ;;  %v431_v41 = vcombine.high %v365_v3, %v381_v11  ;;  %v494_v63 = vrot.slane %v486_v31, %v9508_v38 }
  0xf8   :  { %v470_v30 = vrot.slane %v462_v58, %v9522_v59  ;;  %v535_v23 = vcombine.high %v9483_v43, %v195_v57  ;;  %v478_v52 = vcombine.low %v422_v24, %v454_v46  ;;  %v477_v17 = vrot.slane %v463_v62, %v9522_v59  ;;  %v197_v57 = vpop.permute.xlu1 %196 }
  0xf9   :  { %v582_v1 = vcombine.low %v526_v33, %v542_v47  ;;  %v503_v40 = vcombine.high %v9419_v8, %v9455_v27  ;;  %v550_v6 = vcombine.low %v494_v63, %v510_v9  ;;  %v487_v3 = vcombine.high %v9291_v0, %v9441_v19 }
  0xfa   :  { %1526 = vxpose.xlu1.b32.start.end [1/1] (short) (narrow) %v349_v14, 8  ;;  %1398 = vxpose.xlu0.b32.start.end [1/1] (short) (narrow) %v345_v7, 8  ;;  %v483_v61 = vcombine.high %v438_v49, %v470_v30  ;;  %v519_v14 = vcombine.high %v9469_v35, %v9497_v51  ;;  %v445_v7 = vrot.slane %v431_v41, %v9522_v59 }
  0xfb   :  { %v549_v43 = vrot.slane %v535_v23, %v9508_v38  ;;  %v480_v11 = vcombine.low %v429_v53, %v461_v15  ;;  %v590_v16 = vrot.slane %v582_v1, %v9522_v59  ;;  %v583_v24 = vcombine.high %v526_v33, %v542_v47 }
  0xfc   :  { %v485_v46 = vcombine.high %v445_v7, %v477_v17  ;;  %v517_v8 = vrot.slane %v503_v40, %v9508_v38  ;;  %v533_v27 = vrot.slane %v519_v14, %v9508_v38  ;;  %v558_v35 = vrot.slane %v550_v6, %v9522_v59  ;;  %v199_v6 = vpop.permute.xlu0 %198 }
  0xfd   :  { %v551_v51 = vcombine.high %v494_v63, %v510_v9  ;;  %v501_v32 = vrot.slane %v487_v3, %v9508_v38  ;;  %v670_v0 = vcombine.low %v9481_v42, %v197_v57  ;;  %v482_v19 = vcombine.low %v438_v49, %v470_v30 }
  0xfe   :  { %1590 = vxpose.xlu1.b32.start.end [1/1] (short) (narrow) %v479_v48, 8  ;;  %1430 = vxpose.xlu0.b32.start.end [1/1] (short) (narrow) %v346_v22, 8  ;;  %v615_v36 = vcombine.high %v558_v35, %v590_v16  ;;  %v597_v48 = vrot.slane %v583_v24, %v9522_v59  ;;  %v598_v22 = vcombine.low %v533_v27, %v549_v43 }
  0xff   :  { %v622_v15 = vcombine.low %v9299_v2, %v9439_v18  ;;  %v638_v58 = vcombine.low %v9423_v10, %v9453_v26  ;;  %v654_v55 = vcombine.low %v9467_v34, %v9495_v50  ;;  %v565_v60 = vrot.slane %v551_v51, %v9522_v59 }
 0x100   :  { %v566_v53 = vcombine.low %v501_v32, %v517_v8  ;;  %v678_v54 = vrot.slane %v670_v0, %v9508_v38  ;;  %v484_v31 = vcombine.low %v445_v7, %v477_v17  ;;  %v567_v49 = vcombine.high %v501_v32, %v517_v8 }
 0x101   :  { %v617_v47 = vcombine.high %v565_v60, %v597_v48  ;;  %v630_v30 = vrot.slane %v622_v15, %v9508_v38  ;;  %v646_v62 = vrot.slane %v638_v58, %v9508_v38  ;;  %v662_v9 = vrot.slane %v654_v55, %v9508_v38 }
 0x102   :  { %1654 = vxpose.xlu1.b32.start.end [1/1] (short) (narrow) %v481_v39, 8  ;;  %1494 = vxpose.xlu0.b32.start.end [1/1] (short) (narrow) %v348_v25, 8  ;;  %v606_v39 = vrot.slane %v598_v22, %v9522_v59  ;;  %v599_v25 = vcombine.high %v533_v27, %v549_v43  ;;  %v574_v33 = vrot.slane %v566_v53, %v9522_v59 }
 0x103   :  { %v671_v41 = vcombine.high %v9481_v42, %v197_v57  ;;  %v614_v23 = vcombine.low %v558_v35, %v590_v16  ;;  %v623_v17 = vcombine.high %v9299_v2, %v9439_v18  ;;  %v639_v1 = vcombine.high %v9423_v10, %v9453_v26 }
 0x104   :  { %v619_v63 = vcombine.high %v574_v33, %v606_v39  ;;  %v655_v40 = vcombine.high %v9467_v34, %v9495_v50  ;;  %v581_v14 = vrot.slane %v567_v49, %v9522_v59  ;;  %v686_v7 = vcombine.low %v630_v30, %v646_v62 }
 0x105   :  { %v685_v42 = vrot.slane %v671_v41, %v9508_v38  ;;  %v616_v43 = vcombine.low %v565_v60, %v597_v48  ;;  %v637_v2 = vrot.slane %v623_v17, %v9508_v38  ;;  %v653_v10 = vrot.slane %v639_v1, %v9508_v38 }
 0x106   :  { %1718 = vxpose.xlu1.b32.start.end [1/1] (short) (narrow) %v483_v61, 8  ;;  %1558 = vxpose.xlu0.b32.start.end [1/1] (short) (narrow) %v478_v52, 8  ;;  %v613_v61 = vrot.slane %v599_v25, %v9522_v59  ;;  %v718_v52 = vcombine.low %v662_v9, %v678_v54  ;;  %v669_v18 = vrot.slane %v655_v40, %v9508_v38 }
 0x107   :  { %v694_v26 = vrot.slane %v686_v7, %v9522_v59  ;;  %v687_v34 = vcombine.high %v630_v30, %v646_v62  ;;  %v806_v50 = vcombine.low %v9487_v45, %v199_v6  ;;  %v618_v16 = vcombine.low %v574_v33, %v606_v39 }
 0x108   :  { %v621_v3 = vcombine.high %v581_v14, %v613_v61  ;;  %v726_v57 = vrot.slane %v718_v52, %v9522_v59  ;;  %v734_v8 = vcombine.low %v669_v18, %v685_v42  ;;  %v774_v27 = vcombine.low %v9429_v13, %v9459_v29 }
 0x109   :  { %v790_v35 = vcombine.low %v9473_v37, %v9501_v56  ;;  %v701_v51 = vrot.slane %v687_v34, %v9522_v59  ;;  %v702_v32 = vcombine.low %v637_v2, %v653_v10  ;;  %v758_v0 = vcombine.low %v9309_v5, %v9445_v21 }
 0x10a   :  { %1782 = vxpose.xlu1.b32.start.end [1/1] (short) (narrow) %v485_v46, 8  ;;  %1622 = vxpose.xlu0.b32.start.end [1/1] (short) (narrow) %v480_v11, 8  ;;  %v719_v46 = vcombine.high %v662_v9, %v678_v54  ;;  %v751_v11 = vcombine.high %v694_v26, %v726_v57  ;;  %v620_v48 = vcombine.low %v581_v14, %v613_v61 }
 0x10b   :  { %v742_v22 = vrot.slane %v734_v8, %v9522_v59  ;;  %v735_v15 = vcombine.high %v669_v18, %v685_v42  ;;  %v782_v58 = vrot.slane %v774_v27, %v9508_v38  ;;  %v798_v55 = vrot.slane %v790_v35, %v9508_v38 }
 0x10c   :  { %v733_v24 = vrot.slane %v719_v46, %v9522_v59  ;;  %v710_v60 = vrot.slane %v702_v32, %v9522_v59  ;;  %v703_v53 = vcombine.high %v637_v2, %v653_v10  ;;  %v766_v54 = vrot.slane %v758_v0, %v9508_v38 }
 0x10d   :  { %v750_v39 = vcombine.low %v694_v26, %v726_v57  ;;  %v749_v25 = vrot.slane %v735_v15, %v9522_v59  ;;  %v775_v62 = vcombine.high %v9429_v13, %v9459_v29  ;;  %v791_v9 = vcombine.high %v9473_v37, %v9501_v56 }
 0x10e   :  { %1686 = vxpose.xlu0.b32.start.end [1/1] (short) (narrow) %v482_v19, 8  ;;  %1846 = vxpose.xlu1.b32.start.end [1/1] (short) (narrow) %v615_v36, 8  ;;  %v814_v19 = vrot.slane %v806_v50, %v9508_v38  ;;  %v753_v36 = vcombine.high %v701_v51, %v733_v24  ;;  %v717_v33 = vrot.slane %v703_v53, %v9522_v59 }
 0x10f   :  { %v822_v49 = vcombine.low %v766_v54, %v782_v58  ;;  %v759_v41 = vcombine.high %v9309_v5, %v9445_v21  ;;  %v752_v61 = vcombine.low %v701_v51, %v733_v24  ;;  %v789_v13 = vrot.slane %v775_v62, %v9508_v38 }
 0x110   :  { %v854_v30 = vcombine.low %v798_v55, %v814_v19  ;;  %v855_v17 = vcombine.high %v798_v55, %v814_v19  ;;  %v805_v29 = vrot.slane %v791_v9, %v9508_v38  ;;  %v823_v56 = vcombine.high %v766_v54, %v782_v58 }
 0x111   :  { %v830_v37 = vrot.slane %v822_v49, %v9522_v59  ;;  %v773_v1 = vrot.slane %v759_v41, %v9508_v38  ;;  %v754_v21 = vcombine.low %v710_v60, %v742_v22  ;;  %v894_v42 = vcombine.low %v9307_v4, %v9443_v20  ;;  %v11442_v41 = vld [vmem:[#allocation15_spill] sm:$0xff] }
 0x112   :  { %1750 = vxpose.xlu0.b32.start.end [1/1] (short) (narrow) %v484_v31, 8  ;;  %1910 = vxpose.xlu1.b32.start.end [1/1] (short) (narrow) %v617_v47, 8  ;;  %v807_v31 = vcombine.high %v9487_v45, %v199_v6  ;;  %v755_v47 = vcombine.high %v710_v60, %v742_v22  ;;  %v862_v52 = vrot.slane %v854_v30, %v9522_v59 }
 0x113   :  { %v869_v14 = vrot.slane %v855_v17, %v9522_v59  ;;  %v910_v6 = vcombine.low %v9427_v12, %v9457_v28  ;;  %v837_v46 = vrot.slane %v823_v56, %v9522_v59  ;;  %v838_v2 = vcombine.low %v773_v1, %v789_v13 }
 0x114   :  { %v821_v45 = vrot.slane %v807_v31, %v9508_v38  ;;  %v887_v40 = vcombine.high %v830_v37, %v862_v52  ;;  %v756_v18 = vcombine.low %v717_v33, %v749_v25  ;;  %v839_v27 = vcombine.high %v773_v1, %v789_v13  ;;  %v11446_v13 = vld [vmem:[#allocation13_spill] sm:$0xff] }
 0x115   :  { %v889_v26 = vcombine.high %v837_v46, %v869_v14  ;;  %v846_v8 = vrot.slane %v838_v2, %v9522_v59  ;;  %v886_v32 = vcombine.low %v830_v37, %v862_v52  ;;  %v888_v60 = vcombine.low %v837_v46, %v869_v14 }
 0x116   :  { %1974 = vxpose.xlu1.b32.start.end [1/1] (short) (narrow) %v619_v63, 8  ;;  %1814 = vxpose.xlu0.b32.start.end [1/1] (short) (narrow) %v614_v23, 8  ;;  %v201_v63 = vpop.permute.xlu1 %200  ;;  %v757_v23 = vcombine.high %v717_v33, %v749_v25  ;;  %v870_v7 = vcombine.low %v805_v29, %v821_v45  ;;  %v871_v50 = vcombine.high %v805_v29, %v821_v45  ;;  %v11441_v25 = vld [vmem:[#allocation20_spill] sm:$0xff]  ;;  %v11443_v45 = vld [vmem:[#allocation11_spill] sm:$0xff]  ;;  %v11447_v29 = vld [vmem:[#allocation9_spill] sm:$0xff] }
 0x117   :  { %v942_v5 = vcombine.low %v9485_v44, %v201_v63  ;;  %v943_v35 = vcombine.high %v9485_v44, %v201_v63  ;;  %v853_v15 = vrot.slane %v839_v27, %v9522_v59  ;;  %v1046_v63 = vcombine.low %v11443_v45, %v11442_v41 }
 0x118   :  { %v878_v34 = vrot.slane %v870_v7, %v9522_v59  ;;  %v885_v0 = vrot.slane %v871_v50, %v9522_v59  ;;  %v1030_v37 = vcombine.low %v11447_v29, %v11446_v13 }
 0x119   :  { %v950_v10 = vrot.slane %v942_v5, %v9508_v38  ;;  %v957_v44 = vrot.slane %v943_v35, %v9508_v38  ;;  %v1054_v7 = vrot.slane %v1046_v63, %v9508_v38 }
 0x11a   :  { %2038 = vxpose.xlu1.b32.start.end [1/1] (short) (narrow) %v621_v3, 8  ;;  %1878 = vxpose.xlu0.b32.start.end [1/1] (short) (narrow) %v616_v43, 8  ;;  %v11439_v3 = vld [vmem:[#allocation21_spill] sm:$0xff]  ;;  %v11440_v43 = vld [vmem:[#allocation16_spill] sm:$0xff]  ;;  %v891_v51 = vcombine.high %v846_v8, %v878_v34  ;;  %v893_v55 = vcombine.high %v853_v15, %v885_v0  ;;  %v890_v9 = vcombine.low %v846_v8, %v878_v34 }
 0x11b   :  { %v926_v57 = vcombine.low %v11440_v43, %v11439_v3  ;;  %v927_v22 = vcombine.high %v11440_v43, %v11439_v3  ;;  %v1038_v3 = vrot.slane %v1030_v37, %v9508_v38 }
 0x11d   :  { %v934_v24 = vrot.slane %v926_v57, %v9508_v38 }
 0x11e   :  { %2102 = vxpose.xlu1.b32.start.end [1/1] (short) (narrow) %v751_v11, 8  ;;  %1942 = vxpose.xlu0.b32.start.end [1/1] (short) (narrow) %v618_v16, 8  ;;  %v902_v11 = vrot.slane %v894_v42, %v9508_v38  ;;  %v918_v16 = vrot.slane %v910_v6, %v9508_v38 }
 0x11f   :  { %v990_v19 = vcombine.low %v934_v24, %v950_v10  ;;  %v991_v54 = vcombine.high %v934_v24, %v950_v10  ;;  %v205_v24 = vpop.permute.xlu1 %204 }
 0x120   :  { %v958_v58 = vcombine.low %v902_v11, %v918_v16 }
 0x121   :  { %v998_v53 = vrot.slane %v990_v19, %v9522_v59  ;;  %v1005_v33 = vrot.slane %v991_v54, %v9522_v59  ;;  %v11450_v54 = vld [vmem:[#allocation8_spill] sm:$0xff] }
 0x122   :  { %2166 = vxpose.xlu1.b32.start.end [1/1] (short) (narrow) %v753_v36, 8  ;;  %2006 = vxpose.xlu0.b32.start.end [1/1] (short) (narrow) %v620_v48, 8  ;;  %v895_v36 = vcombine.high %v9307_v4, %v9443_v20  ;;  %v911_v48 = vcombine.high %v9427_v12, %v9457_v28  ;;  %v941_v12 = vrot.slane %v927_v22, %v9508_v38  ;;  %v203_v28 = vpop.permute.xlu0 %202  ;;  %v11448_v22 = vld [vmem:[#allocation19_spill] sm:$0xff] }
 0x123   :  { %v966_v31 = vrot.slane %v958_v58, %v9522_v59  ;;  %v1078_v30 = vcombine.low %v11441_v25, %v203_v28  ;;  %v1079_v43 = vcombine.high %v11441_v25, %v203_v28 }
 0x124   :  { %v909_v4 = vrot.slane %v895_v36, %v9508_v38  ;;  %v925_v20 = vrot.slane %v911_v48, %v9508_v38  ;;  %v1007_v56 = vcombine.high %v941_v12, %v957_v44 }
 0x125   :  { %v1023_v62 = vcombine.high %v966_v31, %v998_v53  ;;  %v1086_v1 = vrot.slane %v1078_v30, %v9508_v38  ;;  %v1022_v2 = vcombine.low %v966_v31, %v998_v53  ;;  %v11449_v53 = vld [vmem:[#allocation12_spill] sm:$0xff] }
 0x126   :  { %2230 = vxpose.xlu1.b32.start.end [1/1] (short) (narrow) %v755_v47, 8  ;;  %2070 = vxpose.xlu0.b32.start.end [1/1] (short) (narrow) %v750_v39, 8  ;;  %v959_v47 = vcombine.high %v902_v11, %v918_v16  ;;  %v1006_v39 = vcombine.low %v941_v12, %v957_v44  ;;  %v974_v49 = vcombine.low %v909_v4, %v925_v20  ;;  %v11452_v12 = vld [vmem:[#allocation10_spill] sm:$0xff] }
 0x127   :  { %v975_v14 = vcombine.high %v909_v4, %v925_v20  ;;  %v1021_v10 = vrot.slane %v1007_v56, %v9522_v59  ;;  %v1031_v11 = vcombine.high %v11447_v29, %v11446_v13  ;;  %v1093_v16 = vrot.slane %v1079_v43, %v9508_v38  ;;  %v11451_v20 = vld [vmem:[#allocation14_spill] sm:$0xff] }
 0x128   :  { %v973_v17 = vrot.slane %v959_v47, %v9522_v59  ;;  %v982_v6 = vrot.slane %v974_v49, %v9522_v59  ;;  %v1166_v4 = vcombine.low %v11450_v54, %v11449_v53  ;;  %v1182_v28 = vcombine.low %v11452_v12, %v11451_v20  ;;  %v11453_v47 = vld [vmem:[#allocation22_spill] sm:$0xff] }
 0x129   :  { %v989_v50 = vrot.slane %v975_v14, %v9522_v59  ;;  %v1045_v48 = vrot.slane %v1031_v11, %v9508_v38 }
 0x12a   :  { %2294 = vxpose.xlu1.b32.start.end [1/1] (short) (narrow) %v757_v23, 8  ;;  %2134 = vxpose.xlu0.b32.start.end [1/1] (short) (narrow) %v752_v61, 8  ;;  %v11444_v23 = vld [vmem:[#allocation23_spill] sm:$0xff]  ;;  %v11445_v61 = vld [vmem:[#allocation18_spill] sm:$0xff]  ;;  %v1025_v5 = vcombine.high %v973_v17, %v1005_v33  ;;  %v1024_v35 = vcombine.low %v973_v17, %v1005_v33  ;;  %v1190_v63 = vrot.slane %v1182_v28, %v9508_v38 }
 0x12b   :  { %v1062_v52 = vcombine.low %v11445_v61, %v11444_v23  ;;  %v1063_v34 = vcombine.high %v11445_v61, %v11444_v23  ;;  %v1029_v27 = vcombine.high %v989_v50, %v1021_v10  ;;  %v1028_v33 = vcombine.low %v989_v50, %v1021_v10 }
 0x12c   :  { %v1215_v17 = vcombine.high %v11448_v22, %v205_v24 }
 0x12d   :  { %v1070_v42 = vrot.slane %v1062_v52, %v9508_v38  ;;  %v1077_v19 = vrot.slane %v1063_v34, %v9508_v38 }
 0x12e   :  { %2198 = vxpose.xlu0.b32.start.end [1/1] (short) (narrow) %v754_v21, 8  ;;  %2358 = vxpose.xlu1.b32.start.end [1/1] (short) (narrow) %v887_v40, 8  ;;  %v892_v21 = vcombine.low %v853_v15, %v885_v0  ;;  %v1014_v40 = vrot.slane %v1006_v39, %v9522_v59  ;;  %v1095_v0 = vcombine.high %v1038_v3, %v1054_v7  ;;  %v11454_v39 = vld [vmem:[#allocation17_spill] sm:$0xff] }
 0x12f   :  { %v1126_v57 = vcombine.low %v1070_v42, %v1086_v1  ;;  %v1127_v8 = vcombine.high %v1070_v42, %v1086_v1  ;;  %v1214_v15 = vcombine.low %v11448_v22, %v205_v24  ;;  %v1142_v58 = vcombine.low %v1077_v19, %v1093_v16 }
 0x130   :  { %v1027_v46 = vcombine.high %v982_v6, %v1014_v40  ;;  %v1026_v44 = vcombine.low %v982_v6, %v1014_v40  ;;  %v1198_v25 = vcombine.low %v11454_v39, %v11453_v47  ;;  %v1109_v30 = vrot.slane %v1095_v0, %v9522_v59 }
 0x131   :  { %v1167_v1 = vcombine.high %v11450_v54, %v11449_v53  ;;  %v1199_v40 = vcombine.high %v11454_v39, %v11453_v47 }
 0x132   :  { %2262 = vxpose.xlu0.b32.start.end [1/1] (short) (narrow) %v756_v18, 8  ;;  %2422 = vxpose.xlu1.b32.start.end [1/1] (short) (narrow) %v889_v26, 8  ;;  %v1047_v18 = vcombine.high %v11443_v45, %v11442_v41  ;;  %v1094_v26 = vcombine.low %v1038_v3, %v1054_v7  ;;  %v1150_v41 = vrot.slane %v1142_v58, %v9522_v59 }
 0x133   :  { %v1174_v45 = vrot.slane %v1166_v4, %v9508_v38  ;;  %v1206_v61 = vrot.slane %v1198_v25, %v9508_v38  ;;  %v1229_v7 = vrot.slane %v1215_v17, %v9508_v38  ;;  %v1213_v10 = vrot.slane %v1199_v40, %v9508_v38 }
 0x134   :  { %v1102_v36 = vrot.slane %v1094_v26, %v9522_v59 }
 0x135   :  { %v1278_v26 = vcombine.low %v1213_v10, %v1229_v7 }
 0x136   :  { %2486 = vxpose.xlu1.b32.start.end [1/1] (short) (narrow) %v891_v51, 8  ;;  %2326 = vxpose.xlu0.b32.start.end [1/1] (short) (narrow) %v886_v32, 8  ;;  %v1134_v51 = vrot.slane %v1126_v57, %v9522_v59  ;;  %v1061_v32 = vrot.slane %v1047_v18, %v9508_v38  ;;  %v1181_v57 = vrot.slane %v1167_v1, %v9508_v38 }
 0x138   :  { %v1110_v31 = vcombine.low %v1045_v48, %v1061_v32  ;;  %v1111_v23 = vcombine.high %v1045_v48, %v1061_v32  ;;  %v1158_v37 = vcombine.low %v1102_v36, %v1134_v51 }
 0x13a   :  { %2550 = vxpose.xlu1.b32.start.end [1/1] (short) (narrow) %v893_v55, 8  ;;  %2390 = vxpose.xlu0.b32.start.end [1/1] (short) (narrow) %v888_v60, 8  ;;  %v1159_v55 = vcombine.high %v1102_v36, %v1134_v51  ;;  %v1141_v60 = vrot.slane %v1127_v8, %v9522_v59  ;;  %v1118_v52 = vrot.slane %v1110_v31, %v9522_v59 }
 0x13b   :  { %v1125_v14 = vrot.slane %v1111_v23, %v9522_v59  ;;  %v1279_v8 = vcombine.high %v1213_v10, %v1229_v7  ;;  %v1286_v51 = vrot.slane %v1278_v26, %v9522_v59 }
 0x13c   :  { %v1161_v49 = vcombine.high %v1109_v30, %v1141_v60  ;;  %v1163_v29 = vcombine.high %v1118_v52, %v1150_v41  ;;  %v1160_v3 = vcombine.low %v1109_v30, %v1141_v60  ;;  %v1162_v50 = vcombine.low %v1118_v52, %v1150_v41 }
 0x13d   :  { %v1293_v48 = vrot.slane %v1279_v8, %v9522_v59 }
 0x13e   :  { %2614 = vxpose.xlu1.b32.start.end [1/1] (short) (narrow) %v1023_v62, 8  ;;  %2454 = vxpose.xlu0.b32.start.end [1/1] (short) (narrow) %v890_v9, 8  ;;  %v1222_v62 = vrot.slane %v1214_v15, %v9508_v38  ;;  %v1143_v9 = vcombine.high %v1077_v19, %v1093_v16 }
 0x140   :  { %v1262_v13 = vcombine.low %v1206_v61, %v1222_v62  ;;  %v1157_v56 = vrot.slane %v1143_v9, %v9522_v59  ;;  %v1263_v42 = vcombine.high %v1206_v61, %v1222_v62 }
 0x142   :  { %2678 = vxpose.xlu1.b32.start.end [1/1] (short) (narrow) %v1025_v5, 8  ;;  %2518 = vxpose.xlu0.b32.start.end [1/1] (short) (narrow) %v892_v21, 8  ;;  %v1183_v5 = vcombine.high %v11452_v12, %v11451_v20  ;;  %v1230_v21 = vcombine.low %v1174_v45, %v1190_v63  ;;  %v1165_v6 = vcombine.high %v1125_v14, %v1157_v56 }
 0x143   :  { %v1270_v43 = vrot.slane %v1262_v13, %v9522_v59  ;;  %v1277_v11 = vrot.slane %v1263_v42, %v9522_v59 }
 0x144   :  { %v1238_v18 = vrot.slane %v1230_v21, %v9522_v59 }
 0x146   :  { %2742 = vxpose.xlu1.b32.start.end [1/1] (short) (narrow) %v1027_v46, 8  ;;  %2582 = vxpose.xlu0.b32.start.end [1/1] (short) (narrow) %v1022_v2, 8  ;;  %v1197_v46 = vrot.slane %v1183_v5, %v9508_v38  ;;  %v1231_v2 = vcombine.high %v1174_v45, %v1190_v63  ;;  %v1295_v34 = vcombine.high %v1238_v18, %v1270_v43 }
 0x147   :  { %v1294_v36 = vcombine.low %v1238_v18, %v1270_v43 }
 0x148   :  { %v1246_v16 = vcombine.low %v1181_v57, %v1197_v46  ;;  %v1245_v24 = vrot.slane %v1231_v2, %v9522_v59  ;;  %v1247_v32 = vcombine.high %v1181_v57, %v1197_v46 }
 0x14a   :  { %2806 = vxpose.xlu1.b32.start.end [1/1] (short) (narrow) %v1029_v27, 8  ;;  %2646 = vxpose.xlu0.b32.start.end [1/1] (short) (narrow) %v1024_v35, 8  ;;  %v1297_v27 = vcombine.high %v1245_v24, %v1277_v11  ;;  %v1164_v35 = vcombine.low %v1125_v14, %v1157_v56  ;;  %v1254_v0 = vrot.slane %v1246_v16, %v9522_v59  ;;  %v11402_v56 = vmov 0.0  }
 0x14b   :  { %v1261_v22 = vrot.slane %v1247_v32, %v9522_v59  ;;  %v1296_v58 = vcombine.low %v1245_v24, %v1277_v11 }
 0x14c   :  { %v1299_v19 = vcombine.high %v1254_v0, %v1286_v51 }
 0x14d   :  { %v1301_v15 = vcombine.high %v1261_v22, %v1293_v48 }
 0x14e   :  { %2710 = vxpose.xlu0.b32.start.end [1/1] (short) (narrow) %v1026_v44, 8  ;;  %2870 = vxpose.xlu1.b32.start.end [1/1] (short) (narrow) %v1159_v55, 8  ;;  %v1298_v44 = vcombine.low %v1254_v0, %v1286_v51  ;;  %v1300_v55 = vcombine.low %v1261_v22, %v1293_v48 }
 0x152   :  { %2774 = vxpose.xlu0.b32.start.end [1/1] (short) (narrow) %v1028_v33, 8  ;;  %2934 = vxpose.xlu1.b32.start.end [1/1] (short) (narrow) %v1161_v49, 8 }
 0x156   :  { %2998 = vxpose.xlu1.b32.start.end [1/1] (short) (narrow) %v1163_v29, 8  ;;  %2838 = vxpose.xlu0.b32.start.end [1/1] (short) (narrow) %v1158_v37, 8 }
 0x15a   :  { %3062 = vxpose.xlu1.b32.start.end [1/1] (short) (narrow) %v1165_v6, 8  ;;  %2902 = vxpose.xlu0.b32.start.end [1/1] (short) (narrow) %v1160_v3, 8 }
 0x15e   :  { %3126 = vxpose.xlu1.b32.start.end [1/1] (short) (narrow) %v1295_v34, 8  ;;  %2966 = vxpose.xlu0.b32.start.end [1/1] (short) (narrow) %v1162_v50, 8 }
 0x162   :  { %3190 = vxpose.xlu1.b32.start.end [1/1] (short) (narrow) %v1297_v27, 8  ;;  %3030 = vxpose.xlu0.b32.start.end [1/1] (short) (narrow) %v1164_v35, 8 }
 0x166   :  { %3254 = vxpose.xlu1.b32.start.end [1/1] (short) (narrow) %v1299_v19, 8  ;;  %3094 = vxpose.xlu0.b32.start.end [1/1] (short) (narrow) %v1294_v36, 8 }
 0x16a   :  { %3318 = vxpose.xlu1.b32.start.end [1/1] (short) (narrow) %v1301_v15, 8  ;;  %3158 = vxpose.xlu0.b32.start.end [1/1] (short) (narrow) %v1296_v58, 8 }
 0x16e   :  { %3222 = vxpose.xlu0.b32.start.end [1/1] (short) (narrow) %v1298_v44, 8 }
 0x172   :  { %3286 = vxpose.xlu0.b32.start.end [1/1] (short) (narrow) %v1300_v55, 8  ;;  %v1318_v60 = vpop.trf.xlu0  ;;  %v1350_v53 = vpop.trf.xlu1 }
 0x176   :  { %v1382_v54 = vpop.trf.xlu0  ;;  %v1478_v4 = vpop.trf.xlu1 }
 0x177   :  { %v3350_v39 = vcombine.low %v1318_v60, %v1382_v54 }
 0x179   :  { %v3357_v33 = vrot.slane %v3350_v39, %v9508_v38 }
 0x17a   :  { %v1414_v20 = vpop.trf.xlu0  ;;  %v1542_v12 = vpop.trf.xlu1 }
 0x17b   :  { %v3358_v28 = vcombine.low %v1350_v53, %v1414_v20  ;;  %v3374_v30 = vcombine.low %v1478_v4, %v1542_v12 }
 0x17d   :  { %v3365_v25 = vrot.slane %v3358_v28, %v9508_v38  ;;  %v3381_v45 = vrot.slane %v3374_v30, %v9508_v38 }
 0x17e   :  { %v1446_v31 = vpop.trf.xlu0  ;;  %v1606_v47 = vpop.trf.xlu1 }
 0x17f   :  { %v3382_v41 = vcombine.low %v3357_v33, %v3365_v25 }
 0x181   :  { %v3389_v17 = vrot.slane %v3382_v41, %v9522_v59 }
 0x182   :  { %v1510_v62 = vpop.trf.xlu0  ;;  %v1670_v9 = vpop.trf.xlu1 }
 0x183   :  { %v3366_v49 = vcombine.low %v1446_v31, %v1510_v62  ;;  %v3408_v43 = vcombine.low %v1606_v47, %v1670_v9 }
 0x185   :  { %v3373_v63 = vrot.slane %v3366_v49, %v9508_v38  ;;  %v3415_v24 = vrot.slane %v3408_v43, %v9508_v38 }
 0x186   :  { %v1574_v23 = vpop.trf.xlu0  ;;  %v1734_v61 = vpop.trf.xlu1 }
 0x187   :  { %v3390_v52 = vcombine.low %v3373_v63, %v3381_v45 }
 0x189   :  { %v3397_v13 = vrot.slane %v3390_v52, %v9522_v59 }
 0x18a   :  { %v1638_v29 = vpop.trf.xlu0  ;;  %v1798_v37 = vpop.trf.xlu1 }
 0x18b   :  { %v9160_v1 = vcombine.high %v3397_v13, %v11402_v56  ;;  %v3398_v5 = vcombine.low %v3389_v17, %v3397_v13  ;;  %v3399_v21 = vcombine.high %v3389_v17, %v3397_v13  ;;  %v3400_v40 = vcombine.low %v1574_v23, %v1638_v29 }
 0x18c   :  { %v3424_v2 = vcombine.low %v1734_v61, %v1798_v37 }
 0x18d   :  { %v9751_v14 = vrot.slane %v3398_v5, %v9508_v38  ;;  %v3750_v7 = vcombine.high %v3398_v5, %v11402_v56  ;;  %v9755_v3 = vrot.slane %v3399_v21, %v9508_v38  ;;  %v9761_v46 = vrot.slane %v9160_v1, %v9508_v38 }
 0x18e   :  { %v1702_v42 = vpop.trf.xlu0  ;;  %v1862_v6 = vpop.trf.xlu1  ;;  %v3407_v18 = vrot.slane %v3400_v40, %v9508_v38  ;;  %v3431_v35 = vrot.slane %v3424_v2, %v9508_v38 }
 0x18f   :  { %v9758_v57 = vrot.slane %v3750_v7, %v9508_v38  ;;  %v3781_v10 = vcombine.high %v9751_v14, %v9755_v3  ;;  %v3780_v26 = vcombine.low %v9751_v14, %v9755_v3 }
 0x190   :  { %v3432_v27 = vcombine.low %v3407_v18, %v3415_v24 }
 0x191   :  { %v3796_v34 = vcombine.low %v9758_v57, %v9761_v46  ;;  %v9776_v32 = vrot.slane %v3780_v26, %v9522_v59 }
 0x192   :  { %v1766_v11 = vpop.trf.xlu0  ;;  %v1926_v16 = vpop.trf.xlu1  ;;  %v3439_v48 = vrot.slane %v3432_v27, %v9522_v59 }
 0x193   :  { %v3416_v8 = vcombine.low %v1702_v42, %v1766_v11  ;;  %11455 = vst [vmem:[#allocation21_spill] sm:$0xff] %v9776_v32  ;;  %v3812_v15 = vcombine.high %v9776_v32, %v11402_v56  ;;  %v3458_v47 = vcombine.low %v1862_v6, %v1926_v16 }
 0x195   :  { %v3423_v51 = vrot.slane %v3416_v8, %v9508_v38  ;;  %v3465_v61 = vrot.slane %v3458_v47, %v9508_v38 }
 0x196   :  { %v1830_v0 = vpop.trf.xlu0  ;;  %v1990_v19 = vpop.trf.xlu1 }
 0x197   :  { %v3440_v36 = vcombine.low %v3423_v51, %v3431_v35 }
 0x199   :  { %v3447_v22 = vrot.slane %v3440_v36, %v9522_v59 }
 0x19a   :  { %v1894_v58 = vpop.trf.xlu0  ;;  %v2054_v44 = vpop.trf.xlu1 }
 0x19b   :  { %v9161_v55 = vcombine.high %v3447_v22, %v11402_v56  ;;  %4286 = vrot.lane.b32.xlu0 %v3812_v15, %s9248_s17  ;;  %v3448_v60 = vcombine.low %v3439_v48, %v3447_v22  ;;  %v3449_v53 = vcombine.high %v3439_v48, %v3447_v22  ;;  %v3450_v54 = vcombine.low %v1830_v0, %v1894_v58 }
 0x19c   :  { %v3474_v33 = vcombine.low %v1990_v19, %v2054_v44 }
 0x19d   :  { %v9785_v4 = vrot.slane %v3448_v60, %v9508_v38  ;;  %v3816_v20 = vcombine.high %v3448_v60, %v11402_v56  ;;  %v9789_v31 = vrot.slane %v3449_v53, %v9508_v38  ;;  %v9795_v25 = vrot.slane %v9161_v55, %v9508_v38 }
 0x19e   :  { %v1958_v12 = vpop.trf.xlu0  ;;  %v2118_v28 = vpop.trf.xlu1  ;;  %v3457_v9 = vrot.slane %v3450_v54, %v9508_v38  ;;  %v3481_v29 = vrot.slane %v3474_v33, %v9508_v38 }
 0x19f   :  { %v9792_v39 = vrot.slane %v3816_v20, %v9508_v38  ;;  %v3846_v30 = vcombine.low %v9785_v4, %v9789_v31  ;;  %v3847_v62 = vcombine.high %v9785_v4, %v9789_v31 }
 0x1a0   :  { %v3482_v13 = vcombine.low %v3457_v9, %v3465_v61 }
 0x1a1   :  { %v3862_v49 = vcombine.low %v9792_v39, %v9795_v25  ;;  %v9807_v63 = vrot.slane %v3846_v30, %v9522_v59 }
 0x1a2   :  { %v2022_v45 = vpop.trf.xlu0  ;;  %v2182_v23 = vpop.trf.xlu1  ;;  %v3489_v40 = vrot.slane %v3482_v13, %v9522_v59 }
 0x1a3   :  { %11456 = vst [vmem:[#allocation16_spill] sm:$0xff] %v9807_v63  ;;  %v3466_v52 = vcombine.low %v1958_v12, %v2022_v45  ;;  %v3878_v17 = vcombine.high %v9807_v63, %v11402_v56  ;;  %v3508_v35 = vcombine.low %v2118_v28, %v2182_v23 }
 0x1a5   :  { %v3473_v37 = vrot.slane %v3466_v52, %v9508_v38  ;;  %4288 = vrot.lane.b32.xlu1 %v3878_v17, %s9248_s17  ;;  %v3515_v53 = vrot.slane %v3508_v35, %v9508_v38 }
 0x1a6   :  { %v2086_v1 = vpop.trf.xlu0  ;;  %v2246_v5 = vpop.trf.xlu1 }
 0x1a7   :  { %v3490_v21 = vcombine.low %v3473_v37, %v3481_v29 }
 0x1a9   :  { %v3497_v7 = vrot.slane %v3490_v21, %v9522_v59 }
 0x1aa   :  { %v2150_v42 = vpop.trf.xlu0  ;;  %v2310_v6 = vpop.trf.xlu1 }
 0x1ab   :  { %v9162_v43 = vcombine.high %v3497_v7, %v11402_v56  ;;  %v3498_v2 = vcombine.low %v3489_v40, %v3497_v7  ;;  %v3499_v18 = vcombine.high %v3489_v40, %v3497_v7  ;;  %v3500_v26 = vcombine.low %v2086_v1, %v2150_v42 }
 0x1ac   :  { %v3524_v22 = vcombine.low %v2246_v5, %v2310_v6 }
 0x1ad   :  { %v9819_v11 = vrot.slane %v3498_v2, %v9508_v38  ;;  %v3882_v16 = vcombine.high %v3498_v2, %v11402_v56  ;;  %v9823_v27 = vrot.slane %v3499_v18, %v9508_v38  ;;  %v9829_v0 = vrot.slane %v9162_v43, %v9508_v38 }
 0x1ae   :  { %v2214_v24 = vpop.trf.xlu0  ;;  %v2374_v8 = vpop.trf.xlu1  ;;  %v3507_v48 = vrot.slane %v3500_v26, %v9508_v38  ;;  %v3531_v28 = vrot.slane %v3524_v22, %v9508_v38 }
 0x1af   :  { %v9826_v51 = vrot.slane %v3882_v16, %v9508_v38  ;;  %v3912_v19 = vcombine.low %v9819_v11, %v9823_v27  ;;  %v3913_v36 = vcombine.high %v9819_v11, %v9823_v27 }
 0x1b0   :  { %v3532_v12 = vcombine.low %v3507_v48, %v3515_v53 }
 0x1b1   :  { %v3928_v15 = vcombine.low %v9826_v51, %v9829_v0  ;;  %v9841_v55 = vrot.slane %v3912_v19, %v9522_v59 }
 0x1b2   :  { %v2278_v44 = vpop.trf.xlu0  ;;  %v2438_v60 = vpop.trf.xlu1  ;;  %v3539_v45 = vrot.slane %v3532_v12, %v9522_v59 }
 0x1b3   :  { %11457 = vst [vmem:[#allocation20_spill] sm:$0xff] %v9841_v55  ;;  %v3516_v54 = vcombine.low %v2214_v24, %v2278_v44  ;;  %v3944_v20 = vcombine.high %v9841_v55, %v11402_v56  ;;  %v3558_v42 = vcombine.low %v2374_v8, %v2438_v60 }
 0x1b5   :  { %v3523_v47 = vrot.slane %v3516_v54, %v9508_v38  ;;  %4290 = vrot.lane.b32.xlu1 %v3944_v20, %s9248_s17  ;;  %v3565_v22 = vrot.slane %v3558_v42, %v9508_v38 }
 0x1b6   :  { %v2342_v30 = vpop.trf.xlu0  ;;  %v2502_v9 = vpop.trf.xlu1 }
 0x1b7   :  { %v3540_v33 = vcombine.low %v3523_v47, %v3531_v28 }
 0x1b9   :  { %v3547_v23 = vrot.slane %v3540_v33, %v9522_v59 }
 0x1ba   :  { %v2406_v61 = vpop.trf.xlu0  ;;  %v2566_v52 = vpop.trf.xlu1 }
 0x1bb   :  { %v9163_v17 = vcombine.high %v3547_v23, %v11402_v56  ;;  %v3548_v13 = vcombine.low %v3539_v45, %v3547_v23  ;;  %v3549_v29 = vcombine.high %v3539_v45, %v3547_v23  ;;  %v3550_v37 = vcombine.low %v2342_v30, %v2406_v61 }
 0x1bc   :  { %v3574_v16 = vcombine.low %v2502_v9, %v2566_v52 }
 0x1bd   :  { %v9853_v1 = vrot.slane %v3548_v13, %v9508_v38  ;;  %v3948_v5 = vcombine.high %v3548_v13, %v11402_v56  ;;  %v9857_v7 = vrot.slane %v3549_v29, %v9508_v38  ;;  %v9863_v43 = vrot.slane %v9163_v17, %v9508_v38 }
 0x1be   :  { %v2470_v21 = vpop.trf.xlu0  ;;  %v2630_v40 = vpop.trf.xlu1  ;;  %v3557_v26 = vrot.slane %v3550_v37, %v9508_v38  ;;  %v3581_v54 = vrot.slane %v3574_v16, %v9508_v38 }
 0x1bf   :  { %v9860_v6 = vrot.slane %v3948_v5, %v9508_v38  ;;  %v3978_v2 = vcombine.low %v9853_v1, %v9857_v7  ;;  %v3979_v18 = vcombine.high %v9853_v1, %v9857_v7 }
 0x1c0   :  { %v3582_v53 = vcombine.low %v3557_v26, %v3565_v22 }
 0x1c1   :  { %v3994_v24 = vcombine.low %v9860_v6, %v9863_v43  ;;  %v9875_v19 = vrot.slane %v3978_v2, %v9522_v59 }
 0x1c2   :  { %v2534_v35 = vpop.trf.xlu0  ;;  %v2694_v48 = vpop.trf.xlu1  ;;  %v3589_v30 = vrot.slane %v3582_v53, %v9522_v59 }
 0x1c3   :  { %11458 = vst [vmem:[#allocation15_spill] sm:$0xff] %v9875_v19  ;;  %v3566_v44 = vcombine.low %v2470_v21, %v2534_v35  ;;  %v4010_v60 = vcombine.high %v9875_v19, %v11402_v56  ;;  %v3608_v42 = vcombine.low %v2630_v40, %v2694_v48 }
 0x1c5   :  { %v3573_v20 = vrot.slane %v3566_v44, %v9508_v38  ;;  %4292 = vrot.lane.b32.xlu1 %v4010_v60, %s9248_s17 }
 0x1c6   :  { %v2598_v12 = vpop.trf.xlu0  ;;  %v2758_v28 = vpop.trf.xlu1 }
 0x1c7   :  { %v3590_v47 = vcombine.low %v3573_v20, %v3581_v54  ;;  %v3615_v54 = vrot.slane %v3608_v42, %v9508_v38 }
 0x1c9   :  { %v3597_v9 = vrot.slane %v3590_v47, %v9522_v59 }
 0x1ca   :  { %v2662_v33 = vpop.trf.xlu0  ;;  %v2822_v45 = vpop.trf.xlu1 }
 0x1cb   :  { %v9164_v23 = vcombine.high %v3597_v9, %v11402_v56  ;;  %v3598_v61 = vcombine.low %v3589_v30, %v3597_v9  ;;  %v3599_v52 = vcombine.high %v3589_v30, %v3597_v9  ;;  %v3600_v17 = vcombine.low %v2598_v12, %v2662_v33 }
 0x1cc   :  { %v3624_v22 = vcombine.low %v2758_v28, %v2822_v45 }
 0x1cd   :  { %v9887_v13 = vrot.slane %v3598_v61, %v9508_v38  ;;  %v4014_v29 = vcombine.high %v3598_v61, %v11402_v56  ;;  %v9891_v21 = vrot.slane %v3599_v52, %v9508_v38  ;;  %v9897_v26 = vrot.slane %v9164_v23, %v9508_v38 }
 0x1ce   :  { %v2726_v37 = vpop.trf.xlu0  ;;  %v2886_v5 = vpop.trf.xlu1  ;;  %v3607_v35 = vrot.slane %v3600_v17, %v9508_v38  ;;  %v3631_v28 = vrot.slane %v3624_v22, %v9508_v38 }
 0x1cf   :  { %v9894_v2 = vrot.slane %v4014_v29, %v9508_v38  ;;  %v4044_v16 = vcombine.low %v9887_v13, %v9891_v21  ;;  %v4045_v14 = vcombine.high %v9887_v13, %v9891_v21  ;;  %v3993_v21 = vrot.slane %v3979_v18, %v9522_v59 }
 0x1d0   :  { %v3632_v47 = vcombine.low %v3607_v35, %v3615_v54 }
 0x1d1   :  { %v4060_v44 = vcombine.low %v9894_v2, %v9897_v26  ;;  %v9907_v40 = vrot.slane %v4044_v16, %v9522_v59 }
 0x1d2   :  { %v2790_v53 = vpop.trf.xlu0  ;;  %v2950_v48 = vpop.trf.xlu1  ;;  %v3639_v23 = vrot.slane %v3632_v47, %v9522_v59 }
 0x1d3   :  { %11459 = vst [vmem:[#allocation11_spill] sm:$0xff] %v9907_v40  ;;  %v3616_v20 = vcombine.low %v2726_v37, %v2790_v53  ;;  %v4076_v12 = vcombine.high %v9907_v40, %v11402_v56 }
 0x1d5   :  { %v3623_v30 = vrot.slane %v3616_v20, %v9508_v38  ;;  %4294 = vrot.lane.b32.xlu0 %v4076_v12, %s9248_s17  ;;  %v3658_v12 = vcombine.low %v2886_v5, %v2950_v48 }
 0x1d6   :  { %v2854_v9 = vpop.trf.xlu0  ;;  %v3014_v33 = vpop.trf.xlu1 }
 0x1d7   :  { %v3640_v45 = vcombine.low %v3623_v30, %v3631_v28 }
 0x1d9   :  { %v3647_v61 = vrot.slane %v3640_v45, %v9522_v59 }
 0x1da   :  { %v2918_v52 = vpop.trf.xlu0  ;;  %v3078_v17 = vpop.trf.xlu1 }
 0x1db   :  { %v9165_v29 = vcombine.high %v3647_v61, %v11402_v56  ;;  %v3648_v37 = vcombine.low %v3639_v23, %v3647_v61  ;;  %v3649_v42 = vcombine.high %v3639_v23, %v3647_v61  ;;  %v3650_v16 = vcombine.low %v2854_v9, %v2918_v52 }
 0x1dc   :  { %v3674_v45 = vcombine.low %v3014_v33, %v3078_v17 }
 0x1dd   :  { %v9919_v35 = vrot.slane %v3648_v37, %v9508_v38  ;;  %v4080_v22 = vcombine.high %v3648_v37, %v11402_v56  ;;  %v9923_v54 = vrot.slane %v3649_v42, %v9508_v38  ;;  %v9929_v28 = vrot.slane %v9165_v29, %v9508_v38 }
 0x1de   :  { %v2982_v53 = vpop.trf.xlu0  ;;  %v3142_v20 = vpop.trf.xlu1  ;;  %v3657_v9 = vrot.slane %v3650_v16, %v9508_v38  ;;  %v3665_v29 = vrot.slane %v3658_v12, %v9508_v38  ;;  %v3681_v33 = vrot.slane %v3674_v45, %v9508_v38 }
 0x1df   :  { %v9926_v47 = vrot.slane %v4080_v22, %v9508_v38  ;;  %v4110_v30 = vcombine.low %v9919_v35, %v9923_v54 }
 0x1e0   :  { %v3682_v22 = vcombine.low %v3657_v9, %v3665_v29 }
 0x1e1   :  { %v4126_v23 = vcombine.low %v9926_v47, %v9929_v28  ;;  %v9939_v5 = vrot.slane %v4110_v30, %v9522_v59 }
 0x1e2   :  { %v3046_v52 = vpop.trf.xlu0  ;;  %v3206_v48 = vpop.trf.xlu1  ;;  %v3689_v30 = vrot.slane %v3682_v22, %v9522_v59 }
 0x1e3   :  { %11460 = vst [vmem:[#allocation23_spill] sm:$0xff] %v9939_v5  ;;  %v3666_v37 = vcombine.low %v2982_v53, %v3046_v52  ;;  %v4142_v42 = vcombine.high %v9939_v5, %v11402_v56  ;;  %v3708_v45 = vcombine.low %v3142_v20, %v3206_v48 }
 0x1e5   :  { %v3673_v17 = vrot.slane %v3666_v37, %v9508_v38  ;;  %4296 = vrot.lane.b32.xlu1 %v4142_v42, %s9248_s17 }
 0x1e6   :  { %v3110_v16 = vpop.trf.xlu0  ;;  %v3270_v61 = vpop.trf.xlu1 }
 0x1e7   :  { %v3690_v8 = vcombine.low %v3673_v17, %v3681_v33 }
 0x1e9   :  { %v9949_v41 = vrot.slane %v3690_v8, %v9522_v59  ;;  %v3715_v8 = vrot.slane %v3708_v45, %v9508_v38 }
 0x1ea   :  { %v3174_v12 = vpop.trf.xlu0  ;;  %v3334_v52 = vpop.trf.xlu1 }
 0x1eb   :  { %v9952_v53 = vcombine.low %v3689_v30, %v9949_v41  ;;  %v3699_v9 = vcombine.high %v3689_v30, %v9949_v41  ;;  %v3700_v29 = vcombine.low %v3110_v16, %v3174_v12  ;;  %v3724_v17 = vcombine.low %v3270_v61, %v3334_v52 }
 0x1ec   :  { %v3795_v52 = vrot.slane %v3781_v10, %v9522_v59 }
 0x1ed   :  { %v4153_v37 = vrot.slane %v9952_v53, %v9508_v38  ;;  %v4168_v33 = vrot.slane %v3699_v9, %v9508_v38  ;;  %v3707_v60 = vrot.slane %v3700_v29, %v9508_v38  ;;  %v3731_v30 = vrot.slane %v3724_v17, %v9508_v38 }
 0x1ee   :  { %v3238_v42 = vpop.trf.xlu0  ;;  %v3927_v29 = vrot.slane %v3913_v36, %v9522_v59  ;;  %v4059_v17 = vrot.slane %v4045_v14, %v9522_v59  ;;  %v3861_v36 = vrot.slane %v3847_v62, %v9522_v59  ;;  %v3813_v13 = vcombine.high %v3795_v52, %v11402_v56 }
 0x1ef   :  { %v4176_v22 = vcombine.low %v4153_v37, %v4168_v33  ;;  %v3732_v16 = vcombine.low %v3707_v60, %v3715_v8 }
 0x1f0   :  { %v4077_v62 = vcombine.high %v4059_v17, %v11402_v56  ;;  %v3879_v18 = vcombine.high %v3861_v36, %v11402_v56 }
 0x1f1   :  { %v9961_v50 = vrot.slane %v4176_v22, %v9522_v59  ;;  %v3739_v9 = vrot.slane %v3732_v16, %v9522_v59  ;;  %v4177_v22 = vcombine.high %v4153_v37, %v4168_v33  ;;  %v4111_v37 = vcombine.high %v9919_v35, %v9923_v54 }
 0x1f2   :  { %v3302_v58 = vpop.trf.xlu0  ;;  %v3945_v33 = vcombine.high %v3927_v29, %v11402_v56  ;;  %v3804_v35 = vrot.slane %v3796_v34, %v9522_v59  ;;  %v4146_v54 = vcombine.high %v9952_v53, %v11402_v56  ;;  %v4068_v16 = vrot.slane %v4060_v44, %v9522_v59 }
 0x1f3   :  { %11461 = vst [vmem:[#allocation18_spill] sm:$0xff] %v9961_v50  ;;  %v3716_v20 = vcombine.low %v3238_v42, %v3302_v58  ;;  %v4208_v48 = vcombine.high %v9961_v50, %v11402_v56  ;;  %v4191_v27 = vrot.slane %v4177_v22, %v9522_v59  ;;  %v4125_v4 = vrot.slane %v4111_v37, %v9522_v59 }
 0x1f4   :  { %v4160_v34 = vrot.slane %v4146_v54, %v9508_v38 }
 0x1f5   :  { %v3723_v12 = vrot.slane %v3716_v20, %v9508_v38  ;;  %4298 = vrot.lane.b32.xlu0 %v4208_v48, %s9248_s17  ;;  %v4209_v7 = vcombine.high %v4191_v27, %v11402_v56  ;;  %v4011_v20 = vcombine.high %v3993_v21, %v11402_v56  ;;  %v3936_v48 = vrot.slane %v3928_v15, %v9522_v59 }
 0x1f7   :  { %v3740_v61 = vcombine.low %v3723_v12, %v3731_v30  ;;  %v9166_v30 = vcombine.high %v9949_v41, %v11402_v56  ;;  %v4143_v41 = vcombine.high %v4125_v4, %v11402_v56 }
 0x1f9   :  { %v9974_v45 = vrot.slane %v3740_v61, %v9522_v59  ;;  %4318 = vrot.lane.b32.xlu0 %v3795_v52, %s9259_s26  ;;  %v4175_v53 = vrot.slane %v9166_v30, %v9508_v38  ;;  %v3870_v52 = vrot.slane %v3862_v49, %v9522_v59  ;;  %v3946_v49 = vcombine.high %v3936_v48, %v11402_v56 }
 0x1fb   :  { %v3748_v58 = vcombine.low %v3739_v9, %v9974_v45  ;;  %v3749_v60 = vcombine.high %v3739_v9, %v9974_v45  ;;  %v4192_v12 = vcombine.low %v4160_v34, %v4175_v53  ;;  %v3814_v9 = vcombine.high %v3804_v35, %v11402_v56 }
 0x1fd   :  { %v4219_v3 = vrot.slane %v3748_v58, %v9508_v38  ;;  %v4234_v10 = vrot.slane %v3749_v60, %v9508_v38  ;;  %4322 = vrot.lane.b32.xlu0 %v3927_v29, %s9259_s26  ;;  %v4200_v61 = vrot.slane %v4192_v12, %v9522_v59  ;;  %v4212_v44 = vcombine.high %v3748_v58, %v11402_v56  ;;  %v10171_v12 = vld [vmem:[#allocation2 + $0x31] ss:$2 sm:$0xff] }
 0x1fe   :  { %v9167_v60 = vcombine.high %v9974_v45, %v11402_v56  ;;  %v4002_v29 = vrot.slane %v3994_v24, %v9522_v59  ;;  %v4134_v45 = vrot.slane %v4126_v23, %v9522_v59  ;;  %v11463_v23 = vcombine.high %v9758_v57, %v9761_v46 }
 0x1ff   :  { %v4242_v42 = vcombine.low %v4219_v3, %v4234_v10  ;;  %v4243_v31 = vcombine.high %v4219_v3, %v4234_v10  ;;  %v4226_v14 = vrot.slane %v4212_v44, %v9508_v38  ;;  %v4078_v10 = vcombine.high %v4068_v16, %v11402_v56 }
 0x200   :  { %v4241_v58 = vrot.slane %v9167_v60, %v9508_v38  ;;  %v3811_v22 = vrot.slane %v11463_v23, %v9522_v59  ;;  %v11465_v57 = vcombine.high %v9894_v2, %v9897_v26  ;;  %v11467_v26 = vcombine.high %v9860_v6, %v9863_v43  ;;  %v10191_v60 = vld [vmem:[#allocation2 + $0x71] ss:$2 sm:$0xff] }
 0x201   :  { %v9990_v8 = vrot.slane %v4242_v42, %v9522_v59  ;;  %4326 = vrot.lane.b32.xlu0 %v4059_v17, %s9259_s26  ;;  %v4257_v1 = vrot.slane %v4243_v31, %v9522_v59  ;;  %v4210_v42 = vcombine.high %v4200_v61, %v11402_v56  ;;  %v3880_v17 = vcombine.high %v3870_v52, %v11402_v56 }
 0x202   :  { %v4258_v3 = vcombine.low %v4226_v14, %v4241_v58  ;;  %v4075_v46 = vrot.slane %v11465_v57, %v9522_v59  ;;  %v3815_v2 = vcombine.high %v3811_v22, %v11402_v56  ;;  %11478 = vst [vmem:[#allocation25_spill] sm:$0xff] %v10191_v60 }
 0x203   :  { %11462 = vst [vmem:[#allocation13_spill] sm:$0xff] %v9990_v8  ;;  %v4274_v11 = vcombine.high %v9990_v8, %v11402_v56  ;;  %v4275_v15 = vcombine.high %v4257_v1, %v11402_v56 }
 0x204   :  { %v4266_v24 = vrot.slane %v4258_v3, %v9522_v59 }
 0x205   :  { %4300 = vrot.lane.b32.xlu1 %v4274_v11, %s9248_s17  ;;  %4330 = vrot.lane.b32.xlu0 %v4191_v27, %s9259_s26  ;;  %v4012_v11 = vcombine.high %v4002_v29, %v11402_v56  ;;  %v11464_v27 = vcombine.high %v9826_v51, %v9829_v0  ;;  %v11466_v0 = vcombine.high %v9792_v39, %v9795_v25 }
 0x206   :  { %v4276_v37 = vcombine.high %v4266_v24, %v11402_v56  ;;  %v11468_v39 = vcombine.high %v9926_v47, %v9929_v28  ;;  %v10139_v28 = vld [vmem:[#allocation2 + $0x21] ss:$2 sm:$0xff] }
 0x208   :  { %v4141_v25 = vrot.slane %v11468_v39, %v9522_v59 }
 0x209   :  { %4320 = vrot.lane.b32.xlu1 %v3861_v36, %s9259_s26  ;;  %4350 = vrot.lane.b32.xlu0 %v3813_v13, %s9260_s27  ;;  %v3943_v36 = vrot.slane %v11464_v27, %v9522_v59  ;;  %v4144_v13 = vcombine.high %v4134_v45, %v11402_v56 }
 0x20a   :  { %v4145_v54 = vcombine.high %v4141_v25, %v11402_v56 }
 0x20b   :  { %v3947_v31 = vcombine.high %v3943_v36, %v11402_v56 }
 0x20d   :  { %4324 = vrot.lane.b32.xlu1 %v3993_v21, %s9259_s26  ;;  %4354 = vrot.lane.b32.xlu0 %v3945_v33, %s9260_s27  ;;  %v4193_v21 = vcombine.high %v4160_v34, %v4175_v53  ;;  %v3877_v33 = vrot.slane %v11466_v0, %v9522_v59  ;;  %v10148_v30 = vpop.permute.xlu0 %4286  ;;  %v10161_v53 = vld [vmem:[#allocation2 + $0x11] ss:$2 sm:$0xff] }
 0x20e   :  { %11469 = vst [vmem:[#allocation9_spill] sm:$0xff] %v10148_v30 }
 0x20f   :  { %v4207_v51 = vrot.slane %v4193_v21, %v9522_v59  ;;  %v3881_v47 = vcombine.high %v3877_v33, %v11402_v56 }
 0x211   :  { %4328 = vrot.lane.b32.xlu1 %v4125_v4, %s9259_s26  ;;  %4358 = vrot.lane.b32.xlu0 %v4077_v62, %s9260_s27  ;;  %v4009_v4 = vrot.slane %v11467_v26, %v9522_v59  ;;  %v4259_v62 = vcombine.high %v4226_v14, %v4241_v58  ;;  %v4211_v43 = vcombine.high %v4207_v51, %v11402_v56 }
 0x213   :  { %v4273_v6 = vrot.slane %v4259_v62, %v9522_v59 }
 0x215   :  { %4332 = vrot.lane.b32.xlu1 %v4257_v1, %s9259_s26  ;;  %4362 = vrot.lane.b32.xlu0 %v4209_v7, %s9260_s27  ;;  %v4079_v1 = vcombine.high %v4075_v46, %v11402_v56  ;;  %v10133_v7 = vld [vmem:[#allocation2 + $0x1] ss:$2 sm:$0xff] }
 0x219   :  { %4352 = vrot.lane.b32.xlu1 %v3879_v18, %s9260_s27  ;;  %4382 = vrot.lane.b32.xlu0 %v3804_v35, %s9261_s28  ;;  %v4013_v18 = vcombine.high %v4009_v4, %v11402_v56  ;;  %v10145_v35 = vld [vmem:[#allocation2 + $0x41] ss:$2 sm:$0xff] }
 0x21d   :  { %4356 = vrot.lane.b32.xlu1 %v4011_v20, %s9260_s27  ;;  %4386 = vrot.lane.b32.xlu0 %v3936_v48, %s9261_s28  ;;  %v10153_v20 = vld [vmem:[#allocation2 + $0x61] ss:$2 sm:$0xff]  ;;  %v4277_v48 = vcombine.high %v4273_v6, %v11402_v56 }
 0x21e   :  { %11470 = vst [vmem:[#allocation19_spill] sm:$0xff] %v10153_v20 }
 0x221   :  { %4360 = vrot.lane.b32.xlu1 %v4143_v41, %s9260_s27  ;;  %4390 = vrot.lane.b32.xlu0 %v4068_v16, %s9261_s28  ;;  %v10163_v41 = vpop.permute.xlu1 %4288 }
 0x222   :  { %11472 = vst [vmem:[#allocation8_spill] sm:$0xff] %v10163_v41 }
 0x225   :  { %4364 = vrot.lane.b32.xlu1 %v4275_v15, %s9260_s27  ;;  %4394 = vrot.lane.b32.xlu0 %v4200_v61, %s9261_s28 }
 0x227   :  { %v10173_v15 = vpop.permute.xlu1 %4290 }
 0x228   :  { %11474 = vst [vmem:[#allocation10_spill] sm:$0xff] %v10173_v15 }
 0x229   :  { %4384 = vrot.lane.b32.xlu1 %v3870_v52, %s9261_s28  ;;  %4414 = vrot.lane.b32.xlu0 %v3814_v9, %s9262_s29  ;;  %v10181_v52 = vld [vmem:[#allocation2 + $0x51] ss:$2 sm:$0xff] }
 0x22d   :  { %4388 = vrot.lane.b32.xlu1 %v4002_v29, %s9261_s28  ;;  %4418 = vrot.lane.b32.xlu0 %v3946_v49, %s9262_s29 }
 0x231   :  { %4392 = vrot.lane.b32.xlu1 %v4134_v45, %s9261_s28  ;;  %4422 = vrot.lane.b32.xlu0 %v4078_v10, %s9262_s29 }
 0x235   :  { %4396 = vrot.lane.b32.xlu1 %v4266_v24, %s9261_s28  ;;  %4426 = vrot.lane.b32.xlu0 %v4210_v42, %s9262_s29 }
 0x237   :  { %v10183_v44 = vpop.permute.xlu1 %4292 }
 0x238   :  { %11476 = vst [vmem:[#allocation17_spill] sm:$0xff] %v10183_v44 }
 0x239   :  { %4416 = vrot.lane.b32.xlu1 %v3880_v17, %s9262_s29  ;;  %4446 = vrot.lane.b32.xlu0 %v3811_v22, %s9263_s30 }
 0x23d   :  { %4420 = vrot.lane.b32.xlu1 %v4012_v11, %s9262_s29  ;;  %4450 = vrot.lane.b32.xlu0 %v3943_v36, %s9263_s30 }
 0x241   :  { %4424 = vrot.lane.b32.xlu1 %v4144_v13, %s9262_s29  ;;  %4454 = vrot.lane.b32.xlu0 %v4075_v46, %s9263_s30 }
 0x245   :  { %4428 = vrot.lane.b32.xlu1 %v4276_v37, %s9262_s29  ;;  %4458 = vrot.lane.b32.xlu0 %v4207_v51, %s9263_s30 }
 0x247   :  { %v10156_v34 = vpop.permute.xlu0 %4294 }
 0x248   :  { %11471 = vst [vmem:[#allocation12_spill] sm:$0xff] %v10156_v34 }
 0x249   :  { %4448 = vrot.lane.b32.xlu1 %v3877_v33, %s9263_s30  ;;  %4478 = vrot.lane.b32.xlu0 %v3815_v2, %s9264_s2 }
 0x24d   :  { %4452 = vrot.lane.b32.xlu1 %v4009_v4, %s9263_s30  ;;  %4482 = vrot.lane.b32.xlu0 %v3947_v31, %s9264_s2 }
 0x251   :  { %4456 = vrot.lane.b32.xlu1 %v4141_v25, %s9263_s30  ;;  %4486 = vrot.lane.b32.xlu0 %v4079_v1, %s9264_s2 }
 0x255   :  { %4460 = vrot.lane.b32.xlu1 %v4273_v6, %s9263_s30  ;;  %4490 = vrot.lane.b32.xlu0 %v4211_v43, %s9264_s2 }
 0x257   :  { %v10193_v29 = vpop.permute.xlu1 %4296 }
 0x258   :  { %11479 = vst [vmem:[#allocation26_spill] sm:$0xff] %v10193_v29 }
 0x259   :  { %4480 = vrot.lane.b32.xlu1 %v3881_v47, %s9264_s2  ;;  %4589 = vrot.lane.b32.xlu0 %v10133_v7, %s9249_s20 }
 0x25d   :  { %4484 = vrot.lane.b32.xlu1 %v4013_v18, %s9264_s2  ;;  %4593 = vrot.lane.b32.xlu0 %v10139_v28, %s9249_s20 }
 0x261   :  { %4488 = vrot.lane.b32.xlu1 %v4145_v54, %s9264_s2  ;;  %4597 = vrot.lane.b32.xlu0 %v10145_v35, %s9249_s20 }
 0x265   :  { %4492 = vrot.lane.b32.xlu1 %v4277_v48, %s9264_s2  ;;  %4601 = vrot.lane.b32.xlu0 %v10153_v20, %s9249_s20 }
 0x267   :  { %v10165_v16 = vpop.permute.xlu0 %4298 }
 0x268   :  { %11473 = vst [vmem:[#allocation14_spill] sm:$0xff] %v10165_v16 }
 0x269   :  { %4591 = vrot.lane.b32.xlu1 %v10161_v53, %s9249_s20  ;;  %4613 = vrot.lane.b32.xlu0 %v10133_v7, %s9250_s0 }
 0x26b   :  { %v10175_v61 = vpop.permute.xlu0 %4318 }
 0x26c   :  { %11475 = vst [vmem:[#allocation22_spill] sm:$0xff] %v10175_v61 }
 0x26d   :  { %4595 = vrot.lane.b32.xlu1 %v10171_v12, %s9249_s20  ;;  %4617 = vrot.lane.b32.xlu0 %v10139_v28, %s9250_s0 }
 0x26f   :  { %v10185_v9 = vpop.permute.xlu0 %4322 }
 0x270   :  { %11477 = vst [vmem:[#allocation24_spill] sm:$0xff] %v10185_v9 }
 0x271   :  { %4599 = vrot.lane.b32.xlu1 %v10181_v52, %s9249_s20  ;;  %4621 = vrot.lane.b32.xlu0 %v10145_v35, %s9250_s0 }
 0x273   :  { %v10195_v14 = vpop.permute.xlu0 %4326 }
 0x274   :  { %11480 = vst [vmem:[#allocation27_spill] sm:$0xff] %v10195_v14 }
 0x275   :  { %4603 = vrot.lane.b32.xlu1 %v10191_v60, %s9249_s20  ;;  %4625 = vrot.lane.b32.xlu0 %v10153_v20, %s9250_s0 }
 0x277   :  { %v10201_v49 = vpop.permute.xlu1 %4300  ;;  %v10203_v58 = vpop.permute.xlu0 %4330 }
 0x278   :  { %11481 = vst [vmem:[#allocation28_spill] sm:$0xff] %v10201_v49  ;;  %11482 = vst [vmem:[#allocation29_spill] sm:$0xff] %v10203_v58 }
 0x279   :  { %4615 = vrot.lane.b32.xlu1 %v10161_v53, %s9250_s0  ;;  %4637 = vrot.lane.b32.xlu0 %v10133_v7, %s9251_s21 }
 0x27b   :  { %v10209_v45 = vpop.permute.xlu1 %4320  ;;  %v10211_v3 = vpop.permute.xlu0 %4350 }
 0x27c   :  { %11483 = vst [vmem:[#allocation30_spill] sm:$0xff] %v10209_v45  ;;  %11484 = vst [vmem:[#allocation31_spill] sm:$0xff] %v10211_v3 }
 0x27d   :  { %4619 = vrot.lane.b32.xlu1 %v10171_v12, %s9250_s0  ;;  %4641 = vrot.lane.b32.xlu0 %v10139_v28, %s9251_s21 }
 0x27f   :  { %v10217_v10 = vpop.permute.xlu1 %4324  ;;  %v10219_v24 = vpop.permute.xlu0 %4354 }
 0x280   :  { %11485 = vst [vmem:[#allocation32_spill] sm:$0xff] %v10217_v10  ;;  %11486 = vst [vmem:[#allocation33_spill] sm:$0xff] %v10219_v24 }
 0x281   :  { %4623 = vrot.lane.b32.xlu1 %v10181_v52, %s9250_s0  ;;  %4645 = vrot.lane.b32.xlu0 %v10145_v35, %s9251_s21 }
 0x283   :  { %v10225_v42 = vpop.permute.xlu1 %4328  ;;  %v10227_v17 = vpop.permute.xlu0 %4358 }
 0x284   :  { %11487 = vst [vmem:[#allocation34_spill] sm:$0xff] %v10225_v42  ;;  %11488 = vst [vmem:[#allocation35_spill] sm:$0xff] %v10227_v17 }
 0x285   :  { %4627 = vrot.lane.b32.xlu1 %v10191_v60, %s9250_s0  ;;  %4649 = vrot.lane.b32.xlu0 %v10153_v20, %s9251_s21 }
 0x287   :  { %v10233_v23 = vpop.permute.xlu1 %4332  ;;  %v10235_v22 = vpop.permute.xlu0 %4362 }
 0x288   :  { %11489 = vst [vmem:[#allocation36_spill] sm:$0xff] %v10233_v23  ;;  %11490 = vst [vmem:[#allocation37_spill] sm:$0xff] %v10235_v22 }
 0x289   :  { %4639 = vrot.lane.b32.xlu1 %v10161_v53, %s9251_s21  ;;  %4661 = vrot.lane.b32.xlu0 %v10133_v7, %s9252_s22 }
 0x28b   :  { %v10241_v11 = vpop.permute.xlu1 %4352  ;;  %v10243_v27 = vpop.permute.xlu0 %4382 }
 0x28c   :  { %11491 = vst [vmem:[#allocation38_spill] sm:$0xff] %v10241_v11  ;;  %11492 = vst [vmem:[#allocation39_spill] sm:$0xff] %v10243_v27 }
 0x28d   :  { %4643 = vrot.lane.b32.xlu1 %v10171_v12, %s9251_s21  ;;  %4665 = vrot.lane.b32.xlu0 %v10139_v28, %s9252_s22 }
 0x28f   :  { %v10249_v36 = vpop.permute.xlu1 %4356  ;;  %v10251_v13 = vpop.permute.xlu0 %4386 }
 0x290   :  { %11493 = vst [vmem:[#allocation40_spill] sm:$0xff] %v10249_v36  ;;  %11494 = vst [vmem:[#allocation41_spill] sm:$0xff] %v10251_v13 }
 0x291   :  { %4647 = vrot.lane.b32.xlu1 %v10181_v52, %s9251_s21  ;;  %4669 = vrot.lane.b32.xlu0 %v10145_v35, %s9252_s22 }
 0x293   :  { %v10257_v57 = vpop.permute.xlu1 %4360  ;;  %v10259_v46 = vpop.permute.xlu0 %4390 }
 0x294   :  { %11495 = vst [vmem:[#allocation42_spill] sm:$0xff] %v10257_v57  ;;  %11496 = vst [vmem:[#allocation43_spill] sm:$0xff] %v10259_v46 }
 0x295   :  { %4651 = vrot.lane.b32.xlu1 %v10191_v60, %s9251_s21  ;;  %4673 = vrot.lane.b32.xlu0 %v10153_v20, %s9252_s22 }
 0x297   :  { %v10265_v21 = vpop.permute.xlu1 %4364  ;;  %v10267_v37 = vpop.permute.xlu0 %4394 }
 0x298   :  { %11497 = vst [vmem:[#allocation44_spill] sm:$0xff] %v10265_v21  ;;  %11498 = vst [vmem:[#allocation45_spill] sm:$0xff] %v10267_v37 }
 0x299   :  { %4663 = vrot.lane.b32.xlu1 %v10161_v53, %s9252_s22  ;;  %4685 = vrot.lane.b32.xlu0 %v10133_v7, %s9253_s23 }
 0x29b   :  { %v10273_v51 = vpop.permute.xlu1 %4384  ;;  %v10275_v0 = vpop.permute.xlu0 %4414 }
 0x29c   :  { %11499 = vst [vmem:[#allocation46_spill] sm:$0xff] %v10273_v51  ;;  %11500 = vst [vmem:[#allocation47_spill] sm:$0xff] %v10275_v0 }
 0x29d   :  { %4667 = vrot.lane.b32.xlu1 %v10171_v12, %s9252_s22  ;;  %4689 = vrot.lane.b32.xlu0 %v10139_v28, %s9253_s23 }
 0x29f   :  { %v10281_v33 = vpop.permute.xlu1 %4388  ;;  %v10283_v2 = vpop.permute.xlu0 %4418 }
 0x2a0   :  { %11501 = vst [vmem:[#allocation48_spill] sm:$0xff] %v10281_v33  ;;  %11502 = vst [vmem:[#allocation49_spill] sm:$0xff] %v10283_v2 }
 0x2a1   :  { %4671 = vrot.lane.b32.xlu1 %v10181_v52, %s9252_s22  ;;  %4693 = vrot.lane.b32.xlu0 %v10145_v35, %s9253_s23 }
 0x2a3   :  { %v10289_v26 = vpop.permute.xlu1 %4392  ;;  %v10291_v4 = vpop.permute.xlu0 %4422 }
 0x2a4   :  { %11503 = vst [vmem:[#allocation50_spill] sm:$0xff] %v10289_v26  ;;  %11504 = vst [vmem:[#allocation51_spill] sm:$0xff] %v10291_v4 }
 0x2a5   :  { %4675 = vrot.lane.b32.xlu1 %v10191_v60, %s9252_s22  ;;  %4697 = vrot.lane.b32.xlu0 %v10153_v20, %s9253_s23 }
 0x2a7   :  { %v10297_v31 = vpop.permute.xlu1 %4396  ;;  %v10299_v39 = vpop.permute.xlu0 %4426 }
 0x2a8   :  { %11505 = vst [vmem:[#allocation52_spill] sm:$0xff] %v10297_v31  ;;  %11506 = vst [vmem:[#allocation53_spill] sm:$0xff] %v10299_v39 }
 0x2a9   :  { %4687 = vrot.lane.b32.xlu1 %v10161_v53, %s9253_s23  ;;  %4709 = vrot.lane.b32.xlu0 %v10133_v7, %s9254_s24 }
 0x2ab   :  { %v10305_v25 = vpop.permute.xlu1 %4416  ;;  %v10307_v62 = vpop.permute.xlu0 %4446 }
 0x2ac   :  { %11507 = vst [vmem:[#allocation54_spill] sm:$0xff] %v10305_v25  ;;  %11508 = vst [vmem:[#allocation55_spill] sm:$0xff] %v10307_v62 }
 0x2ad   :  { %4691 = vrot.lane.b32.xlu1 %v10171_v12, %s9253_s23  ;;  %4713 = vrot.lane.b32.xlu0 %v10139_v28, %s9254_s24 }
 0x2af   :  { %v10313_v1 = vpop.permute.xlu1 %4420  ;;  %v10315_v6 = vpop.permute.xlu0 %4450 }
 0x2b0   :  { %11509 = vst [vmem:[#allocation56_spill] sm:$0xff] %v10313_v1  ;;  %11510 = vst [vmem:[#allocation57_spill] sm:$0xff] %v10315_v6 }
 0x2b1   :  { %4695 = vrot.lane.b32.xlu1 %v10181_v52, %s9253_s23  ;;  %4717 = vrot.lane.b32.xlu0 %v10145_v35, %s9254_s24 }
 0x2b3   :  { %v10321_v43 = vpop.permute.xlu1 %4424  ;;  %v10323_v47 = vpop.permute.xlu0 %4454 }
 0x2b4   :  { %11511 = vst [vmem:[#allocation58_spill] sm:$0xff] %v10321_v43  ;;  %11512 = vst [vmem:[#allocation59_spill] sm:$0xff] %v10323_v47 }
 0x2b5   :  { %4699 = vrot.lane.b32.xlu1 %v10191_v60, %s9253_s23  ;;  %4721 = vrot.lane.b32.xlu0 %v10153_v20, %s9254_s24 }
 0x2b7   :  { %v10329_v18 = vpop.permute.xlu1 %4428  ;;  %v10331_v54 = vpop.permute.xlu0 %4458 }
 0x2b8   :  { %11513 = vst [vmem:[#allocation60_spill] sm:$0xff] %v10329_v18  ;;  %11514 = vst [vmem:[#allocation61_spill] sm:$0xff] %v10331_v54 }
 0x2b9   :  { %4711 = vrot.lane.b32.xlu1 %v10161_v53, %s9254_s24  ;;  %4733 = vrot.lane.b32.xlu0 %v10133_v7, %s9255_s25 }
 0x2bb   :  { %v10337_v48 = vpop.permute.xlu1 %4448  ;;  %v10339_v56 = vpop.permute.xlu0 %4478 }
 0x2bc   :  { %11515 = vst [vmem:[#allocation62_spill] sm:$0xff] %v10337_v48  ;;  %11516 = vst [vmem:[#allocation63_spill] sm:$0xff] %v10339_v56 }
 0x2bd   :  { %4715 = vrot.lane.b32.xlu1 %v10171_v12, %s9254_s24  ;;  %4737 = vrot.lane.b32.xlu0 %v10139_v28, %s9255_s25 }
 0x2bf   :  { %v10345_v31 = vpop.permute.xlu1 %4452  ;;  %v10347_v18 = vpop.permute.xlu0 %4482 }
 0x2c0   :  { %11517 = vst [vmem:[#allocation64_spill] sm:$0xff] %v10345_v31  ;;  %11518 = vst [vmem:[#allocation65_spill] sm:$0xff] %v10347_v18 }
 0x2c1   :  { %4719 = vrot.lane.b32.xlu1 %v10181_v52, %s9254_s24  ;;  %4741 = vrot.lane.b32.xlu0 %v10145_v35, %s9255_s25 }
 0x2c3   :  { %v10353_v21 = vpop.permute.xlu1 %4456  ;;  %v10355_v23 = vpop.permute.xlu0 %4486 }
 0x2c4   :  { %11519 = vst [vmem:[#allocation66_spill] sm:$0xff] %v10353_v21  ;;  %11520 = vst [vmem:[#allocation67_spill] sm:$0xff] %v10355_v23 }
 0x2c5   :  { %4723 = vrot.lane.b32.xlu1 %v10191_v60, %s9254_s24  ;;  %4745 = vrot.lane.b32.xlu0 %v10153_v20, %s9255_s25 }
 0x2c7   :  { %v10361_v43 = vpop.permute.xlu1 %4460  ;;  %v10363_v8 = vpop.permute.xlu0 %4490 }
 0x2c8   :  { %11521 = vst [vmem:[#allocation68_spill] sm:$0xff] %v10361_v43  ;;  %11522 = vst [vmem:[#allocation69_spill] sm:$0xff] %v10363_v8 }
 0x2c9   :  { %4735 = vrot.lane.b32.xlu1 %v10161_v53, %s9255_s25 }
 0x2cb   :  { %v10367_v49 = vpop.permute.xlu1 %4480  ;;  %v10369_v26 = vpop.permute.xlu0 %4589 }
 0x2cc   :  { %11523 = vst [vmem:[#allocation70_spill] sm:$0xff] %v10367_v49 }
 0x2cd   :  { %4739 = vrot.lane.b32.xlu1 %v10171_v12, %s9255_s25 }
 0x2cf   :  { %v10373_v21 = vpop.permute.xlu1 %4484  ;;  %v10375_v57 = vpop.permute.xlu0 %4593 }
 0x2d0   :  { %11524 = vst [vmem:[#allocation71_spill] sm:$0xff] %v10373_v21 }
 0x2d1   :  { %4743 = vrot.lane.b32.xlu1 %v10181_v52, %s9255_s25 }
 0x2d3   :  { %v10379_v43 = vpop.permute.xlu1 %4488  ;;  %v10381_v31 = vpop.permute.xlu0 %4597 }
 0x2d4   :  { %11525 = vst [vmem:[#allocation72_spill] sm:$0xff] %v10379_v43 }
 0x2d5   :  { %4747 = vrot.lane.b32.xlu1 %v10191_v60, %s9255_s25 }
 0x2d7   :  { %v10385_v42 = vpop.permute.xlu1 %4492  ;;  %v10387_v1 = vpop.permute.xlu0 %4601 }
 0x2d8   :  { %11526 = vst [vmem:[#allocation73_spill] sm:$0xff] %v10385_v42 }
 0x2db   :  { %v10389_v5 = vpop.permute.xlu1 %4591  ;;  %v4614_v29 = vpop.permute.xlu0 %4613 }
 0x2dc   :  { %v4757_v62 = vcombine.low %v10133_v7, %v4614_v29  ;;  %v4758_v30 = vcombine.high %v10133_v7, %v4614_v29 }
 0x2de   :  { %v4765_v61 = vrot.slane %v4757_v62, %v9508_v38 }
 0x2df   :  { %v10391_v21 = vpop.permute.xlu1 %4595  ;;  %v10393_v33 = vpop.permute.xlu0 %4617 }
 0x2e3   :  { %v10395_v49 = vpop.permute.xlu1 %4599  ;;  %v10397_v36 = vpop.permute.xlu0 %4621 }
 0x2e7   :  { %v10399_v43 = vpop.permute.xlu1 %4603  ;;  %v10401_v48 = vpop.permute.xlu0 %4625 }
 0x2e8   :  { %11527 = vst [vmem:[#allocation74_spill] sm:$0xff] %v10399_v43  ;;  %11528 = vst [vmem:[#allocation75_spill] sm:$0xff] %v10401_v48 }
 0x2eb   :  { %v10403_v10 = vpop.permute.xlu1 %4615  ;;  %v4638_v42 = vpop.permute.xlu0 %4637 }
 0x2ec   :  { %v4773_v56 = vcombine.low %v10369_v26, %v4638_v42  ;;  %v4774_v27 = vcombine.high %v10369_v26, %v4638_v42  ;;  %v4772_v26 = vrot.slane %v4758_v30, %v9508_v38 }
 0x2ee   :  { %v4781_v9 = vrot.slane %v4773_v56, %v9508_v38 }
 0x2ef   :  { %v10405_v25 = vpop.permute.xlu1 %4619  ;;  %v10407_v19 = vpop.permute.xlu0 %4641 }
 0x2f0   :  { %v4821_v43 = vcombine.low %v4765_v61, %v4781_v9 }
 0x2f3   :  { %v10409_v44 = vpop.permute.xlu1 %4623  ;;  %v10411_v51 = vpop.permute.xlu0 %4645 }
 0x2f7   :  { %v10413_v8 = vpop.permute.xlu1 %4627  ;;  %v10415_v11 = vpop.permute.xlu0 %4649 }
 0x2f8   :  { %11529 = vst [vmem:[#allocation76_spill] sm:$0xff] %v10413_v8 }
 0x2fb   :  { %v10417_v54 = vpop.permute.xlu1 %4639  ;;  %v4662_v45 = vpop.permute.xlu0 %4661 }
 0x2fc   :  { %v4909_v30 = vcombine.low %v10389_v5, %v10417_v54 }
 0x2ff   :  { %v10419_v39 = vpop.permute.xlu1 %4643  ;;  %v10421_v63 = vpop.permute.xlu0 %4665 }
 0x303   :  { %v10423_v41 = vpop.permute.xlu1 %4647  ;;  %v10425_v37 = vpop.permute.xlu0 %4669 }
 0x307   :  { %v10427_v23 = vpop.permute.xlu1 %4651  ;;  %v10429_v22 = vpop.permute.xlu0 %4673 }
 0x308   :  { %11530 = vst [vmem:[#allocation77_spill] sm:$0xff] %v10427_v23  ;;  %11531 = vst [vmem:[#allocation78_spill] sm:$0xff] %v10429_v22 }
 0x30b   :  { %v10431_v47 = vpop.permute.xlu1 %4663  ;;  %v4686_v58 = vpop.permute.xlu0 %4685 }
 0x30f   :  { %v10433_v4 = vpop.permute.xlu1 %4667  ;;  %v10435_v50 = vpop.permute.xlu0 %4689 }
 0x313   :  { %v10437_v16 = vpop.permute.xlu1 %4671  ;;  %v10439_v46 = vpop.permute.xlu0 %4693 }
 0x317   :  { %v10441_v18 = vpop.permute.xlu1 %4675  ;;  %v10443_v17 = vpop.permute.xlu0 %4697 }
 0x318   :  { %11532 = vst [vmem:[#allocation79_spill] sm:$0xff] %v10441_v18  ;;  %v4788_v18 = vrot.slane %v4774_v27, %v9508_v38  ;;  %v4822_v27 = vcombine.high %v4765_v61, %v4781_v9  ;;  %v4893_v61 = vcombine.low %v10161_v53, %v10403_v10 }
 0x31a   :  { %v4837_v29 = vcombine.low %v4772_v26, %v4788_v18  ;;  %v4838_v22 = vcombine.high %v4772_v26, %v4788_v18  ;;  %v4917_v18 = vrot.slane %v4909_v30, %v9508_v38 }
 0x31b   :  { %v10445_v6 = vpop.permute.xlu1 %4687  ;;  %v4710_v14 = vpop.permute.xlu0 %4709 }
 0x31c   :  { %v4789_v3 = vcombine.low %v4662_v45, %v4710_v14  ;;  %v4790_v55 = vcombine.high %v4662_v45, %v4710_v14  ;;  %v4852_v26 = vrot.slane %v4838_v22, %v9522_v59 }
 0x31e   :  { %v4797_v23 = vrot.slane %v4789_v3, %v9508_v38  ;;  %v4804_v42 = vrot.slane %v4790_v55, %v9508_v38 }
 0x31f   :  { %v10447_v2 = vpop.permute.xlu1 %4691  ;;  %v10449_v40 = vpop.permute.xlu0 %4713 }
 0x323   :  { %v10451_v34 = vpop.permute.xlu1 %4695  ;;  %v10453_v13 = vpop.permute.xlu0 %4717 }
 0x327   :  { %v10456_v24 = vpop.permute.xlu1 %4699  ;;  %v10459_v0 = vpop.permute.xlu0 %4721 }
 0x328   :  { %11533 = vst [vmem:[#allocation80_spill] sm:$0xff] %v10456_v24 }
 0x32b   :  { %v10463_v15 = vpop.permute.xlu1 %4711  ;;  %v4734_v32 = vpop.permute.xlu0 %4733 }
 0x32c   :  { %v4805_v60 = vcombine.low %v4686_v58, %v4734_v32  ;;  %v4806_v8 = vcombine.high %v4686_v58, %v4734_v32  ;;  %v4829_v58 = vrot.slane %v4821_v43, %v9522_v59  ;;  %v4836_v43 = vrot.slane %v4822_v27, %v9522_v59 }
 0x32e   :  { %v4813_v56 = vrot.slane %v4805_v60, %v9508_v38  ;;  %v4820_v14 = vrot.slane %v4806_v8, %v9508_v38 }
 0x32f   :  { %v10472_v45 = vpop.permute.xlu1 %4715 }
 0x330   :  { %v4853_v62 = vcombine.low %v4797_v23, %v4813_v56  ;;  %v4869_v24 = vcombine.low %v4804_v42, %v4820_v14  ;;  %v4854_v7 = vcombine.high %v4797_v23, %v4813_v56  ;;  %v4870_v55 = vcombine.high %v4804_v42, %v4820_v14 }
 0x331   :  { %v4845_v56 = vrot.slane %v4837_v29, %v9522_v59  ;;  %v4925_v14 = vcombine.low %v10431_v47, %v10463_v15 }
 0x332   :  { %v4861_v3 = vrot.slane %v4853_v62, %v9522_v59  ;;  %v4877_v8 = vrot.slane %v4869_v24, %v9522_v59  ;;  %v4868_v48 = vrot.slane %v4854_v7, %v9522_v59  ;;  %v4884_v24 = vrot.slane %v4870_v55, %v9522_v59 }
 0x333   :  { %v10475_v32 = vpop.permute.xlu1 %4719  ;;  %v4901_v7 = vrot.slane %v4893_v61, %v9508_v38  ;;  %v4933_v30 = vrot.slane %v4925_v14, %v9508_v38 }
 0x334   :  { %v4886_v20 = vcombine.high %v4829_v58, %v4861_v3  ;;  %v4885_v60 = vcombine.low %v4829_v58, %v4861_v3  ;;  %v4890_v9 = vcombine.high %v4845_v56, %v4877_v8  ;;  %v4887_v42 = vcombine.low %v4836_v43, %v4868_v48 }
 0x335   :  { %v4892_v58 = vcombine.high %v4852_v26, %v4884_v24  ;;  %v4910_v3 = vcombine.high %v10389_v5, %v10417_v54  ;;  %v4888_v27 = vcombine.high %v4836_v43, %v4868_v48  ;;  %v4957_v55 = vcombine.low %v4901_v7, %v4917_v18  ;;  %v4738_v54 = vpop.permute.xlu0 %4737 }
 0x336   :  { %5877 = vxpose.xlu1.b32.start.end [1/1] (short) (narrow) %v4886_v20, 8  ;;  %5845 = vxpose.xlu0.b32.start.end [1/1] (short) (narrow) %v4885_v60, 8  ;;  %v4926_v60 = vcombine.high %v10431_v47, %v10463_v15  ;;  %v4889_v48 = vcombine.low %v4845_v56, %v4877_v8  ;;  %v4958_v43 = vcombine.high %v4901_v7, %v4917_v18 }
 0x337   :  { %v10483_v23 = vpop.permute.xlu1 %4723  ;;  %v4924_v5 = vrot.slane %v4910_v3, %v9508_v38  ;;  %v4965_v47 = vrot.slane %v4957_v55, %v9522_v59  ;;  %v5045_v8 = vcombine.low %v10375_v57, %v10407_v19  ;;  %v5061_v18 = vcombine.low %v10421_v63, %v10449_v40 }
 0x338   :  { %v4940_v15 = vrot.slane %v4926_v60, %v9508_v38  ;;  %v4972_v7 = vrot.slane %v4958_v43, %v9522_v59  ;;  %v5029_v3 = vcombine.low %v10139_v28, %v10393_v33 }
 0x33a   :  { %6005 = vxpose.xlu1.b32.start.end [1/1] (short) (narrow) %v4890_v9, 8  ;;  %5909 = vxpose.xlu0.b32.start.end [1/1] (short) (narrow) %v4887_v42, 8  ;;  %v4894_v9 = vcombine.high %v10161_v53, %v10403_v10  ;;  %v5077_v53 = vcombine.low %v10435_v50, %v4738_v54 }
 0x33b   :  { %v4736_v20 = vpop.permute.xlu1 %4735 }
 0x33c   :  { %v4941_v62 = vcombine.low %v10445_v6, %v4736_v20  ;;  %v4942_v29 = vcombine.high %v10445_v6, %v4736_v20  ;;  %v4908_v20 = vrot.slane %v4894_v9, %v9508_v38  ;;  %v5069_v9 = vrot.slane %v5061_v18, %v9508_v38 }
 0x33e   :  { %v4949_v22 = vrot.slane %v4941_v62, %v9508_v38  ;;  %6069 = vxpose.xlu1.b32.start.end [1/1] (short) (narrow) %v4892_v58, 8  ;;  %5941 = vxpose.xlu0.b32.start.end [1/1] (short) (narrow) %v4888_v27, 8  ;;  %v4956_v6 = vrot.slane %v4942_v29, %v9508_v38  ;;  %v4891_v58 = vcombine.low %v4852_v26, %v4884_v24 }
 0x33f   :  { %v4973_v56 = vcombine.low %v4908_v20, %v4924_v5  ;;  %v5085_v27 = vrot.slane %v5077_v53, %v9508_v38 }
 0x340   :  { %v4989_v61 = vcombine.low %v4933_v30, %v4949_v22  ;;  %v4990_v42 = vcombine.high %v4933_v30, %v4949_v22  ;;  %v5005_v10 = vcombine.low %v4940_v15, %v4956_v6  ;;  %v5006_v55 = vcombine.high %v4940_v15, %v4956_v6 }
 0x341   :  { %v5053_v30 = vrot.slane %v5045_v8, %v9508_v38  ;;  %v4974_v22 = vcombine.high %v4908_v20, %v4924_v5  ;;  %v5125_v43 = vcombine.low %v5069_v9, %v5085_v27  ;;  %v5062_v5 = vcombine.high %v10421_v63, %v10449_v40 }
 0x342   :  { %v4997_v14 = vrot.slane %v4989_v61, %v9522_v59  ;;  %5973 = vxpose.xlu0.b32.start.end [1/1] (short) (narrow) %v4889_v48, 8  ;;  %v5004_v29 = vrot.slane %v4990_v42, %v9522_v59  ;;  %v5013_v24 = vrot.slane %v5005_v10, %v9522_v59  ;;  %v4981_v61 = vrot.slane %v4973_v56, %v9522_v59 }
 0x343   :  { %v5037_v42 = vrot.slane %v5029_v3, %v9508_v38  ;;  %v5078_v48 = vcombine.high %v10435_v50, %v4738_v54  ;;  %v5020_v6 = vrot.slane %v5006_v55, %v9522_v59  ;;  %v4988_v20 = vrot.slane %v4974_v22, %v9522_v59 }
 0x344   :  { %v5022_v62 = vcombine.high %v4965_v47, %v4997_v14  ;;  %v5024_v60 = vcombine.high %v4972_v7, %v5004_v29  ;;  %v5021_v26 = vcombine.low %v4965_v47, %v4997_v14  ;;  %v5026_v53 = vcombine.high %v4981_v61, %v5013_v24 }
 0x345   :  { %v5023_v15 = vcombine.low %v4972_v7, %v5004_v29  ;;  %v5046_v47 = vcombine.high %v10375_v57, %v10407_v19  ;;  %v5093_v14 = vcombine.low %v5037_v42, %v5053_v30  ;;  %v5030_v10 = vcombine.high %v10139_v28, %v10393_v33 }
 0x346   :  { %6133 = vxpose.xlu1.b32.start.end [1/1] (short) (narrow) %v5022_v62, 8  ;;  %6037 = vxpose.xlu0.b32.start.end [1/1] (short) (narrow) %v4891_v58, 8  ;;  %v5092_v50 = vrot.slane %v5078_v48, %v9508_v38  ;;  %v5126_v54 = vcombine.high %v5069_v9, %v5085_v27  ;;  %v5028_v62 = vcombine.high %v4988_v20, %v5020_v6  ;;  %v4740_v58 = vpop.permute.xlu1 %4739 }
 0x347   :  { %v5133_v29 = vrot.slane %v5125_v43, %v9522_v59  ;;  %v5025_v8 = vcombine.low %v4981_v61, %v5013_v24  ;;  %v5060_v19 = vrot.slane %v5046_v47, %v9508_v38  ;;  %v5094_v57 = vcombine.high %v5037_v42, %v5053_v30 }
 0x348   :  { %v5076_v63 = vrot.slane %v5062_v5, %v9508_v38  ;;  %v5101_v40 = vrot.slane %v5093_v14, %v9522_v59  ;;  %v5044_v56 = vrot.slane %v5030_v10, %v9508_v38  ;;  %v5213_v33 = vcombine.low %v10447_v2, %v4740_v58 }
 0x349   :  { %v5140_v7 = vrot.slane %v5126_v54, %v9522_v59  ;;  %v5027_v3 = vcombine.low %v4988_v20, %v5020_v6  ;;  %v5181_v55 = vcombine.low %v10391_v21, %v10419_v39  ;;  %v5108_v24 = vrot.slane %v5094_v57, %v9522_v59 }
 0x34a   :  { %6197 = vxpose.xlu1.b32.start.end [1/1] (short) (narrow) %v5024_v60, 8  ;;  %6101 = vxpose.xlu0.b32.start.end [1/1] (short) (narrow) %v5021_v26, 8  ;;  %v5141_v28 = vcombine.low %v5076_v63, %v5092_v50  ;;  %v5158_v18 = vcombine.high %v5101_v40, %v5133_v29  ;;  %v5109_v27 = vcombine.low %v5044_v56, %v5060_v19 }
 0x34b   :  { %v5197_v60 = vcombine.low %v10433_v4, %v10472_v45  ;;  %v5165_v26 = vcombine.low %v10171_v12, %v10405_v25  ;;  %v5142_v30 = vcombine.high %v5076_v63, %v5092_v50  ;;  %v5221_v22 = vrot.slane %v5213_v33, %v9508_v38  ;;  %v4742_v63 = vpop.permute.xlu0 %4741 }
 0x34c   :  { %v5160_v9 = vcombine.high %v5108_v24, %v5140_v7  ;;  %v5149_v61 = vrot.slane %v5141_v28, %v9522_v59  ;;  %v5157_v42 = vcombine.low %v5101_v40, %v5133_v29  ;;  %v5110_v48 = vcombine.high %v5044_v56, %v5060_v19 }
 0x34d   :  { %v5189_v43 = vrot.slane %v5181_v55, %v9508_v38  ;;  %v5117_v6 = vrot.slane %v5109_v27, %v9522_v59  ;;  %v5214_v47 = vcombine.high %v10447_v2, %v4740_v58  ;;  %v5156_v20 = vrot.slane %v5142_v30, %v9522_v59 }
 0x34e   :  { %6261 = vxpose.xlu1.b32.start.end [1/1] (short) (narrow) %v5026_v53, 8  ;;  %6165 = vxpose.xlu0.b32.start.end [1/1] (short) (narrow) %v5023_v15, 8  ;;  %v5205_v53 = vrot.slane %v5197_v60, %v9508_v38  ;;  %v5173_v15 = vrot.slane %v5165_v26, %v9508_v38  ;;  %v5159_v10 = vcombine.low %v5108_v24, %v5140_v7 }
 0x34f   :  { %v5162_v5 = vcombine.high %v5117_v6, %v5149_v61  ;;  %v5182_v50 = vcombine.high %v10391_v21, %v10419_v39  ;;  %v5124_v29 = vrot.slane %v5110_v48, %v9522_v59  ;;  %v5228_v2 = vrot.slane %v5214_v47, %v9508_v38 }
 0x350   :  { %v5261_v14 = vcombine.low %v5205_v53, %v5221_v22  ;;  %v5229_v54 = vcombine.low %v5173_v15, %v5189_v43  ;;  %v5262_v58 = vcombine.high %v5205_v53, %v5221_v22  ;;  %v5161_v40 = vcombine.low %v5117_v6, %v5149_v61 }
 0x351   :  { %v5164_v19 = vcombine.high %v5124_v29, %v5156_v20  ;;  %v5196_v21 = vrot.slane %v5182_v50, %v9508_v38  ;;  %v5230_v39 = vcombine.high %v5173_v15, %v5189_v43  ;;  %v5317_v7 = vcombine.low %v10381_v31, %v10411_v51 }
 0x352   :  { %6325 = vxpose.xlu1.b32.start.end [1/1] (short) (narrow) %v5028_v62, 8  ;;  %6229 = vxpose.xlu0.b32.start.end [1/1] (short) (narrow) %v5025_v8, 8  ;;  %v5198_v62 = vcombine.high %v10433_v4, %v10472_v45  ;;  %v5166_v8 = vcombine.high %v10171_v12, %v10405_v25  ;;  %v5269_v57 = vrot.slane %v5261_v14, %v9522_v59 }
 0x353   :  { %v5237_v45 = vrot.slane %v5229_v54, %v9522_v59  ;;  %v5349_v12 = vcombine.low %v10439_v46, %v4742_v63  ;;  %v5276_v33 = vrot.slane %v5262_v58, %v9522_v59  ;;  %v5333_v27 = vcombine.low %v10425_v37, %v10453_v13  ;;  %v4744_v58 = vpop.permute.xlu1 %4743 }
 0x354   :  { %v5212_v4 = vrot.slane %v5198_v62, %v9508_v38  ;;  %v5180_v56 = vrot.slane %v5166_v8, %v9508_v38  ;;  %v5244_v55 = vrot.slane %v5230_v39, %v9522_v59  ;;  %v5301_v60 = vcombine.low %v10145_v35, %v10397_v36 }
 0x355   :  { %v5294_v28 = vcombine.high %v5237_v45, %v5269_v57  ;;  %v5357_v24 = vrot.slane %v5349_v12, %v9508_v38  ;;  %v5325_v61 = vrot.slane %v5317_v7, %v9508_v38  ;;  %v5341_v48 = vrot.slane %v5333_v27, %v9508_v38 }
 0x356   :  { %6389 = vxpose.xlu1.b32.start.end [1/1] (short) (narrow) %v5158_v18, 8  ;;  %6293 = vxpose.xlu0.b32.start.end [1/1] (short) (narrow) %v5027_v3, 8  ;;  %v5277_v25 = vcombine.low %v5212_v4, %v5228_v2  ;;  %v5163_v18 = vcombine.low %v5124_v29, %v5156_v20  ;;  %v5245_v3 = vcombine.low %v5180_v56, %v5196_v21 }
 0x357   :  { %v5278_v26 = vcombine.high %v5212_v4, %v5228_v2  ;;  %v5296_v30 = vcombine.high %v5244_v55, %v5276_v33  ;;  %v5309_v53 = vrot.slane %v5301_v60, %v9508_v38  ;;  %v5350_v6 = vcombine.high %v10439_v46, %v4742_v63 }
 0x358   :  { %v5285_v22 = vrot.slane %v5277_v25, %v9522_v59  ;;  %v5253_v43 = vrot.slane %v5245_v3, %v9522_v59  ;;  %v5397_v15 = vcombine.low %v5341_v48, %v5357_v24  ;;  %v5318_v20 = vcombine.high %v10381_v31, %v10411_v51 }
 0x359   :  { %v5292_v14 = vrot.slane %v5278_v26, %v9522_v59  ;;  %v5334_v50 = vcombine.high %v10425_v37, %v10453_v13  ;;  %v5302_v62 = vcombine.high %v10145_v35, %v10397_v36  ;;  %v5364_v46 = vrot.slane %v5350_v6, %v9508_v38 }
 0x35a   :  { %6453 = vxpose.xlu1.b32.start.end [1/1] (short) (narrow) %v5160_v9, 8  ;;  %6357 = vxpose.xlu0.b32.start.end [1/1] (short) (narrow) %v5157_v42, 8  ;;  %v5293_v9 = vcombine.low %v5237_v45, %v5269_v57  ;;  %v5246_v42 = vcombine.high %v5180_v56, %v5196_v21  ;;  %v5298_v47 = vcombine.high %v5253_v43, %v5285_v22 }
 0x35b   :  { %v5398_v29 = vcombine.high %v5341_v48, %v5357_v24  ;;  %v5405_v2 = vrot.slane %v5397_v15, %v9522_v59  ;;  %v5332_v51 = vrot.slane %v5318_v20, %v9508_v38  ;;  %v5366_v31 = vcombine.high %v5309_v53, %v5325_v61 }
 0x35c   :  { %v5260_v54 = vrot.slane %v5246_v42, %v9522_v59  ;;  %v5348_v13 = vrot.slane %v5334_v50, %v9508_v38  ;;  %v5316_v57 = vrot.slane %v5302_v62, %v9508_v38  ;;  %v5485_v36 = vcombine.low %v10451_v34, %v4744_v58 }
 0x35d   :  { %v5453_v4 = vcombine.low %v10395_v49, %v10423_v41  ;;  %v5469_v45 = vcombine.low %v10437_v16, %v10475_v32  ;;  %v5380_v56 = vrot.slane %v5366_v31, %v9522_v59  ;;  %v5437_v12 = vcombine.low %v10181_v52, %v10409_v44 }
 0x35e   :  { %6517 = vxpose.xlu1.b32.start.end [1/1] (short) (narrow) %v5162_v5, 8  ;;  %6421 = vxpose.xlu0.b32.start.end [1/1] (short) (narrow) %v5159_v10, 8  ;;  %v5295_v5 = vcombine.low %v5244_v55, %v5276_v33  ;;  %v5365_v10 = vcombine.low %v5309_v53, %v5325_v61  ;;  %v5300_v8 = vcombine.high %v5260_v54, %v5292_v14 }
 0x35f   :  { %v5413_v35 = vcombine.low %v5348_v13, %v5364_v46  ;;  %v5299_v21 = vcombine.low %v5260_v54, %v5292_v14  ;;  %v5381_v39 = vcombine.low %v5316_v57, %v5332_v51  ;;  %v5414_v25 = vcombine.high %v5348_v13, %v5364_v46 }
 0x360   :  { %v5373_v37 = vrot.slane %v5365_v10, %v9522_v59  ;;  %v5382_v3 = vcombine.high %v5316_v57, %v5332_v51  ;;  %v5461_v27 = vrot.slane %v5453_v4, %v9508_v38  ;;  %v5477_v55 = vrot.slane %v5469_v45, %v9508_v38  ;;  %v11536_v51 = vld [vmem:[#allocation19_spill] sm:$0xff] }
 0x361   :  { %v5389_v60 = vrot.slane %v5381_v39, %v9522_v59  ;;  %v5445_v24 = vrot.slane %v5437_v12, %v9508_v38  ;;  %v5486_v26 = vcombine.high %v10451_v34, %v4744_v58  ;;  %v5454_v42 = vcombine.high %v10395_v49, %v10423_v41 }
 0x362   :  { %6581 = vxpose.xlu1.b32.start.end [1/1] (short) (narrow) %v5164_v19, 8  ;;  %6485 = vxpose.xlu0.b32.start.end [1/1] (short) (narrow) %v5161_v40, 8  ;;  %v5297_v19 = vcombine.low %v5253_v43, %v5285_v22  ;;  %v5430_v63 = vcombine.high %v5373_v37, %v5405_v2  ;;  %v5412_v40 = vrot.slane %v5398_v29, %v9522_v59 }
 0x363   :  { %v5429_v7 = vcombine.low %v5373_v37, %v5405_v2  ;;  %v5501_v48 = vcombine.low %v5445_v24, %v5461_v27  ;;  %v5470_v43 = vcombine.high %v10437_v16, %v10475_v32  ;;  %v5396_v53 = vrot.slane %v5382_v3, %v9522_v59 }
 0x364   :  { %v5432_v33 = vcombine.high %v5380_v56, %v5412_v40  ;;  %v5431_v61 = vcombine.low %v5380_v56, %v5412_v40  ;;  %v5438_v6 = vcombine.high %v10181_v52, %v10409_v44  ;;  %v5500_v34 = vrot.slane %v5486_v26, %v9508_v38  ;;  %v4748_v26 = vpop.permute.xlu1 %4747 }
 0x365   :  { %v5468_v41 = vrot.slane %v5454_v42, %v9508_v38  ;;  %v5502_v49 = vcombine.high %v5445_v24, %v5461_v27  ;;  %v5484_v16 = vrot.slane %v5470_v43, %v9508_v38  ;;  %v5509_v32 = vrot.slane %v5501_v48, %v9522_v59  ;;  %v11537_v42 = vld [vmem:[#allocation80_spill] sm:$0xff] }
 0x366   :  { %6645 = vxpose.xlu1.b32.start.end [1/1] (short) (narrow) %v5294_v28, 8  ;;  %6549 = vxpose.xlu0.b32.start.end [1/1] (short) (narrow) %v5163_v18, 8  ;;  %v5493_v28 = vrot.slane %v5485_v36, %v9508_v38  ;;  %v5421_v18 = vrot.slane %v5413_v35, %v9522_v59  ;;  %v5452_v10 = vrot.slane %v5438_v6, %v9508_v38 }
 0x367   :  { %v5549_v44 = vcombine.low %v5484_v16, %v5500_v34  ;;  %v5589_v46 = vcombine.low %v10387_v1, %v10415_v11  ;;  %v5516_v58 = vrot.slane %v5502_v49, %v9522_v59  ;;  %v5550_v37 = vcombine.high %v5484_v16, %v5500_v34  ;;  %v11541_v49 = vld [vmem:[#allocation76_spill] sm:$0xff]  ;;  %v11542_v16 = vld [vmem:[#allocation25_spill] sm:$0xff] }
 0x368   :  { %v5434_v22 = vcombine.high %v5389_v60, %v5421_v18  ;;  %v5534_v15 = vcombine.high %v5477_v55, %v5493_v28  ;;  %v5433_v20 = vcombine.low %v5389_v60, %v5421_v18  ;;  %v5517_v29 = vcombine.low %v5452_v10, %v5468_v41 }
 0x369   :  { %v5557_v35 = vrot.slane %v5549_v44, %v9522_v59  ;;  %v5518_v40 = vcombine.high %v5452_v10, %v5468_v41  ;;  %v5757_v48 = vcombine.low %v11537_v42, %v4748_v26 }
 0x36a   :  { %6709 = vxpose.xlu1.b32.start.end [1/1] (short) (narrow) %v5296_v30, 8  ;;  %6613 = vxpose.xlu0.b32.start.end [1/1] (short) (narrow) %v5293_v9, 8  ;;  %v5533_v30 = vcombine.low %v5477_v55, %v5493_v28  ;;  %v5428_v9 = vrot.slane %v5414_v25, %v9522_v59  ;;  %v5548_v54 = vrot.slane %v5534_v15, %v9522_v59  ;;  %v11538_v15 = vld [vmem:[#allocation77_spill] sm:$0xff] }
 0x36b   :  { %v5525_v39 = vrot.slane %v5517_v29, %v9522_v59  ;;  %v5564_v25 = vrot.slane %v5550_v37, %v9522_v59  ;;  %v5532_v3 = vrot.slane %v5518_v40, %v9522_v59 }
 0x36c   :  { %v5541_v14 = vrot.slane %v5533_v30, %v9522_v59  ;;  %v5435_v62 = vcombine.low %v5396_v53, %v5428_v9  ;;  %v5568_v57 = vcombine.high %v5516_v58, %v5548_v54  ;;  %v5567_v28 = vcombine.low %v5516_v58, %v5548_v54 }
 0x36d   :  { %v5570_v12 = vcombine.high %v5525_v39, %v5557_v35  ;;  %v5572_v60 = vcombine.high %v5532_v3, %v5564_v25  ;;  %v5569_v30 = vcombine.low %v5525_v39, %v5557_v35  ;;  %v5571_v6 = vcombine.low %v5532_v3, %v5564_v25 }
 0x36e   :  { %6773 = vxpose.xlu1.b32.start.end [1/1] (short) (narrow) %v5298_v47, 8  ;;  %6677 = vxpose.xlu0.b32.start.end [1/1] (short) (narrow) %v5295_v5, 8  ;;  %v5436_v47 = vcombine.high %v5396_v53, %v5428_v9  ;;  %v4746_v5 = vpop.permute.xlu0 %4745  ;;  %v5566_v50 = vcombine.high %v5509_v32, %v5541_v14  ;;  %v5565_v36 = vcombine.low %v5509_v32, %v5541_v14 }
 0x36f   :  { %v5621_v52 = vcombine.low %v10443_v17, %v4746_v5  ;;  %v5622_v45 = vcombine.high %v10443_v17, %v4746_v5  ;;  %v11540_v5 = vld [vmem:[#allocation79_spill] sm:$0xff]  ;;  %v5709_v32 = vcombine.low %v11542_v16, %v11541_v49  ;;  %v5758_v58 = vcombine.high %v11537_v42, %v4748_v26 }
 0x370   :  { %v5742_v35 = vcombine.high %v11540_v5, %v10483_v23 }
 0x371   :  { %v5629_v13 = vrot.slane %v5621_v52, %v9508_v38  ;;  %v5636_v17 = vrot.slane %v5622_v45, %v9508_v38  ;;  %v5765_v52 = vrot.slane %v5757_v48, %v9508_v38  ;;  %v5772_v40 = vrot.slane %v5758_v58, %v9508_v38 }
 0x372   :  { %6837 = vxpose.xlu1.b32.start.end [1/1] (short) (narrow) %v5300_v8, 8  ;;  %6741 = vxpose.xlu0.b32.start.end [1/1] (short) (narrow) %v5297_v19, 8  ;;  %v11534_v8 = vld [vmem:[#allocation78_spill] sm:$0xff]  ;;  %v11535_v19 = vld [vmem:[#allocation75_spill] sm:$0xff]  ;;  %v5756_v25 = vrot.slane %v5742_v35, %v9508_v38 }
 0x373   :  { %v5605_v2 = vcombine.low %v11534_v8, %v10459_v0  ;;  %v5573_v31 = vcombine.low %v11536_v51, %v11535_v19  ;;  %v5574_v27 = vcombine.high %v11536_v51, %v11535_v19 }
 0x375   :  { %v5581_v4 = vrot.slane %v5573_v31, %v9508_v38  ;;  %v5588_v9 = vrot.slane %v5574_v27, %v9508_v38 }
 0x376   :  { %6901 = vxpose.xlu1.b32.start.end [1/1] (short) (narrow) %v5430_v63, 8  ;;  %6805 = vxpose.xlu0.b32.start.end [1/1] (short) (narrow) %v5299_v21, 8  ;;  %v5597_v63 = vrot.slane %v5589_v46, %v9508_v38  ;;  %v5613_v21 = vrot.slane %v5605_v2, %v9508_v38  ;;  %v5717_v2 = vrot.slane %v5709_v32, %v9508_v38 }
 0x378   :  { %v5669_v56 = vcombine.low %v5613_v21, %v5629_v13  ;;  %v5637_v18 = vcombine.low %v5581_v4, %v5597_v63  ;;  %v5670_v55 = vcombine.high %v5613_v21, %v5629_v13 }
 0x37a   :  { %6965 = vxpose.xlu1.b32.start.end [1/1] (short) (narrow) %v5432_v33, 8  ;;  %6869 = vxpose.xlu0.b32.start.end [1/1] (short) (narrow) %v5429_v7, 8  ;;  %v5590_v33 = vcombine.high %v10387_v1, %v10415_v11  ;;  %v5606_v7 = vcombine.high %v11534_v8, %v10459_v0  ;;  %v5677_v24 = vrot.slane %v5669_v56, %v9522_v59 }
 0x37b   :  { %v5638_v1 = vcombine.high %v5581_v4, %v5597_v63  ;;  %v5684_v53 = vrot.slane %v5670_v55, %v9522_v59  ;;  %v5710_v63 = vcombine.high %v11542_v16, %v11541_v49  ;;  %v5822_v55 = vcombine.high %v5756_v25, %v5772_v40 }
 0x37c   :  { %v5604_v11 = vrot.slane %v5590_v33, %v9508_v38  ;;  %v5620_v0 = vrot.slane %v5606_v7, %v9508_v38  ;;  %v5821_v33 = vcombine.low %v5756_v25, %v5772_v40 }
 0x37d   :  { %v5652_v41 = vrot.slane %v5638_v1, %v9522_v59 }
 0x37e   :  { %7029 = vxpose.xlu1.b32.start.end [1/1] (short) (narrow) %v5434_v22, 8  ;;  %6933 = vxpose.xlu0.b32.start.end [1/1] (short) (narrow) %v5431_v61, 8  ;;  %v5645_v22 = vrot.slane %v5637_v18, %v9522_v59  ;;  %v5685_v61 = vcombine.low %v5620_v0, %v5636_v17  ;;  %v5653_v34 = vcombine.low %v5588_v9, %v5604_v11 }
 0x37f   :  { %v5686_v10 = vcombine.high %v5620_v0, %v5636_v17  ;;  %v5704_v44 = vcombine.high %v5652_v41, %v5684_v53  ;;  %v5703_v13 = vcombine.low %v5652_v41, %v5684_v53  ;;  %v5836_v0 = vrot.slane %v5822_v55, %v9522_v59 }
 0x380   :  { %v5702_v43 = vcombine.high %v5645_v22, %v5677_v24  ;;  %v5701_v54 = vcombine.low %v5645_v22, %v5677_v24  ;;  %v5661_v8 = vrot.slane %v5653_v34, %v9522_v59  ;;  %v5829_v24 = vrot.slane %v5821_v33, %v9522_v59 }
 0x381   :  { %v5700_v31 = vrot.slane %v5686_v10, %v9522_v59 }
 0x382   :  { %7093 = vxpose.xlu1.b32.start.end [1/1] (short) (narrow) %v5436_v47, 8  ;;  %6997 = vxpose.xlu0.b32.start.end [1/1] (short) (narrow) %v5433_v20, 8  ;;  %v11539_v47 = vld [vmem:[#allocation74_spill] sm:$0xff]  ;;  %v5741_v20 = vcombine.low %v11540_v5, %v10483_v23 }
 0x383   :  { %v5725_v14 = vcombine.low %v11539_v47, %v11538_v15  ;;  %v5726_v37 = vcombine.high %v11539_v47, %v11538_v15 }
 0x384   :  { %v5749_v29 = vrot.slane %v5741_v20, %v9508_v38 }
 0x385   :  { %v5733_v46 = vrot.slane %v5725_v14, %v9508_v38  ;;  %v5740_v56 = vrot.slane %v5726_v37, %v9508_v38 }
 0x386   :  { %7157 = vxpose.xlu1.b32.start.end [1/1] (short) (narrow) %v5566_v50, 8  ;;  %7061 = vxpose.xlu0.b32.start.end [1/1] (short) (narrow) %v5435_v62, 8  ;;  %v5693_v50 = vrot.slane %v5685_v61, %v9522_v59  ;;  %v5654_v62 = vcombine.high %v5588_v9, %v5604_v11  ;;  %v5805_v19 = vcombine.low %v5749_v29, %v5765_v52 }
 0x387   :  { %v5806_v21 = vcombine.high %v5749_v29, %v5765_v52 }
 0x388   :  { %v5706_v51 = vcombine.high %v5661_v8, %v5693_v50  ;;  %v5813_v4 = vrot.slane %v5805_v19, %v9522_v59  ;;  %v5705_v45 = vcombine.low %v5661_v8, %v5693_v50 }
 0x389   :  { %v5820_v7 = vrot.slane %v5806_v21, %v9522_v59 }
 0x38a   :  { %7221 = vxpose.xlu1.b32.start.end [1/1] (short) (narrow) %v5568_v57, 8  ;;  %7125 = vxpose.xlu0.b32.start.end [1/1] (short) (narrow) %v5565_v36, 8  ;;  %v5773_v57 = vcombine.low %v5717_v2, %v5733_v46  ;;  %v5668_v36 = vrot.slane %v5654_v62, %v9522_v59 }
 0x38c   :  { %v5708_v39 = vcombine.high %v5668_v36, %v5700_v31  ;;  %v5781_v23 = vrot.slane %v5773_v57, %v9522_v59  ;;  %v5707_v3 = vcombine.low %v5668_v36, %v5700_v31 }
 0x38e   :  { %7285 = vxpose.xlu1.b32.start.end [1/1] (short) (narrow) %v5570_v12, 8  ;;  %7189 = vxpose.xlu0.b32.start.end [1/1] (short) (narrow) %v5567_v28, 8  ;;  %v5774_v12 = vcombine.high %v5717_v2, %v5733_v46  ;;  %v5724_v28 = vrot.slane %v5710_v63, %v9508_v38  ;;  %v5838_v18 = vcombine.high %v5781_v23, %v5813_v4 }
 0x38f   :  { %v5837_v26 = vcombine.low %v5781_v23, %v5813_v4 }
 0x390   :  { %v5789_v27 = vcombine.low %v5724_v28, %v5740_v56  ;;  %v5788_v17 = vrot.slane %v5774_v12, %v9522_v59 }
 0x392   :  { %7349 = vxpose.xlu1.b32.start.end [1/1] (short) (narrow) %v5572_v60, 8  ;;  %7253 = vxpose.xlu0.b32.start.end [1/1] (short) (narrow) %v5569_v30, 8  ;;  %v5840_v60 = vcombine.high %v5788_v17, %v5820_v7  ;;  %v5790_v30 = vcombine.high %v5724_v28, %v5740_v56  ;;  %v5797_v11 = vrot.slane %v5789_v27, %v9522_v59 }
 0x393   :  { %v5839_v22 = vcombine.low %v5788_v17, %v5820_v7 }
 0x394   :  { %v5842_v1 = vcombine.high %v5797_v11, %v5829_v24  ;;  %v5804_v9 = vrot.slane %v5790_v30, %v9522_v59  ;;  %v5841_v42 = vcombine.low %v5797_v11, %v5829_v24 }
 0x396   :  { %7413 = vxpose.xlu1.b32.start.end [1/1] (short) (narrow) %v5702_v43, 8  ;;  %7317 = vxpose.xlu0.b32.start.end [1/1] (short) (narrow) %v5571_v6, 8  ;;  %v5844_v61 = vcombine.high %v5804_v9, %v5836_v0  ;;  %v5843_v48 = vcombine.low %v5804_v9, %v5836_v0 }
 0x39a   :  { %7477 = vxpose.xlu1.b32.start.end [1/1] (short) (narrow) %v5704_v44, 8  ;;  %7381 = vxpose.xlu0.b32.start.end [1/1] (short) (narrow) %v5701_v54, 8 }
 0x39e   :  { %7541 = vxpose.xlu1.b32.start.end [1/1] (short) (narrow) %v5706_v51, 8  ;;  %7445 = vxpose.xlu0.b32.start.end [1/1] (short) (narrow) %v5703_v13, 8  ;;  %v11543_v51 = vmov 0.0  }
 0x3a2   :  { %7605 = vxpose.xlu1.b32.start.end [1/1] (short) (narrow) %v5708_v39, 8  ;;  %7509 = vxpose.xlu0.b32.start.end [1/1] (short) (narrow) %v5705_v45, 8 }
 0x3a6   :  { %7669 = vxpose.xlu1.b32.start.end [1/1] (short) (narrow) %v5838_v18, 8  ;;  %7573 = vxpose.xlu0.b32.start.end [1/1] (short) (narrow) %v5707_v3, 8 }
 0x3aa   :  { %7733 = vxpose.xlu1.b32.start.end [1/1] (short) (narrow) %v5840_v60, 8  ;;  %7637 = vxpose.xlu0.b32.start.end [1/1] (short) (narrow) %v5837_v26, 8 }
 0x3ae   :  { %7797 = vxpose.xlu1.b32.start.end [1/1] (short) (narrow) %v5842_v1, 8  ;;  %7701 = vxpose.xlu0.b32.start.end [1/1] (short) (narrow) %v5839_v22, 8 }
 0x3b2   :  { %7861 = vxpose.xlu1.b32.start.end [1/1] (short) (narrow) %v5844_v61, 8  ;;  %7765 = vxpose.xlu0.b32.start.end [1/1] (short) (narrow) %v5841_v42, 8 }
 0x3b6   :  { %v5893_v43 = vpop.trf.xlu1  ;;  %7829 = vxpose.xlu0.b32.start.end [1/1] (short) (narrow) %v5843_v48, 8  ;;  %v5861_v53 = vpop.trf.xlu0 }
 0x3ba   :  { %v6021_v6 = vpop.trf.xlu1  ;;  %v5925_v34 = vpop.trf.xlu0 }
 0x3bb   :  { %v7893_v20 = vcombine.low %v5861_v53, %v5925_v34 }
 0x3bd   :  { %v7900_v10 = vrot.slane %v7893_v20, %v9508_v38 }
 0x3be   :  { %v5957_v15 = vpop.trf.xlu0  ;;  %v6085_v47 = vpop.trf.xlu1 }
 0x3bf   :  { %v7901_v14 = vcombine.low %v5893_v43, %v5957_v15  ;;  %v7917_v49 = vcombine.low %v6021_v6, %v6085_v47 }
 0x3c1   :  { %v7908_v41 = vrot.slane %v7901_v14, %v9508_v38  ;;  %v7924_v50 = vrot.slane %v7917_v49, %v9508_v38 }
 0x3c2   :  { %v5989_v5 = vpop.trf.xlu0 }
 0x3c3   :  { %v7925_v44 = vcombine.low %v7900_v10, %v7908_v41 }
 0x3c5   :  { %v7932_v8 = vrot.slane %v7925_v44, %v9522_v59 }
 0x3c6   :  { %v6149_v16 = vpop.trf.xlu1  ;;  %v6053_v32 = vpop.trf.xlu0 }
 0x3c7   :  { %v7909_v52 = vcombine.low %v5989_v5, %v6053_v32 }
 0x3c9   :  { %v7916_v54 = vrot.slane %v7909_v52, %v9508_v38 }
 0x3ca   :  { %v6213_v62 = vpop.trf.xlu1  ;;  %v6117_v46 = vpop.trf.xlu0 }
 0x3cb   :  { %v7933_v29 = vcombine.low %v7916_v54, %v7924_v50  ;;  %v7951_v39 = vcombine.low %v6149_v16, %v6213_v62 }
 0x3cd   :  { %v7940_v2 = vrot.slane %v7933_v29, %v9522_v59  ;;  %v7958_v3 = vrot.slane %v7951_v39, %v9508_v38 }
 0x3ce   :  { %v6277_v58 = vpop.trf.xlu1  ;;  %v6181_v19 = vpop.trf.xlu0 }
 0x3cf   :  { %v9168_v31 = vcombine.high %v7940_v2, %v11543_v51  ;;  %v7941_v13 = vcombine.low %v7932_v8, %v7940_v2  ;;  %v7942_v37 = vcombine.high %v7932_v8, %v7940_v2  ;;  %v7943_v57 = vcombine.low %v6117_v46, %v6181_v19 }
 0x3d1   :  { %v10705_v36 = vrot.slane %v7941_v13, %v9508_v38  ;;  %v10708_v63 = vrot.slane %v7942_v37, %v9508_v38  ;;  %v8293_v40 = vcombine.high %v7941_v13, %v11543_v51  ;;  %v10717_v56 = vrot.slane %v9168_v31, %v9508_v38 }
 0x3d2   :  { %v6341_v35 = vpop.trf.xlu1  ;;  %v6245_v21 = vpop.trf.xlu0  ;;  %v7950_v12 = vrot.slane %v7943_v57, %v9508_v38 }
 0x3d3   :  { %v8324_v4 = vcombine.high %v10705_v36, %v10708_v63  ;;  %v10714_v45 = vrot.slane %v8293_v40, %v9508_v38  ;;  %v7967_v25 = vcombine.low %v6277_v58, %v6341_v35  ;;  %v8323_v28 = vcombine.low %v10705_v36, %v10708_v63 }
 0x3d4   :  { %v7975_v17 = vcombine.low %v7950_v12, %v7958_v3 }
 0x3d5   :  { %v8339_v33 = vcombine.low %v10714_v45, %v10717_v56  ;;  %v7974_v55 = vrot.slane %v7967_v25, %v9508_v38  ;;  %v10730_v26 = vrot.slane %v8323_v28, %v9522_v59 }
 0x3d6   :  { %v6405_v23 = vpop.trf.xlu1  ;;  %v6309_v18 = vpop.trf.xlu0  ;;  %v7982_v1 = vrot.slane %v7975_v17, %v9522_v59 }
 0x3d7   :  { %v7959_v27 = vcombine.low %v6245_v21, %v6309_v18  ;;  %v8355_v9 = vcombine.high %v10730_v26, %v11543_v51 }
 0x3d9   :  { %v7966_v60 = vrot.slane %v7959_v27, %v9508_v38 }
 0x3da   :  { %v6469_v24 = vpop.trf.xlu1  ;;  %v6373_v30 = vpop.trf.xlu0 }
 0x3db   :  { %v7983_v11 = vcombine.low %v7966_v60, %v7974_v55  ;;  %v8001_v14 = vcombine.low %v6405_v23, %v6469_v24 }
 0x3dd   :  { %v7990_v0 = vrot.slane %v7983_v11, %v9522_v59  ;;  %v8008_v46 = vrot.slane %v8001_v14, %v9508_v38 }
 0x3de   :  { %v6533_v22 = vpop.trf.xlu1  ;;  %v6437_v61 = vpop.trf.xlu0 }
 0x3df   :  { %v9169_v42 = vcombine.high %v7990_v0, %v11543_v51  ;;  %8829 = vrot.lane.b32.xlu0 %v8355_v9, %s9248_s17  ;;  %v7991_v48 = vcombine.low %v7982_v1, %v7990_v0  ;;  %v7992_v43 = vcombine.high %v7982_v1, %v7990_v0  ;;  %v7993_v53 = vcombine.low %v6373_v30, %v6437_v61 }
 0x3e1   :  { %v10739_v34 = vrot.slane %v7991_v48, %v9508_v38  ;;  %v10742_v15 = vrot.slane %v7992_v43, %v9508_v38  ;;  %v8359_v47 = vcombine.high %v7991_v48, %v11543_v51  ;;  %v10753_v16 = vrot.slane %v9169_v42, %v9508_v38 }
 0x3e2   :  { %v6597_v6 = vpop.trf.xlu1  ;;  %v6501_v5 = vpop.trf.xlu0  ;;  %v8000_v32 = vrot.slane %v7993_v53, %v9508_v38 }
 0x3e3   :  { %v8389_v20 = vcombine.low %v10739_v34, %v10742_v15  ;;  %v8390_v41 = vcombine.high %v10739_v34, %v10742_v15  ;;  %v10750_v49 = vrot.slane %v8359_v47, %v9508_v38  ;;  %v8017_v10 = vcombine.low %v6533_v22, %v6597_v6 }
 0x3e4   :  { %v8025_v2 = vcombine.low %v8000_v32, %v8008_v46 }
 0x3e5   :  { %v10757_v44 = vrot.slane %v8389_v20, %v9522_v59  ;;  %v8405_v50 = vcombine.low %v10750_v49, %v10753_v16  ;;  %v8024_v58 = vrot.slane %v8017_v10, %v9508_v38 }
 0x3e6   :  { %v6661_v52 = vpop.trf.xlu1  ;;  %v6565_v54 = vpop.trf.xlu0  ;;  %v8032_v57 = vrot.slane %v8025_v2, %v9522_v59 }
 0x3e7   :  { %v8009_v29 = vcombine.low %v6501_v5, %v6565_v54  ;;  %v8421_v8 = vcombine.high %v10757_v44, %v11543_v51 }
 0x3e9   :  { %v8016_v19 = vrot.slane %v8009_v29, %v9508_v38  ;;  %8831 = vrot.lane.b32.xlu1 %v8421_v8, %s9248_s17 }
 0x3ea   :  { %v6725_v31 = vpop.trf.xlu1  ;;  %v6629_v13 = vpop.trf.xlu0 }
 0x3eb   :  { %v8033_v37 = vcombine.low %v8016_v19, %v8024_v58  ;;  %v8051_v17 = vcombine.low %v6661_v52, %v6725_v31 }
 0x3ed   :  { %v8040_v35 = vrot.slane %v8033_v37, %v9522_v59  ;;  %v8058_v43 = vrot.slane %v8051_v17, %v9508_v38 }
 0x3ee   :  { %v6789_v40 = vpop.trf.xlu1  ;;  %v6693_v21 = vpop.trf.xlu0 }
 0x3ef   :  { %v8041_v39 = vcombine.low %v8032_v57, %v8040_v35  ;;  %v8042_v12 = vcombine.high %v8032_v57, %v8040_v35  ;;  %v9170_v25 = vcombine.high %v8040_v35, %v11543_v51  ;;  %v8043_v28 = vcombine.low %v6629_v13, %v6693_v21 }
 0x3f1   :  { %v8425_v23 = vcombine.high %v8041_v39, %v11543_v51  ;;  %v10774_v3 = vrot.slane %v8041_v39, %v9508_v38  ;;  %v10777_v27 = vrot.slane %v8042_v12, %v9508_v38  ;;  %v10787_v11 = vrot.slane %v9170_v25, %v9508_v38 }
 0x3f2   :  { %v6853_v18 = vpop.trf.xlu1  ;;  %v6757_v55 = vpop.trf.xlu0  ;;  %v8050_v1 = vrot.slane %v8043_v28, %v9508_v38 }
 0x3f3   :  { %v8455_v60 = vcombine.low %v10774_v3, %v10777_v27  ;;  %v8456_v24 = vcombine.high %v10774_v3, %v10777_v27  ;;  %v10784_v30 = vrot.slane %v8425_v23, %v9508_v38  ;;  %v8067_v0 = vcombine.low %v6789_v40, %v6853_v18 }
 0x3f4   :  { %v8075_v47 = vcombine.low %v8050_v1, %v8058_v43 }
 0x3f5   :  { %v10791_v9 = vrot.slane %v8455_v60, %v9522_v59  ;;  %v8471_v61 = vcombine.low %v10784_v30, %v10787_v11  ;;  %v8074_v14 = vrot.slane %v8067_v0, %v9508_v38 }
 0x3f6   :  { %v6917_v22 = vpop.trf.xlu1  ;;  %v6821_v42 = vpop.trf.xlu0  ;;  %v8082_v52 = vrot.slane %v8075_v47, %v9522_v59 }
 0x3f7   :  { %v8059_v53 = vcombine.low %v6757_v55, %v6821_v42  ;;  %v8487_v6 = vcombine.high %v10791_v9, %v11543_v51 }
 0x3f9   :  { %v8066_v5 = vrot.slane %v8059_v53, %v9508_v38  ;;  %8833 = vrot.lane.b32.xlu1 %v8487_v6, %s9248_s17 }
 0x3fa   :  { %v6981_v20 = vpop.trf.xlu1  ;;  %v6885_v32 = vpop.trf.xlu0 }
 0x3fb   :  { %v8083_v10 = vcombine.low %v8066_v5, %v8074_v14  ;;  %v8101_v35 = vcombine.low %v6917_v22, %v6981_v20 }
 0x3fd   :  { %v8090_v54 = vrot.slane %v8083_v10, %v9522_v59  ;;  %v8108_v0 = vrot.slane %v8101_v35, %v9508_v38 }
 0x3fe   :  { %v7045_v46 = vpop.trf.xlu1  ;;  %v6949_v29 = vpop.trf.xlu0 }
 0x3ff   :  { %v8091_v8 = vcombine.low %v8082_v52, %v8090_v54  ;;  %v8092_v2 = vcombine.high %v8082_v52, %v8090_v54  ;;  %v9171_v58 = vcombine.high %v8090_v54, %v11543_v51  ;;  %v8093_v31 = vcombine.low %v6885_v32, %v6949_v29 }
 0x401   :  { %v8491_v19 = vcombine.high %v8091_v8, %v11543_v51  ;;  %v10808_v37 = vrot.slane %v8091_v8, %v9508_v38  ;;  %v10811_v57 = vrot.slane %v8092_v2, %v9508_v38  ;;  %v10821_v25 = vrot.slane %v9171_v58, %v9508_v38 }
 0x402   :  { %v7109_v13 = vpop.trf.xlu1  ;;  %v7013_v40 = vpop.trf.xlu0  ;;  %v8100_v23 = vrot.slane %v8093_v31, %v9508_v38 }
 0x403   :  { %v8521_v21 = vcombine.low %v10808_v37, %v10811_v57  ;;  %v8522_v39 = vcombine.high %v10808_v37, %v10811_v57  ;;  %v10818_v12 = vrot.slane %v8491_v19, %v9508_v38  ;;  %v8117_v28 = vcombine.low %v7045_v46, %v7109_v13 }
 0x404   :  { %v8125_v43 = vcombine.low %v8100_v23, %v8108_v0 }
 0x405   :  { %v10825_v17 = vrot.slane %v8521_v21, %v9522_v59  ;;  %v8537_v55 = vcombine.low %v10818_v12, %v10821_v25  ;;  %v8124_v53 = vrot.slane %v8117_v28, %v9508_v38 }
 0x406   :  { %v7173_v18 = vpop.trf.xlu1  ;;  %v7077_v60 = vpop.trf.xlu0  ;;  %v8132_v20 = vrot.slane %v8125_v43, %v9522_v59 }
 0x407   :  { %v8109_v22 = vcombine.low %v7013_v40, %v7077_v60  ;;  %v8553_v42 = vcombine.high %v10825_v17, %v11543_v51 }
 0x409   :  { %v8116_v6 = vrot.slane %v8109_v22, %v9508_v38  ;;  %8835 = vrot.lane.b32.xlu1 %v8553_v42, %s9248_s17 }
 0x40a   :  { %v7237_v47 = vpop.trf.xlu1  ;;  %v7141_v14 = vpop.trf.xlu0 }
 0x40b   :  { %v8133_v5 = vcombine.low %v8116_v6, %v8124_v53  ;;  %v8151_v35 = vcombine.low %v7173_v18, %v7237_v47 }
 0x40d   :  { %v8140_v32 = vrot.slane %v8133_v5, %v9522_v59  ;;  %v8158_v53 = vrot.slane %v8151_v35, %v9508_v38 }
 0x40e   :  { %v7301_v10 = vpop.trf.xlu1  ;;  %v7205_v52 = vpop.trf.xlu0 }
 0x40f   :  { %v8141_v54 = vcombine.low %v8132_v20, %v8140_v32  ;;  %v8142_v46 = vcombine.high %v8132_v20, %v8140_v32  ;;  %v9172_v29 = vcombine.high %v8140_v32, %v11543_v51  ;;  %v8143_v2 = vcombine.low %v7141_v14, %v7205_v52 }
 0x411   :  { %v8557_v8 = vcombine.high %v8141_v54, %v11543_v51  ;;  %v10842_v19 = vrot.slane %v8141_v54, %v9508_v38  ;;  %v10845_v31 = vrot.slane %v8142_v46, %v9508_v38  ;;  %v10853_v23 = vrot.slane %v9172_v29, %v9508_v38 }
 0x412   :  { %v7365_v58 = vpop.trf.xlu1  ;;  %v7269_v13 = vpop.trf.xlu0  ;;  %v8150_v28 = vrot.slane %v8143_v2, %v9508_v38 }
 0x413   :  { %v8587_v40 = vcombine.low %v10842_v19, %v10845_v31  ;;  %v10850_v21 = vrot.slane %v8557_v8, %v9508_v38  ;;  %v8167_v60 = vcombine.low %v7301_v10, %v7365_v58 }
 0x414   :  { %v8175_v14 = vcombine.low %v8150_v28, %v8158_v53 }
 0x415   :  { %v10857_v22 = vrot.slane %v8587_v40, %v9522_v59  ;;  %v8603_v42 = vcombine.low %v10850_v21, %v10853_v23  ;;  %v8174_v5 = vrot.slane %v8167_v60, %v9508_v38 }
 0x416   :  { %v7429_v0 = vpop.trf.xlu1  ;;  %v7333_v18 = vpop.trf.xlu0  ;;  %v8182_v54 = vrot.slane %v8175_v14, %v9522_v59 }
 0x417   :  { %v8159_v6 = vcombine.low %v7269_v13, %v7333_v18  ;;  %v8619_v47 = vcombine.high %v10857_v22, %v11543_v51 }
 0x419   :  { %v8166_v20 = vrot.slane %v8159_v6, %v9508_v38  ;;  %8837 = vrot.lane.b32.xlu0 %v8619_v47, %s9248_s17 }
 0x41a   :  { %v7493_v32 = vpop.trf.xlu1  ;;  %v7397_v10 = vpop.trf.xlu0 }
 0x41b   :  { %v8183_v52 = vcombine.low %v8166_v20, %v8174_v5  ;;  %v8201_v6 = vcombine.low %v7429_v0, %v7493_v32 }
 0x41d   :  { %v8190_v46 = vrot.slane %v8183_v52, %v9522_v59 }
 0x41e   :  { %v7557_v29 = vpop.trf.xlu1  ;;  %v7461_v8 = vpop.trf.xlu0 }
 0x41f   :  { %v8191_v2 = vcombine.low %v8182_v54, %v8190_v46  ;;  %v8192_v58 = vcombine.high %v8182_v54, %v8190_v46  ;;  %v9173_v13 = vcombine.high %v8190_v46, %v11543_v51  ;;  %v8193_v40 = vcombine.low %v7397_v10, %v7461_v8 }
 0x420   :  { %v8208_v8 = vrot.slane %v8201_v6, %v9508_v38 }
 0x421   :  { %v8623_v35 = vcombine.high %v8191_v2, %v11543_v51  ;;  %v10874_v60 = vrot.slane %v8191_v2, %v9508_v38  ;;  %v10877_v18 = vrot.slane %v8192_v58, %v9508_v38  ;;  %v10885_v5 = vrot.slane %v9173_v13, %v9508_v38 }
 0x422   :  { %v7621_v28 = vpop.trf.xlu1  ;;  %v7525_v53 = vpop.trf.xlu0  ;;  %v8200_v20 = vrot.slane %v8193_v40, %v9508_v38 }
 0x423   :  { %v8653_v47 = vcombine.low %v10874_v60, %v10877_v18  ;;  %v10882_v14 = vrot.slane %v8623_v35, %v9508_v38  ;;  %v8217_v10 = vcombine.low %v7557_v29, %v7621_v28 }
 0x424   :  { %v8225_v13 = vcombine.low %v8200_v20, %v8208_v8 }
 0x425   :  { %v10889_v54 = vrot.slane %v8653_v47, %v9522_v59  ;;  %v8224_v29 = vrot.slane %v8217_v10, %v9508_v38 }
 0x426   :  { %v7685_v52 = vpop.trf.xlu1  ;;  %v7589_v0 = vpop.trf.xlu0  ;;  %v8232_v1 = vrot.slane %v8225_v13, %v9522_v59 }
 0x427   :  { %v8209_v2 = vcombine.low %v7525_v53, %v7589_v0  ;;  %v8685_v58 = vcombine.high %v10889_v54, %v11543_v51 }
 0x429   :  { %v8216_v35 = vrot.slane %v8209_v2, %v9508_v38  ;;  %8839 = vrot.lane.b32.xlu1 %v8685_v58, %s9248_s17 }
 0x42a   :  { %v7749_v40 = vpop.trf.xlu1  ;;  %v7653_v28 = vpop.trf.xlu0 }
 0x42b   :  { %v8233_v47 = vcombine.low %v8216_v35, %v8224_v29  ;;  %v8251_v43 = vcombine.low %v7685_v52, %v7749_v40  ;;  %v8338_v40 = vrot.slane %v8324_v4, %v9522_v59 }
 0x42d   :  { %v10903_v32 = vrot.slane %v8233_v47, %v9522_v59  ;;  %v8258_v7 = vrot.slane %v8251_v43, %v9508_v38  ;;  %v8470_v43 = vrot.slane %v8456_v24, %v9522_v59  ;;  %v8356_v24 = vcombine.high %v8338_v40, %v11543_v51 }
 0x42e   :  { %v7813_v6 = vpop.trf.xlu1  ;;  %v7717_v53 = vpop.trf.xlu0 }
 0x42f   :  { %v8241_v0 = vcombine.low %v8232_v1, %v10903_v32  ;;  %v8242_v20 = vcombine.high %v8232_v1, %v10903_v32  ;;  %v8243_v8 = vcombine.low %v7653_v28, %v7717_v53 }
 0x431   :  { %v8696_v10 = vrot.slane %v8241_v0, %v9508_v38  ;;  %v8711_v2 = vrot.slane %v8242_v20, %v9508_v38  ;;  %v8250_v13 = vrot.slane %v8243_v8, %v9508_v38  ;;  %v8689_v57 = vcombine.high %v8241_v0, %v11543_v51 }
 0x432   :  { %v7877_v58 = vpop.trf.xlu1  ;;  %v7781_v62 = vpop.trf.xlu0 }
 0x433   :  { %v8719_v29 = vcombine.low %v8696_v10, %v8711_v2  ;;  %v8267_v35 = vcombine.low %v7813_v6, %v7877_v58  ;;  %v8275_v28 = vcombine.low %v8250_v13, %v8258_v7  ;;  %v8720_v8 = vcombine.high %v8696_v10, %v8711_v2 }
 0x434   :  { %v8536_v10 = vrot.slane %v8522_v39, %v9522_v59  ;;  %v8654_v2 = vcombine.high %v10874_v60, %v10877_v18  ;;  %v8347_v39 = vrot.slane %v8339_v33, %v9522_v59  ;;  %v9174_v18 = vcombine.high %v10903_v32, %v11543_v51 }
 0x435   :  { %v10911_v47 = vrot.slane %v8719_v29, %v9522_v59  ;;  %v8274_v53 = vrot.slane %v8267_v35, %v9508_v38  ;;  %v8282_v6 = vrot.slane %v8275_v28, %v9522_v59  ;;  %v8734_v3 = vrot.slane %v8720_v8, %v9522_v59 }
 0x436   :  { %v7845_v48 = vpop.trf.xlu0  ;;  %v8668_v15 = vrot.slane %v8654_v2, %v9522_v59  ;;  %v8479_v35 = vrot.slane %v8471_v61, %v9522_v59  ;;  %v8554_v0 = vcombine.high %v8536_v10, %v11543_v51  ;;  %v8718_v33 = vrot.slane %v9174_v18, %v9508_v38 }
 0x437   :  { %v8259_v46 = vcombine.low %v7781_v62, %v7845_v48  ;;  %v8751_v1 = vcombine.high %v10911_v47, %v11543_v51  ;;  %v8752_v13 = vcombine.high %v8734_v3, %v11543_v51  ;;  %v8611_v32 = vrot.slane %v8603_v42, %v9522_v59 }
 0x438   :  { %v8686_v28 = vcombine.high %v8668_v15, %v11543_v51  ;;  %v8413_v42 = vrot.slane %v8405_v50, %v9522_v59 }
 0x439   :  { %v8266_v20 = vrot.slane %v8259_v46, %v9508_v38  ;;  %8841 = vrot.lane.b32.xlu0 %v8751_v1, %s9248_s17  ;;  %v8588_v46 = vcombine.high %v10842_v19, %v10845_v31  ;;  %v8404_v19 = vrot.slane %v8390_v41, %v9522_v59  ;;  %v8488_v31 = vcombine.high %v8470_v43, %v11543_v51 }
 0x43a   :  { %v8703_v1 = vrot.slane %v8689_v57, %v9508_v38 }
 0x43b   :  { %v8283_v52 = vcombine.low %v8266_v20, %v8274_v53  ;;  %v8602_v4 = vrot.slane %v8588_v46, %v9522_v59  ;;  %v8422_v60 = vcombine.high %v8404_v19, %v11543_v51  ;;  %v11544_v46 = vcombine.low %v10882_v14, %v10885_v5 }
 0x43c   :  { %v8735_v53 = vcombine.low %v8703_v1, %v8718_v33 }
 0x43d   :  { %v8290_v62 = vrot.slane %v8283_v52, %v9522_v59  ;;  %8861 = vrot.lane.b32.xlu0 %v8338_v40, %s9259_s26  ;;  %v8620_v34 = vcombine.high %v8602_v4, %v11543_v51  ;;  %v8357_v40 = vcombine.high %v8347_v39, %v11543_v51 }
 0x43e   :  { %v8743_v61 = vrot.slane %v8735_v53, %v9522_v59 }
 0x43f   :  { %v8291_v48 = vcombine.low %v8282_v6, %v8290_v62  ;;  %v8292_v7 = vcombine.high %v8282_v6, %v8290_v62  ;;  %v9175_v6 = vcombine.high %v8290_v62, %v11543_v51  ;;  %v8621_v62 = vcombine.high %v8611_v32, %v11543_v51 }
 0x441   :  { %8865 = vrot.lane.b32.xlu0 %v8470_v43, %s9259_s26  ;;  %v8762_v36 = vrot.slane %v8291_v48, %v9508_v38  ;;  %v8777_v63 = vrot.slane %v8292_v7, %v9508_v38  ;;  %v8755_v52 = vcombine.high %v8291_v48, %v11543_v51  ;;  %v8489_v7 = vcombine.high %v8479_v35, %v11543_v51 }
 0x442   :  { %v8545_v48 = vrot.slane %v8537_v55, %v9522_v59  ;;  %v8784_v50 = vrot.slane %v9175_v6, %v9508_v38  ;;  %v8753_v55 = vcombine.high %v8743_v61, %v11543_v51 }
 0x443   :  { %v8785_v58 = vcombine.low %v8762_v36, %v8777_v63  ;;  %v8786_v41 = vcombine.high %v8762_v36, %v8777_v63  ;;  %v8769_v43 = vrot.slane %v8755_v52, %v9508_v38  ;;  %v8677_v36 = vrot.slane %v11544_v46, %v9522_v59 }
 0x444   :  { %v11545_v38 = vcombine.high %v10714_v45, %v10717_v56  ;;  %v11547_v45 = vcombine.high %v10850_v21, %v10853_v23  ;;  %v11548_v21 = vcombine.high %v10750_v49, %v10753_v16  ;;  %v11550_v49 = vcombine.high %v10882_v14, %v10885_v5 }
 0x445   :  { %8869 = vrot.lane.b32.xlu0 %v8602_v4, %s9259_s26  ;;  %v10938_v29 = vrot.slane %v8785_v58, %v9522_v59  ;;  %v8800_v37 = vrot.slane %v8786_v41, %v9522_v59  ;;  %v8801_v63 = vcombine.low %v8769_v43, %v8784_v50  ;;  %v8423_v58 = vcombine.high %v8413_v42, %v11543_v51 }
 0x446   :  { %v8354_v8 = vrot.slane %v11545_v38, %v9522_v59  ;;  %v8618_v56 = vrot.slane %v11547_v45, %v9522_v59  ;;  %v8420_v23 = vrot.slane %v11548_v21, %v9522_v59  ;;  %v8684_v16 = vrot.slane %v11550_v49, %v9522_v59 }
 0x447   :  { %v8817_v27 = vcombine.high %v10938_v29, %v11543_v51  ;;  %v8818_v20 = vcombine.high %v8800_v37, %v11543_v51  ;;  %v8809_v4 = vrot.slane %v8801_v63, %v9522_v59 }
 0x448   :  { %v8622_v41 = vcombine.high %v8618_v56, %v11543_v51  ;;  %v8688_v57 = vcombine.high %v8684_v16, %v11543_v51 }
 0x449   :  { %8873 = vrot.lane.b32.xlu0 %v8734_v3, %s9259_s26  ;;  %8843 = vrot.lane.b32.xlu1 %v8817_v27, %s9248_s17  ;;  %v11546_v3 = vcombine.high %v10784_v30, %v10787_v11  ;;  %v8819_v11 = vcombine.high %v8809_v4, %v11543_v51 }
 0x44b   :  { %v8486_v27 = vrot.slane %v11546_v3, %v9522_v59 }
 0x44d   :  { %8893 = vrot.lane.b32.xlu0 %v8356_v24, %s9260_s27  ;;  %8863 = vrot.lane.b32.xlu1 %v8404_v19, %s9259_s26  ;;  %v8555_v24 = vcombine.high %v8545_v48, %v11543_v51  ;;  %v8687_v19 = vcombine.high %v8677_v36, %v11543_v51  ;;  %v8490_v2 = vcombine.high %v8486_v27, %v11543_v51 }
 0x451   :  { %8897 = vrot.lane.b32.xlu0 %v8488_v31, %s9260_s27  ;;  %8867 = vrot.lane.b32.xlu1 %v8536_v10, %s9259_s26  ;;  %v8736_v31 = vcombine.high %v8703_v1, %v8718_v33  ;;  %v8358_v10 = vcombine.high %v8354_v8, %v11543_v51  ;;  %v8830_v5 = vpop.permute.xlu0 %8829 }
 0x453   :  { %v8750_v30 = vrot.slane %v8736_v31, %v9522_v59 }
 0x455   :  { %8901 = vrot.lane.b32.xlu0 %v8620_v34, %s9260_s27  ;;  %8871 = vrot.lane.b32.xlu1 %v8668_v15, %s9259_s26  ;;  %v11549_v34 = vcombine.high %v10818_v12, %v10821_v25  ;;  %v8424_v25 = vcombine.high %v8420_v23, %v11543_v51 }
 0x457   :  { %v8552_v15 = vrot.slane %v11549_v34, %v9522_v59 }
 0x459   :  { %8905 = vrot.lane.b32.xlu0 %v8752_v13, %s9260_s27  ;;  %8875 = vrot.lane.b32.xlu1 %v8800_v37, %s9259_s26  ;;  %v8802_v13 = vcombine.high %v8769_v43, %v8784_v50  ;;  %v8754_v37 = vcombine.high %v8750_v30, %v11543_v51  ;;  %v8556_v14 = vcombine.high %v8552_v15, %v11543_v51 }
 0x45b   :  { %v8816_v12 = vrot.slane %v8802_v13, %v9522_v59 }
 0x45d   :  { %8925 = vrot.lane.b32.xlu0 %v8347_v39, %s9261_s28  ;;  %8895 = vrot.lane.b32.xlu1 %v8422_v60, %s9260_s27  ;;  %v8820_v59 = vcombine.high %v8816_v12, %v11543_v51  ;;  %v8832_v60 = vpop.permute.xlu1 %8831 }
 0x461   :  { %8929 = vrot.lane.b32.xlu0 %v8479_v35, %s9261_s28  ;;  %8899 = vrot.lane.b32.xlu1 %v8554_v0, %s9260_s27  ;;  %v9045_v35 = vsel %vm4502_vm0, %v10730_v26, %v8830_v5 }
 0x465   :  { %8933 = vrot.lane.b32.xlu0 %v8611_v32, %s9261_s28  ;;  %8903 = vrot.lane.b32.xlu1 %v8686_v28, %s9260_s27 }
 0x469   :  { %8937 = vrot.lane.b32.xlu0 %v8743_v61, %s9261_s28  ;;  %8907 = vrot.lane.b32.xlu1 %v8818_v20, %s9260_s27 }
 0x46b   :  { %v8834_v0 = vpop.permute.xlu1 %8833 }
 0x46c   :  { %v9047_v32 = vsel %vm4502_vm0, %v10791_v9, %v8834_v0 }
 0x46d   :  { %8957 = vrot.lane.b32.xlu0 %v8357_v40, %s9262_s29  ;;  %8927 = vrot.lane.b32.xlu1 %v8413_v42, %s9261_s28 }
 0x471   :  { %8961 = vrot.lane.b32.xlu0 %v8489_v7, %s9262_s29  ;;  %8931 = vrot.lane.b32.xlu1 %v8545_v48, %s9261_s28  ;;  %v9046_v7 = vsel %vm4502_vm0, %v10757_v44, %v8832_v60 }
 0x475   :  { %8965 = vrot.lane.b32.xlu0 %v8621_v62, %s9262_s29  ;;  %8935 = vrot.lane.b32.xlu1 %v8677_v36, %s9261_s28 }
 0x479   :  { %8969 = vrot.lane.b32.xlu0 %v8753_v55, %s9262_s29  ;;  %8939 = vrot.lane.b32.xlu1 %v8809_v4, %s9261_s28 }
 0x47b   :  { %v8836_v28 = vpop.permute.xlu1 %8835 }
 0x47c   :  { %v9048_v50 = vsel %vm4502_vm0, %v10825_v17, %v8836_v28 }
 0x47d   :  { %8989 = vrot.lane.b32.xlu0 %v8354_v8, %s9263_s30  ;;  %8959 = vrot.lane.b32.xlu1 %v8423_v58, %s9262_s29 }
 0x481   :  { %8993 = vrot.lane.b32.xlu0 %v8486_v27, %s9263_s30  ;;  %8963 = vrot.lane.b32.xlu1 %v8555_v24, %s9262_s29 }
 0x485   :  { %8997 = vrot.lane.b32.xlu0 %v8618_v56, %s9263_s30  ;;  %8967 = vrot.lane.b32.xlu1 %v8687_v19, %s9262_s29 }
 0x489   :  { %9001 = vrot.lane.b32.xlu0 %v8750_v30, %s9263_s30  ;;  %8971 = vrot.lane.b32.xlu1 %v8819_v11, %s9262_s29 }
 0x48b   :  { %v8838_v39 = vpop.permute.xlu0 %8837 }
 0x48c   :  { %v9049_v61 = vsel %vm4502_vm0, %v10857_v22, %v8838_v39  ;;  %v11553_v39 = vld [vmem:[#allocation22_spill] sm:$0xff] }
 0x48d   :  { %9021 = vrot.lane.b32.xlu0 %v8358_v10, %s9264_s2  ;;  %8991 = vrot.lane.b32.xlu1 %v8420_v23, %s9263_s30 }
 0x491   :  { %9025 = vrot.lane.b32.xlu0 %v8490_v2, %s9264_s2  ;;  %8995 = vrot.lane.b32.xlu1 %v8552_v15, %s9263_s30 }
 0x495   :  { %9029 = vrot.lane.b32.xlu0 %v8622_v41, %s9264_s2  ;;  %8999 = vrot.lane.b32.xlu1 %v8684_v16, %s9263_s30 }
 0x499   :  { %9033 = vrot.lane.b32.xlu0 %v8754_v37, %s9264_s2  ;;  %9003 = vrot.lane.b32.xlu1 %v8816_v12, %s9263_s30 }
 0x49b   :  { %v8840_v20 = vpop.permute.xlu1 %8839 }
 0x49c   :  { %v9050_v36 = vsel %vm4502_vm0, %v10889_v54, %v8840_v20 }
 0x49d   :  { %9023 = vrot.lane.b32.xlu1 %v8424_v25, %s9264_s2  ;;  %v11551_v25 = vld [vmem:[#allocation9_spill] sm:$0xff] }
 0x4a1   :  { %9027 = vrot.lane.b32.xlu1 %v8556_v14, %s9264_s2  ;;  %v11552_v14 = vld [vmem:[#allocation21_spill] sm:$0xff] }
 0x4a2   :  { %v4503_v5 = vsel %vm4502_vm0, %v11552_v14, %v11551_v25  ;;  %v11563_v25 = vld [vmem:[#allocation41_spill] sm:$0xff] }
 0x4a5   :  { %9031 = vrot.lane.b32.xlu1 %v8688_v57, %s9264_s2 }
 0x4a9   :  { %9035 = vrot.lane.b32.xlu1 %v8820_v59, %s9264_s2  ;;  %v4512_v59 = vsel %vm4511_vm1, %v4503_v5, %v11553_v39  ;;  %v11565_v39 = vld [vmem:[#allocation11_spill] sm:$0xff] }
 0x4ab   :  { %v8842_v18 = vpop.permute.xlu0 %8841 }
 0x4ac   :  { %v9051_v26 = vsel %vm4502_vm0, %v10911_v47, %v8842_v18  ;;  %v11554_v18 = vld [vmem:[#allocation10_spill] sm:$0xff] }
 0x4af   :  { %v8862_v1 = vpop.permute.xlu0 %8861 }
 0x4b0   :  { %v9053_v33 = vsel %vm4511_vm1, %v9045_v35, %v8862_v1  ;;  %v11555_v35 = vld [vmem:[#allocation20_spill] sm:$0xff]  ;;  %v11556_v1 = vld [vmem:[#allocation31_spill] sm:$0xff] }
 0x4b1   :  { %v4505_v0 = vsel %vm4502_vm0, %v11555_v35, %v11554_v18  ;;  %v11567_v35 = vld [vmem:[#allocation27_spill] sm:$0xff] }
 0x4b3   :  { %v8866_v53 = vpop.permute.xlu0 %8865 }
 0x4b4   :  { %v11092_v51 = vsel %vm4511_vm1, %v9047_v32, %v8866_v53  ;;  %v4521_v32 = vsel %vm4520_vm2, %v4512_v59, %v11556_v1  ;;  %v11557_v53 = vld [vmem:[#allocation24_spill] sm:$0xff]  ;;  %v11568_v1 = vld [vmem:[#allocation57_spill] sm:$0xff] }
 0x4b7   :  { %v8870_v52 = vpop.permute.xlu0 %8869 }
 0x4b8   :  { %v11097_v40 = vsel %vm4511_vm1, %v9049_v61, %v8870_v52  ;;  %v4514_v61 = vsel %vm4511_vm1, %v4505_v0, %v11557_v53 }
 0x4bb   :  { %v8844_v42 = vpop.permute.xlu1 %8843  ;;  %v8874_v6 = vpop.permute.xlu0 %8873 }
 0x4bc   :  { %v11102_v9 = vsel %vm4511_vm1, %v9051_v26, %v8874_v6  ;;  %v9052_v4 = vsel %vm4502_vm0, %v10938_v29, %v8844_v42  ;;  %v11559_v6 = vld [vmem:[#allocation47_spill] sm:$0xff] }
 0x4bf   :  { %v8864_v48 = vpop.permute.xlu1 %8863  ;;  %v8894_v43 = vpop.permute.xlu0 %8893 }
 0x4c0   :  { %v11107_v22 = vsel %vm4511_vm1, %v9046_v7, %v8864_v48  ;;  %v9061_v57 = vsel %vm4520_vm2, %v9053_v33, %v8894_v43  ;;  %v11558_v33 = vld [vmem:[#allocation39_spill] sm:$0xff] }
 0x4c1   :  { %v4530_v20 = vsel %vm4529_vm3, %v4521_v32, %v11558_v33 }
 0x4c2   :  { %v4539_v7 = vsel %vm4538_vm4, %v4530_v20, %v11559_v6  ;;  %v11570_v20 = vld [vmem:[#allocation65_spill] sm:$0xff] }
 0x4c3   :  { %v8868_v62 = vpop.permute.xlu1 %8867  ;;  %v8898_v46 = vpop.permute.xlu0 %8897 }
 0x4c4   :  { %v11112_v47 = vsel %vm4511_vm1, %v9048_v50, %v8868_v62  ;;  %v9063_v48 = vsel %vm4520_vm2, %v11092_v51, %v8898_v46  ;;  %v11560_v50 = vld [vmem:[#allocation55_spill] sm:$0xff] }
 0x4c5   :  { %v4548_v62 = vsel %vm4547_vm5, %v4539_v7, %v11560_v50  ;;  %v11573_v50 = vld [vmem:[#allocation18_spill] sm:$0xff] }
 0x4c7   :  { %v8872_v63 = vpop.permute.xlu1 %8871  ;;  %v11116_v55 = vpop.permute.xlu0 %8901 }
 0x4c8   :  { %v11119_v44 = vsel %vm4511_vm1, %v9050_v36, %v8872_v63 }
 0x4cb   :  { %v8876_v38 = vpop.permute.xlu1 %8875  ;;  %v11123_v8 = vpop.permute.xlu0 %8905 }
 0x4cc   :  { %v11126_v17 = vsel %vm4511_vm1, %v9052_v4, %v8876_v38  ;;  %v11561_v4 = vld [vmem:[#allocation33_spill] sm:$0xff] }
 0x4cd   :  { %v4523_v38 = vsel %vm4520_vm2, %v4514_v61, %v11561_v4  ;;  %v11569_v61 = vld [vmem:[#allocation35_spill] sm:$0xff]  ;;  %v11575_v4 = vld [vmem:[#allocation29_spill] sm:$0xff] }
 0x4ce   :  { %v4532_v51 = vsel %vm4529_vm3, %v4523_v38, %v11563_v25 }
 0x4cf   :  { %v11128_v58 = vpop.permute.xlu1 %8895  ;;  %v8926_v3 = vpop.permute.xlu0 %8925 }
 0x4d0   :  { %v9069_v60 = vsel %vm4529_vm3, %v9061_v57, %v8926_v3  ;;  %v11562_v3 = vld [vmem:[#allocation63_spill] sm:$0xff]  ;;  %v11564_v57 = vld [vmem:[#allocation12_spill] sm:$0xff] }
 0x4d1   :  { %v4507_v59 = vsel %vm4502_vm0, %v11565_v39, %v11564_v57 }
 0x4d2   :  { %v4516_v0 = vsel %vm4511_vm1, %v4507_v59, %v11567_v35  ;;  %v11582_v35 = vld [vmem:[#allocation53_spill] sm:$0xff] }
 0x4d3   :  { %v11130_v27 = vpop.permute.xlu1 %8899  ;;  %v8930_v54 = vpop.permute.xlu0 %8929  ;;  %v4525_v33 = vsel %vm4520_vm2, %v4516_v0, %v11569_v61 }
 0x4d4   :  { %v9071_v36 = vsel %vm4529_vm3, %v9063_v48, %v8930_v54 }
 0x4d7   :  { %v11132_v24 = vpop.permute.xlu1 %8903  ;;  %v8934_v45 = vpop.permute.xlu0 %8933 }
 0x4db   :  { %v11134_v56 = vpop.permute.xlu1 %8907  ;;  %v11136_v19 = vpop.permute.xlu0 %8937 }
 0x4df   :  { %v11138_v29 = vpop.permute.xlu1 %8927  ;;  %v8958_v31 = vpop.permute.xlu0 %8957 }
 0x4e0   :  { %v9077_v28 = vsel %vm4538_vm4, %v9069_v60, %v8958_v31  ;;  %v4557_v31 = vsel %vm4556_vm6, %v4548_v62, %v11562_v3  ;;  %v11566_v60 = vld [vmem:[#allocation49_spill] sm:$0xff]  ;;  %v11576_v3 = vld [vmem:[#allocation59_spill] sm:$0xff] }
 0x4e1   :  { %v4541_v18 = vsel %vm4538_vm4, %v4532_v51, %v11566_v60  ;;  %v11577_v51 = vld [vmem:[#allocation37_spill] sm:$0xff] }
 0x4e2   :  { %v4550_v32 = vsel %vm4547_vm5, %v4541_v18, %v11568_v1  ;;  %v11580_v18 = vld [vmem:[#allocation8_spill] sm:$0xff]  ;;  %v11583_v1 = vld [vmem:[#allocation30_spill] sm:$0xff] }
 0x4e3   :  { %v11140_v30 = vpop.permute.xlu1 %8931  ;;  %v8962_v11 = vpop.permute.xlu0 %8961 }
 0x4e7   :  { %v11142_v10 = vpop.permute.xlu1 %8935  ;;  %v8966_v21 = vpop.permute.xlu0 %8965 }
 0x4eb   :  { %v11144_v23 = vpop.permute.xlu1 %8939  ;;  %v11146_v2 = vpop.permute.xlu0 %8969 }
 0x4ef   :  { %v11148_v34 = vpop.permute.xlu1 %8959  ;;  %v8990_v15 = vpop.permute.xlu0 %8989 }
 0x4f0   :  { %v9085_v52 = vsel %vm4547_vm5, %v9077_v28, %v8990_v15  ;;  %v9079_v15 = vsel %vm4538_vm4, %v9071_v36, %v8962_v11  ;;  %v9065_v11 = vsel %vm4520_vm2, %v11097_v40, %v11116_v55  ;;  %v11571_v55 = vld [vmem:[#allocation43_spill] sm:$0xff] }
 0x4f1   :  { %v9073_v28 = vsel %vm4529_vm3, %v9065_v11, %v8934_v45  ;;  %v11572_v45 = vld [vmem:[#allocation14_spill] sm:$0xff]  ;;  %v11574_v36 = vld [vmem:[#allocation51_spill] sm:$0xff]  ;;  %v11581_v11 = vld [vmem:[#allocation16_spill] sm:$0xff] }
 0x4f2   :  { %v9081_v40 = vsel %vm4538_vm4, %v9073_v28, %v8966_v21  ;;  %v4509_v62 = vsel %vm4502_vm0, %v11573_v50, %v11572_v45  ;;  %v9067_v21 = vsel %vm4520_vm2, %v11102_v9, %v11123_v8  ;;  %v11584_v28 = vld [vmem:[#allocation61_spill] sm:$0xff]  ;;  %v11589_v45 = vld [vmem:[#allocation15_spill] sm:$0xff] }
 0x4f3   :  { %v11150_v41 = vpop.permute.xlu1 %8963  ;;  %v8994_v49 = vpop.permute.xlu0 %8993  ;;  %v4518_v38 = vsel %vm4511_vm1, %v4509_v62, %v11575_v4  ;;  %v11590_v62 = vld [vmem:[#allocation54_spill] sm:$0xff] }
 0x4f4   :  { %v9087_v46 = vsel %vm4547_vm5, %v9079_v15, %v8994_v49  ;;  %v9075_v15 = vsel %vm4529_vm3, %v9067_v21, %v11136_v19  ;;  %v11591_v21 = vld [vmem:[#allocation32_spill] sm:$0xff] }
 0x4f5   :  { %v9083_v8 = vsel %vm4538_vm4, %v9075_v15, %v11146_v2  ;;  %v9062_v2 = vsel %vm4520_vm2, %v11107_v22, %v11128_v58 }
 0x4f6   :  { %v9070_v61 = vsel %vm4529_vm3, %v9062_v2, %v11138_v29  ;;  %v11588_v29 = vld [vmem:[#allocation17_spill] sm:$0xff]  ;;  %v11601_v2 = vld [vmem:[#allocation42_spill] sm:$0xff] }
 0x4f7   :  { %v11152_v16 = vpop.permute.xlu1 %8967  ;;  %v8998_v13 = vpop.permute.xlu0 %8997  ;;  %v9078_v58 = vsel %vm4538_vm4, %v9070_v61, %v11148_v34  ;;  %v4506_v50 = vsel %vm4502_vm0, %v11589_v45, %v11588_v29  ;;  %v9064_v34 = vsel %vm4520_vm2, %v11112_v47, %v11130_v27  ;;  %v11609_v29 = vld [vmem:[#allocation44_spill] sm:$0xff] }
 0x4f8   :  { %v9089_v6 = vsel %vm4547_vm5, %v9081_v40, %v8998_v13  ;;  %v11586_v40 = vld [vmem:[#allocation69_spill] sm:$0xff] }
 0x4fb   :  { %v11154_v37 = vpop.permute.xlu1 %8971  ;;  %v11156_v12 = vpop.permute.xlu0 %9001 }
 0x4fc   :  { %v9091_v39 = vsel %vm4547_vm5, %v9083_v8, %v11156_v12 }
 0x4ff   :  { %v11176_v26 = vpop.permute.xlu1 %8991  ;;  %v9022_v42 = vpop.permute.xlu0 %9021 }
 0x500   :  { %v9093_v43 = vsel %vm4556_vm6, %v9085_v52, %v9022_v42  ;;  %v4559_v52 = vsel %vm4556_vm6, %v4550_v32, %v11570_v20  ;;  %v4534_v42 = vsel %vm4529_vm3, %v4525_v33, %v11571_v55  ;;  %v11585_v20 = vld [vmem:[#allocation38_spill] sm:$0xff] }
 0x501   :  { %v9109_v63 = vrot.slane %v9093_v43, 6  ;;  %v11587_v55 = vld [vmem:[#allocation46_spill] sm:$0xff] }
 0x503   :  { %v9126_v14 = vsel %vm9125_vm7, %v4557_v31, %v9109_v63  ;;  %v11195_v5 = vpop.permute.xlu1 %8995  ;;  %v9026_v54 = vpop.permute.xlu0 %9025  ;;  %v4543_v63 = vsel %vm4538_vm4, %v4534_v42, %v11574_v36 }
 0x504   :  { %9135 = vst.msk [vmem:[#allocation5] sm:$0xf] %vm9134_vm8, %v9126_v14  ;;  %v9095_v49 = vsel %vm4556_vm6, %v9087_v46, %v9026_v54  ;;  %v4552_v31 = vsel %vm4547_vm5, %v4543_v63, %v11576_v3  ;;  %v4527_v46 = vsel %vm4520_vm2, %v4518_v38, %v11577_v51  ;;  %v11578_v14 = vld [vmem:[#allocation67_spill] sm:$0xff]  ;;  %v11579_v54 = vld [vmem:[#allocation45_spill] sm:$0xff]  ;;  %v9072_v38 = vsel %vm4529_vm3, %v9064_v34, %v11140_v30  ;;  %v11595_v51 = vld [vmem:[#allocation48_spill] sm:$0xff] }
 0x505   :  { %v9111_v53 = vrot.slane %v9095_v49, 6  ;;  %v4561_v9 = vsel %vm4556_vm6, %v4552_v31, %v11578_v14  ;;  %v4536_v57 = vsel %vm4529_vm3, %v4527_v46, %v11579_v54  ;;  %v4504_v49 = vsel %vm4502_vm0, %v11581_v11, %v11580_v18  ;;  %v11593_v31 = vld [vmem:[#allocation40_spill] sm:$0xff]  ;;  %v11596_v30 = vld [vmem:[#allocation26_spill] sm:$0xff]  ;;  %v11597_v54 = vld [vmem:[#allocation23_spill] sm:$0xff] }
 0x506   :  { %v4545_v0 = vsel %vm4538_vm4, %v4536_v57, %v11582_v35  ;;  %v4513_v32 = vsel %vm4511_vm1, %v4504_v49, %v11583_v1  ;;  %v9080_v27 = vsel %vm4538_vm4, %v9072_v38, %v11150_v41  ;;  %v4508_v57 = vsel %vm4502_vm0, %v11597_v54, %v11596_v30  ;;  %v11599_v18 = vld [vmem:[#allocation34_spill] sm:$0xff]  ;;  %v11600_v11 = vld [vmem:[#allocation64_spill] sm:$0xff]  ;;  %v11602_v1 = vld [vmem:[#allocation71_spill] sm:$0xff] }
 0x507   :  { %v9128_v7 = vsel %vm9125_vm7, %v4559_v52, %v9111_v53  ;;  %v11221_v48 = vpop.permute.xlu1 %8999  ;;  %v9030_v43 = vpop.permute.xlu0 %9029  ;;  %v4554_v53 = vsel %vm4547_vm5, %v4545_v0, %v11584_v28  ;;  %v4522_v52 = vsel %vm4520_vm2, %v4513_v32, %v11585_v20  ;;  %v9088_v14 = vsel %vm4547_vm5, %v9080_v27, %v11195_v5  ;;  %v11603_v32 = vld [vmem:[#allocation50_spill] sm:$0xff]  ;;  %v11605_v20 = vld [vmem:[#allocation13_spill] sm:$0xff] }
 0x508   :  { %9137 = vst.msk [vmem:[#allocation5 + $0x8] sm:$0xf] %vm9134_vm8, %v9128_v7  ;;  %v9097_v13 = vsel %vm4556_vm6, %v9089_v6, %v9030_v43  ;;  %v4563_v22 = vsel %vm4556_vm6, %v4554_v53, %v11586_v40  ;;  %v4531_v42 = vsel %vm4529_vm3, %v4522_v52, %v11587_v55  ;;  %v9086_v6 = vsel %vm4547_vm5, %v9078_v58, %v11176_v26  ;;  %v11606_v40 = vld [vmem:[#allocation58_spill] sm:$0xff]  ;;  %v11607_v55 = vld [vmem:[#allocation36_spill] sm:$0xff] }
 0x509   :  { %v9113_v25 = vrot.slane %v9097_v13, 6  ;;  %v4540_v36 = vsel %vm4538_vm4, %v4531_v42, %v11590_v62  ;;  %v4515_v26 = vsel %vm4511_vm1, %v4506_v50, %v11591_v21  ;;  %v11592_v13 = vld [vmem:[#allocation62_spill] sm:$0xff]  ;;  %v9066_v41 = vsel %vm4520_vm2, %v11119_v44, %v11132_v24  ;;  %v11610_v50 = vld [vmem:[#allocation72_spill] sm:$0xff] }
 0x50a   :  { %v4549_v4 = vsel %vm4547_vm5, %v4540_v36, %v11592_v13  ;;  %v4524_v15 = vsel %vm4520_vm2, %v4515_v26, %v11593_v31  ;;  %v4517_v5 = vsel %vm4511_vm1, %v4508_v57, %v11599_v18  ;;  %v9074_v35 = vsel %vm4529_vm3, %v9066_v41, %v11142_v10  ;;  %v11604_v10 = vld [vmem:[#allocation28_spill] sm:$0xff]  ;;  %v11608_v42 = vld [vmem:[#allocation66_spill] sm:$0xff] }
 0x50b   :  { %v9130_v59 = vsel %vm9125_vm7, %v4561_v9, %v9113_v25  ;;  %v11250_v60 = vpop.permute.xlu1 %9003  ;;  %v9034_v19 = vpop.permute.xlu0 %9033  ;;  %v11594_v25 = vld [vmem:[#allocation70_spill] sm:$0xff]  ;;  %v4533_v46 = vsel %vm4529_vm3, %v4524_v15, %v11595_v51  ;;  %v9082_v24 = vsel %vm4538_vm4, %v9074_v35, %v11152_v16  ;;  %v4510_v52 = vsel %vm4502_vm0, %v11605_v20, %v11604_v10  ;;  %v11611_v62 = vld [vmem:[#allocation52_spill] sm:$0xff] }
 0x50c   :  { %9139 = vst.msk [vmem:[#allocation5 + $0x10] sm:$0xf] %vm9134_vm8, %v9130_v59  ;;  %v9099_v12 = vsel %vm4556_vm6, %v9091_v39, %v9034_v19  ;;  %v4558_v47 = vsel %vm4556_vm6, %v4549_v4, %v11594_v25  ;;  %v11598_v39 = vld [vmem:[#allocation56_spill] sm:$0xff]  ;;  %v9090_v53 = vsel %vm4547_vm5, %v9082_v24, %v11221_v48  ;;  %v9068_v16 = vsel %vm4520_vm2, %v11126_v17, %v11134_v56 }
 0x50d   :  { %v9115_v33 = vrot.slane %v9099_v12, 6  ;;  %v4542_v59 = vsel %vm4538_vm4, %v4533_v46, %v11598_v39  ;;  %v4526_v12 = vsel %vm4520_vm2, %v4517_v5, %v11601_v2  ;;  %v4519_v48 = vsel %vm4511_vm1, %v4510_v52, %v11607_v55  ;;  %v11613_v4 = vld [vmem:[#allocation68_spill] sm:$0xff] }
 0x50e   :  { %v4551_v49 = vsel %vm4547_vm5, %v4542_v59, %v11600_v11  ;;  %v4535_v28 = vsel %vm4529_vm3, %v4526_v12, %v11603_v32  ;;  %v4528_v45 = vsel %vm4520_vm2, %v4519_v48, %v11609_v29 }
 0x50f   :  { %v9132_v7 = vsel %vm9125_vm7, %v4563_v22, %v9115_v33  ;;  %v9024_v43 = vpop.permute.xlu1 %9023  ;;  %v4560_v44 = vsel %vm4556_vm6, %v4551_v49, %v11602_v1  ;;  %v4544_v22 = vsel %vm4538_vm4, %v4535_v28, %v11606_v40  ;;  %v4537_v36 = vsel %vm4529_vm3, %v4528_v45, %v11611_v62 }
 0x510   :  { %9141 = vst.msk [vmem:[#allocation5 + $0x18] sm:$0xf] %vm9134_vm8, %v9132_v7  ;;  %v9094_v63 = vsel %vm4556_vm6, %v9086_v6, %v9024_v43  ;;  %v4553_v6 = vsel %vm4547_vm5, %v4544_v22, %v11608_v42  ;;  %v9076_v7 = vsel %vm4529_vm3, %v9068_v16, %v11144_v23  ;;  %v11612_v23 = vld [vmem:[#allocation60_spill] sm:$0xff] }
 0x511   :  { %v9110_v3 = vrot.slane %v9094_v63, 6  ;;  %v4562_v17 = vsel %vm4556_vm6, %v4553_v6, %v11610_v50  ;;  %v9084_v56 = vsel %vm4538_vm4, %v9076_v7, %v11154_v37  ;;  %v4546_v26 = vsel %vm4538_vm4, %v4537_v36, %v11612_v23 }
 0x512   :  { %v9092_v34 = vsel %vm4547_vm5, %v9084_v56, %v11250_v60  ;;  %v4555_v37 = vsel %vm4547_vm5, %v4546_v26, %v11613_v4 }
 0x513   :  { %v9127_v9 = vsel %vm9125_vm7, %v4558_v47, %v9110_v3  ;;  %v9028_v8 = vpop.permute.xlu1 %9027  ;;  %v11614_v3 = vld [vmem:[#allocation73_spill] sm:$0xff] }
 0x514   :  { %9136 = vst.msk [vmem:[#allocation5 + $0x4] sm:$0xf] %vm9134_vm8, %v9127_v9  ;;  %v9096_v19 = vsel %vm4556_vm6, %v9088_v14, %v9028_v8  ;;  %v4564_v31 = vsel %vm4556_vm6, %v4555_v37, %v11614_v3 }
 0x515   :  { %v9112_v0 = vrot.slane %v9096_v19, 6 }
 0x517   :  { %v9129_v61 = vsel %vm9125_vm7, %v4560_v44, %v9112_v0  ;;  %v9032_v33 = vpop.permute.xlu1 %9031 }
 0x518   :  { %9138 = vst.msk [vmem:[#allocation5 + $0xc] sm:$0xf] %vm9134_vm8, %v9129_v61  ;;  %v9098_v58 = vsel %vm4556_vm6, %v9090_v53, %v9032_v33 }
 0x519   :  { %v9114_v43 = vrot.slane %v9098_v58, 6 }
 0x51b   :  { %v9131_v63 = vsel %vm9125_vm7, %v4562_v17, %v9114_v43  ;;  %v9036_v21 = vpop.permute.xlu1 %9035 }
 0x51c   :  { %9140 = vst.msk [vmem:[#allocation5 + $0x14] sm:$0xf] %vm9134_vm8, %v9131_v63  ;;  %v9100_v13 = vsel %vm4556_vm6, %v9092_v34, %v9036_v21 }
 0x51d   :  { %v9116_v38 = vrot.slane %v9100_v13, 6 }
 0x51f   :  { %v9133_v60 = vsel %vm9125_vm7, %v4564_v31, %v9116_v38 }
 0x520   :  { %9142 = vst.msk [vmem:[#allocation5 + $0x1c] sm:$0xf] %vm9134_vm8, %v9133_v60 }
 0x521   :  { %9231 = shalt.err (!%p9228_p12)
}
 0x522   :  { %s9232_s8 = scalar_lea.hbm %s11383_s1, 512 }
 0x523   :  { %p9233_p13 = scmp.ne.s32.totalorder %s11383_s1, %s9232_s8  ;;  %p9236_p0 = scmp.lt.u32.totalorder %s9232_s8, %s11383_s1 }
 0x525   :  { %p9238_p1 = pnand %p9236_p0, %p9233_p13 }
 0x527   :  { %9241 = shalt.err (!%p9238_p1)
}
 0x528   :  { %s9266_s13 = smov 64   ;;  %s9267_s14 = smov 4  }
 0x529   :  { %9154 = dma.vmem_to_hbm [thread:$0]  %s9149_s4, 512, %s11383_s1, [#allocation4], %s9266_s13, %s9266_s13, %s9267_s14  }
 0x52a   :  { %9244 = dma.done.wait [#allocation4], 512  }
 0x52b   :  { %9245 = vsyncadd [#allocation4], 4294966784 }
 0x52c   :  { %9158 = vsyncpa [#allocation3], 1 }
 0x52d   :  { %9159 = vsyncpa [#allocation4], 1 }

</bundles_post_ra>
